<compile_context>
chip_gen: v5e
topology: v5e:2x2
jax: 0.10.0
libtpu: 0.0.40
codegen_flags: <defaults>
</compile_context>

<pallas_src>
import functools
import math

import numpy as np
import jax
import jax.numpy as jnp
from jax.experimental import pallas as pl
from jax.experimental.pallas import tpu as pltpu


# ----------------------------- fused decoder-stack kernel -----------------------------

def _bf16_dot(x, w):
    # MXU-friendly: bf16 operands, f32 accumulation.
    return jnp.dot(x.astype(jnp.bfloat16), w.astype(jnp.bfloat16),
                   preferred_element_type=jnp.float32)


def _decoder_stack_kernel(
    h0_ref, enc_ref, tmb_ref, xmb_ref,
    wqkv1_ref, bqkv1_ref, wo1_ref, bo1_ref, g1_ref, be1_ref,
    wq2_ref, bq2_ref, wkv2_ref, bkv2_ref, wo2_ref, bo2_ref, g2_ref, be2_ref,
    w1_ref, b1_ref, w2_ref, b2_ref, g3_ref, be3_ref,
    out_ref, *, heads, eps):
    """Grid = (B, N).  One batch element per b-step; layers iterate along n.

    The running activation is carried in the (revisited) output block, which
    stays resident in VMEM across the layer axis."""
    n = pl.program_id(1)

    E = h0_ref.shape[-1]
    dk = E // heads
    scale = 1.0 / math.sqrt(dk)

    # Initialize the carried activation with the (2*emb + PE) input.
    @pl.when(n == 0)
    def _():
        out_ref[...] = h0_ref[...]

    x = out_ref[...]          # (S, E)   activation carried across layers
    enc = enc_ref[...]        # (Ss, E)  encoder output (resident across n)

    def layer_norm_res(v, res, g, b):
        # LayerNorm(v + res) with torch.std semantics (unbiased, eps on std).
        z = v + res
        mean = jnp.mean(z, axis=-1, keepdims=True)
        d = z - mean
        var = jnp.sum(d * d, axis=-1, keepdims=True) / (z.shape[-1] - 1)
        std = jnp.sqrt(var)
        return g * d / (std + eps) + b

    def mha(q_all, k_all, v_all, bias, wo, bo):
        # q_all: (Sq, E); k_all, v_all: (Sk, E); bias: (Sq, Sk) additive.
        # Heads are processed as static lane-slices; the per-head context is
        # folded directly into the output projection (block matmul), so no
        # concat / transpose is needed.
        acc = jnp.zeros((q_all.shape[0], E), jnp.float32)
        for h in range(heads):
            lo, hi = h * dk, (h + 1) * dk
            qh = q_all[:, lo:hi].astype(jnp.bfloat16)
            kh_t = k_all[:, lo:hi].T.astype(jnp.bfloat16)
            vh = v_all[:, lo:hi].astype(jnp.bfloat16)
            s = jnp.dot(qh, kh_t, preferred_element_type=jnp.float32) * scale + bias
            s = s - jnp.max(s, axis=-1, keepdims=True)
            p = jnp.exp(s)
            p = p * pl.reciprocal(jnp.sum(p, axis=-1, keepdims=True), approx=True)
            oh = jnp.dot(p.astype(jnp.bfloat16), vh,
                         preferred_element_type=jnp.float32)
            acc = acc + _bf16_dot(oh, wo[lo:hi, :])
        return acc + bo

    # ---- self attention (fused QKV projection) ----
    qkv = _bf16_dot(x, wqkv1_ref[...]) + bqkv1_ref[...]          # (S, 3E)
    a1 = mha(qkv[:, :E], qkv[:, E:2 * E], qkv[:, 2 * E:],
             tmb_ref[...], wo1_ref[...], bo1_ref[...])
    x1 = layer_norm_res(a1, x, g1_ref[...], be1_ref[...])

    # ---- cross attention (fused K/V projection of encoder output) ----
    q2 = _bf16_dot(x1, wq2_ref[...]) + bq2_ref[...]              # (S, E)
    kv2 = _bf16_dot(enc, wkv2_ref[...]) + bkv2_ref[...]          # (Ss, 2E)
    a2 = mha(q2, kv2[:, :E], kv2[:, E:],
             xmb_ref[...], wo2_ref[...], bo2_ref[...])
    x2 = layer_norm_res(a2, x1, g2_ref[...], be2_ref[...])

    # ---- feed forward: Linear(E,2048) -> ReLU -> Linear(2048,E) ----
    hmid = jnp.maximum(_bf16_dot(x2, w1_ref[...]) + b1_ref[...], 0.0)
    ff = _bf16_dot(hmid, w2_ref[...]) + b2_ref[...]
    out_ref[...] = layer_norm_res(ff, x2, g3_ref[...], be3_ref[...])


_WEIGHT_ORDER = ["wqkv1", "bqkv1", "wo1", "bo1", "g1", "be1",
                 "wq2", "bq2", "wkv2", "bkv2", "wo2", "bo2", "g2", "be2",
                 "w1", "b1", "w2", "b2", "g3", "be3"]


def decoder_stack(h0, enc, tmask_bias, xmask_bias, layer_params, heads):
    B, S, E = h0.shape
    N = layer_params["wqkv1"].shape[0]

    def act_spec(a):       # per-batch activation block, resident across layers
        return pl.BlockSpec((None,) + a.shape[1:], lambda b, n: (b, 0, 0))

    def layer_spec(a):     # per-layer weight block (pipelined along n)
        return pl.BlockSpec((None,) + a.shape[1:], lambda b, n: (n, 0, 0))

    weights = [layer_params[k] for k in _WEIGHT_ORDER]

    return pl.pallas_call(
        functools.partial(_decoder_stack_kernel, heads=heads, eps=1e-6),
        out_shape=jax.ShapeDtypeStruct((B, S, E), jnp.float32),
        grid=(B, N),
        in_specs=[act_spec(h0), act_spec(enc),
                  act_spec(tmask_bias), act_spec(xmask_bias)]
                 + [layer_spec(w) for w in weights],
        out_specs=pl.BlockSpec((None, S, E), lambda b, n: (b, 0, 0)),
        compiler_params=pltpu.CompilerParams(
            dimension_semantics=("parallel", "arbitrary")),
    )(h0, enc, tmask_bias, xmask_bias, *weights)


# ----------------------------- model glue (plain JAX) -----------------------------

def decoder_forward(params, encoder_out, x, x_mask, target_mask, heads):
    # TODO(synk): token-id embedding gather stays in XLA (no clean tiny-shape
    # Pallas gather); everything after it runs in the single fused kernel.
    emb = params["embedding"][x]                 # (B, S, E)
    S = x.shape[1]
    pe = params["pos_encoding"][:S]
    h0 = 2.0 * emb + pe                          # emb + (emb + PE), per reference

    # Precompute additive mask biases: mask==1 -> 0, mask==0 -> -1e10.
    tmask_bias = (target_mask - 1.0) * 1e10
    xmask_bias = (x_mask - 1.0) * 1e10
    return decoder_stack(h0, encoder_out, tmask_bias, xmask_bias,
                         params["layers"], heads)


# ----------------------------- parameter init -----------------------------

def make_positional_encoding(sentence_len, E):
    pe = np.zeros((sentence_len, E), dtype=np.float32)
    pos = np.arange(sentence_len, dtype=np.float64)[:, None]
    i = np.arange(E // 2, dtype=np.float64)[None, :]
    angle = pos / np.power(10000.0, 2.0 * i / E)
    pe[:, 0::2] = np.sin(angle)
    pe[:, 1::2] = np.cos(angle)
    return jnp.asarray(pe)


def init_params(key, vocab, E, heads, N, inner=2048, sentence_len=128):
    keys = iter(jax.random.split(key, 1 + 10 * N))

    def lin(din, dout):
        k = next(keys)
        w = jax.random.normal(k, (din, dout), jnp.float32) / math.sqrt(din)
        b = jnp.zeros((1, dout), jnp.float32)
        return w, b

    emb = jax.random.normal(next(keys), (vocab, E), jnp.float32) * 0.02

    acc = {k: [] for k in _WEIGHT_ORDER}
    ones = jnp.ones((1, E), jnp.float32)
    zeros = jnp.zeros((1, E), jnp.float32)
    for _ in range(N):
        # self-attention: fused QKV weight/bias
        wq, bq = lin(E, E); wk, bk = lin(E, E); wv, bv = lin(E, E)
        acc["wqkv1"].append(jnp.concatenate([wq, wk, wv], axis=1))
        acc["bqkv1"].append(jnp.concatenate([bq, bk, bv], axis=1))
        wo, bo = lin(E, E)
        acc["wo1"].append(wo); acc["bo1"].append(bo)
        acc["g1"].append(ones); acc["be1"].append(zeros)
        # cross-attention: separate Q, fused K/V
        wq2, bq2 = lin(E, E)
        acc["wq2"].append(wq2); acc["bq2"].append(bq2)
        wk2, bk2 = lin(E, E); wv2, bv2 = lin(E, E)
        acc["wkv2"].append(jnp.concatenate([wk2, wv2], axis=1))
        acc["bkv2"].append(jnp.concatenate([bk2, bv2], axis=1))
        wo2, bo2 = lin(E, E)
        acc["wo2"].append(wo2); acc["bo2"].append(bo2)
        acc["g2"].append(ones); acc["be2"].append(zeros)
        # feed-forward
        w1, b1 = lin(E, inner)
        w2, b2 = lin(inner, E)
        acc["w1"].append(w1); acc["b1"].append(b1)
        acc["w2"].append(w2); acc["b2"].append(b2)
        acc["g3"].append(ones); acc["be3"].append(zeros)

    layers = {k: jnp.stack(v, axis=0) for k, v in acc.items()}
    return dict(embedding=emb,
                pos_encoding=make_positional_encoding(sentence_len, E),
                layers=layers)


# ----------------------------- main -----------------------------

if __name__ == "__main__":
    B, S_TGT, S_SRC = 2, 8, 8
    E, HEADS, N_LAYERS = 32, 4, 2
    VOCAB = 50

    root = jax.random.PRNGKey(0)
    k_par, k_x, k_enc = jax.random.split(root, 3)

    params = init_params(k_par, VOCAB, E, HEADS, N_LAYERS)

    x = jax.random.randint(k_x, (B, S_TGT), 0, VOCAB, dtype=jnp.int32)
    encoder_out = jax.random.normal(k_enc, (B, S_SRC, E), jnp.float32)

    # target_mask: causal (B, S_tgt, S_tgt); x_mask: all-ones (B, S_tgt, S_src)
    target_mask = jnp.broadcast_to(
        jnp.tril(jnp.ones((S_TGT, S_TGT), jnp.float32)), (B, S_TGT, S_TGT))
    x_mask = jnp.ones((B, S_TGT, S_SRC), jnp.float32)

    fwd = jax.jit(functools.partial(decoder_forward, heads=HEADS))
    out = fwd(params, encoder_out, x, x_mask, target_mask)
    out = jax.block_until_ready(out)
    assert out.shape == (B, S_TGT, E) and out.dtype == jnp.float32
    print("KERNEL_OK")
</pallas_src>

<mosaic_0001>
module attributes {stable_mosaic.version = 11 : i64} {
  func.func @_decoder_stack_kernel(%arg0: i32, %arg1: i32, %arg2: memref<1x8x32xf32, #tpu.memory_space<vmem>>, %arg3: memref<1x8x32xf32, #tpu.memory_space<vmem>>, %arg4: memref<1x8x8xf32, #tpu.memory_space<vmem>>, %arg5: memref<1x8x8xf32, #tpu.memory_space<vmem>>, %arg6: memref<1x32x96xf32, #tpu.memory_space<vmem>>, %arg7: memref<1x1x96xf32, #tpu.memory_space<vmem>>, %arg8: memref<1x32x32xf32, #tpu.memory_space<vmem>>, %arg9: memref<1x1x32xf32, #tpu.memory_space<vmem>>, %arg10: memref<1x1x32xf32, #tpu.memory_space<vmem>>, %arg11: memref<1x1x32xf32, #tpu.memory_space<vmem>>, %arg12: memref<1x32x32xf32, #tpu.memory_space<vmem>>, %arg13: memref<1x1x32xf32, #tpu.memory_space<vmem>>, %arg14: memref<1x32x64xf32, #tpu.memory_space<vmem>>, %arg15: memref<1x1x64xf32, #tpu.memory_space<vmem>>, %arg16: memref<1x32x32xf32, #tpu.memory_space<vmem>>, %arg17: memref<1x1x32xf32, #tpu.memory_space<vmem>>, %arg18: memref<1x1x32xf32, #tpu.memory_space<vmem>>, %arg19: memref<1x1x32xf32, #tpu.memory_space<vmem>>, %arg20: memref<1x32x2048xf32, #tpu.memory_space<vmem>>, %arg21: memref<1x1x2048xf32, #tpu.memory_space<vmem>>, %arg22: memref<1x2048x32xf32, #tpu.memory_space<vmem>>, %arg23: memref<1x1x32xf32, #tpu.memory_space<vmem>>, %arg24: memref<1x1x32xf32, #tpu.memory_space<vmem>>, %arg25: memref<1x1x32xf32, #tpu.memory_space<vmem>>, %arg26: memref<1x8x32xf32, #tpu.memory_space<vmem>>) attributes {dimension_semantics = [#tpu.dimension_semantics<parallel>, #tpu.dimension_semantics<arbitrary>], iteration_bounds = array<i64: 2, 2>, scalar_prefetch = 0 : i64, scratch_operands = 0 : i64, tpu.core_type = #tpu.core_type<tc>, window_params = [{transform_indices = @transform_0, window_bounds = array<i64: 1, 8, 32>}, {transform_indices = @transform_1, window_bounds = array<i64: 1, 8, 32>}, {transform_indices = @transform_2, window_bounds = array<i64: 1, 8, 8>}, {transform_indices = @transform_3, window_bounds = array<i64: 1, 8, 8>}, {transform_indices = @transform_4, window_bounds = array<i64: 1, 32, 96>}, {transform_indices = @transform_5, window_bounds = array<i64: 1, 1, 96>}, {transform_indices = @transform_6, window_bounds = array<i64: 1, 32, 32>}, {transform_indices = @transform_7, window_bounds = array<i64: 1, 1, 32>}, {transform_indices = @transform_8, window_bounds = array<i64: 1, 1, 32>}, {transform_indices = @transform_9, window_bounds = array<i64: 1, 1, 32>}, {transform_indices = @transform_10, window_bounds = array<i64: 1, 32, 32>}, {transform_indices = @transform_11, window_bounds = array<i64: 1, 1, 32>}, {transform_indices = @transform_12, window_bounds = array<i64: 1, 32, 64>}, {transform_indices = @transform_13, window_bounds = array<i64: 1, 1, 64>}, {transform_indices = @transform_14, window_bounds = array<i64: 1, 32, 32>}, {transform_indices = @transform_15, window_bounds = array<i64: 1, 1, 32>}, {transform_indices = @transform_16, window_bounds = array<i64: 1, 1, 32>}, {transform_indices = @transform_17, window_bounds = array<i64: 1, 1, 32>}, {transform_indices = @transform_18, window_bounds = array<i64: 1, 32, 2048>}, {transform_indices = @transform_19, window_bounds = array<i64: 1, 1, 2048>}, {transform_indices = @transform_20, window_bounds = array<i64: 1, 2048, 32>}, {transform_indices = @transform_21, window_bounds = array<i64: 1, 1, 32>}, {transform_indices = @transform_22, window_bounds = array<i64: 1, 1, 32>}, {transform_indices = @transform_23, window_bounds = array<i64: 1, 1, 32>}, {transform_indices = @transform_24, window_bounds = array<i64: 1, 8, 32>}]} {
    %c0_i32 = arith.constant 0 : i32
    %0 = arith.cmpi eq, %arg1, %c0_i32 : i32
    %1 = arith.extui %0 : i1 to i32
    %c0_i32_0 = arith.constant 0 : i32
    %2 = arith.cmpi ne, %1, %c0_i32_0 : i32
    scf.if %2 {
      %c0_145 = arith.constant 0 : index
      %c0_146 = arith.constant 0 : index
      %c0_147 = arith.constant 0 : index
      %379 = vector.load %arg2[%c0_145, %c0_146, %c0_147] : memref<1x8x32xf32, #tpu.memory_space<vmem>>, vector<1x8x32xf32>
      %380 = vector.shape_cast %379 : vector<1x8x32xf32> to vector<8x32xf32>
      %c0_148 = arith.constant 0 : index
      %c0_149 = arith.constant 0 : index
      %c0_150 = arith.constant 0 : index
      %381 = vector.load %arg26[%c0_148, %c0_149, %c0_150] : memref<1x8x32xf32, #tpu.memory_space<vmem>>, vector<1x8x32xf32>
      %382 = vector.shape_cast %381 : vector<1x8x32xf32> to vector<8x32xf32>
      %383 = vector.shape_cast %380 : vector<8x32xf32> to vector<1x8x32xf32>
      tpu.vector_store %arg26[%c0_148, %c0_149, %c0_150], %383 {strides = array<i32>} : memref<1x8x32xf32, #tpu.memory_space<vmem>>, vector<1x8x32xf32>,
    } else {
    }
    %c0 = arith.constant 0 : index
    %c0_1 = arith.constant 0 : index
    %c0_2 = arith.constant 0 : index
    %3 = vector.load %arg26[%c0, %c0_1, %c0_2] : memref<1x8x32xf32, #tpu.memory_space<vmem>>, vector<1x8x32xf32>
    %4 = vector.shape_cast %3 : vector<1x8x32xf32> to vector<8x32xf32>
    %c0_3 = arith.constant 0 : index
    %c0_4 = arith.constant 0 : index
    %c0_5 = arith.constant 0 : index
    %5 = vector.load %arg3[%c0_3, %c0_4, %c0_5] : memref<1x8x32xf32, #tpu.memory_space<vmem>>, vector<1x8x32xf32>
    %6 = vector.shape_cast %5 : vector<1x8x32xf32> to vector<8x32xf32>
    %c0_6 = arith.constant 0 : index
    %c0_7 = arith.constant 0 : index
    %c0_8 = arith.constant 0 : index
    %7 = vector.load %arg6[%c0_6, %c0_7, %c0_8] : memref<1x32x96xf32, #tpu.memory_space<vmem>>, vector<1x32x96xf32>
    %8 = vector.shape_cast %7 : vector<1x32x96xf32> to vector<32x96xf32>
    %9 = arith.truncf %4 : vector<8x32xf32> to vector<8x32xbf16>
    %10 = arith.truncf %8 : vector<32x96xf32> to vector<32x96xbf16>
    %cst = arith.constant dense<0.000000e+00> : vector<8x96xf32>
    %11 = tpu.matmul %9, %10, %cst {dimension_numbers = #tpu.dot_dimension_numbers<[1], [0], [0], [1], [0, 0, 1, 1], [], []>} : vector<8x32xbf16>, vector<32x96xbf16>, vector<8x96xf32> -> vector<8x96xf32>
    %c0_9 = arith.constant 0 : index
    %c0_10 = arith.constant 0 : index
    %c0_11 = arith.constant 0 : index
    %12 = vector.load %arg7[%c0_9, %c0_10, %c0_11] : memref<1x1x96xf32, #tpu.memory_space<vmem>>, vector<1x1x96xf32>
    %13 = vector.shape_cast %12 : vector<1x1x96xf32> to vector<1x96xf32>
    %14 = vector.broadcast %13 : vector<1x96xf32> to vector<8x96xf32>
    %15 = arith.addf %11, %14 : vector<8x96xf32>
    %16 = vector.extract_strided_slice %15 {offsets = [0, 0], sizes = [8, 32], strides = [1, 1]} : vector<8x96xf32> to vector<8x32xf32>
    %17 = vector.extract_strided_slice %15 {offsets = [0, 32], sizes = [8, 32], strides = [1, 1]} : vector<8x96xf32> to vector<8x32xf32>
    %18 = vector.extract_strided_slice %15 {offsets = [0, 64], sizes = [8, 32], strides = [1, 1]} : vector<8x96xf32> to vector<8x32xf32>
    %c0_12 = arith.constant 0 : index
    %c0_13 = arith.constant 0 : index
    %c0_14 = arith.constant 0 : index
    %19 = vector.load %arg4[%c0_12, %c0_13, %c0_14] : memref<1x8x8xf32, #tpu.memory_space<vmem>>, vector<1x8x8xf32>
    %20 = vector.shape_cast %19 : vector<1x8x8xf32> to vector<8x8xf32>
    %c0_15 = arith.constant 0 : index
    %c0_16 = arith.constant 0 : index
    %c0_17 = arith.constant 0 : index
    %21 = vector.load %arg8[%c0_15, %c0_16, %c0_17] : memref<1x32x32xf32, #tpu.memory_space<vmem>>, vector<1x32x32xf32>
    %22 = vector.shape_cast %21 : vector<1x32x32xf32> to vector<32x32xf32>
    %c0_18 = arith.constant 0 : index
    %c0_19 = arith.constant 0 : index
    %c0_20 = arith.constant 0 : index
    %23 = vector.load %arg9[%c0_18, %c0_19, %c0_20] : memref<1x1x32xf32, #tpu.memory_space<vmem>>, vector<1x1x32xf32>
    %24 = vector.shape_cast %23 : vector<1x1x32xf32> to vector<1x32xf32>
    %cst_21 = arith.constant 0.000000e+00 : f32
    %25 = vector.broadcast %cst_21 : f32 to vector<8x32xf32>
    %26 = vector.extract_strided_slice %16 {offsets = [0, 0], sizes = [8, 8], strides = [1, 1]} : vector<8x32xf32> to vector<8x8xf32>
    %27 = arith.truncf %26 : vector<8x8xf32> to vector<8x8xbf16>
    %28 = vector.extract_strided_slice %17 {offsets = [0, 0], sizes = [8, 8], strides = [1, 1]} : vector<8x32xf32> to vector<8x8xf32>
    %29 = tpu.transpose %28, [1, 0] : vector<8x8xf32> -> vector<8x8xf32>
    %30 = arith.truncf %29 : vector<8x8xf32> to vector<8x8xbf16>
    %31 = vector.extract_strided_slice %18 {offsets = [0, 0], sizes = [8, 8], strides = [1, 1]} : vector<8x32xf32> to vector<8x8xf32>
    %32 = arith.truncf %31 : vector<8x8xf32> to vector<8x8xbf16>
    %cst_22 = arith.constant dense<0.000000e+00> : vector<8x8xf32>
    %33 = tpu.matmul %27, %30, %cst_22 {dimension_numbers = #tpu.dot_dimension_numbers<[1], [0], [0], [1], [0, 0, 1, 1], [], []>} : vector<8x8xbf16>, vector<8x8xbf16>, vector<8x8xf32> -> vector<8x8xf32>
    %cst_23 = arith.constant 0.353553385 : f32
    %34 = vector.broadcast %cst_23 : f32 to vector<8x8xf32>
    %35 = arith.mulf %33, %34 : vector<8x8xf32>
    %36 = arith.addf %35, %20 : vector<8x8xf32>
    %cst_24 = arith.constant dense<0xFF800000> : vector<8xf32>
    %37 = vector.multi_reduction <maximumf>, %36, %cst_24 [1] : vector<8x8xf32> to vector<8xf32>
    %38 = vector.shape_cast %37 : vector<8xf32> to vector<8x1xf32>
    %39 = vector.broadcast %38 : vector<8x1xf32> to vector<8x8xf32>
    %40 = arith.subf %36, %39 : vector<8x8xf32>
    %41 = math.exp %40 : vector<8x8xf32>
    %cst_25 = arith.constant dense<0.000000e+00> : vector<8xf32>
    %42 = vector.multi_reduction <add>, %41, %cst_25 [1] : vector<8x8xf32> to vector<8xf32>
    %43 = vector.shape_cast %42 : vector<8xf32> to vector<8x1xf32>
    %44 = tpu.reciprocal %43 {approx = true} : vector<8x1xf32> -> vector<8x1xf32>
    %45 = vector.broadcast %44 : vector<8x1xf32> to vector<8x8xf32>
    %46 = arith.mulf %41, %45 : vector<8x8xf32>
    %47 = arith.truncf %46 : vector<8x8xf32> to vector<8x8xbf16>
    %cst_26 = arith.constant dense<0.000000e+00> : vector<8x8xf32>
    %48 = tpu.matmul %47, %32, %cst_26 {dimension_numbers = #tpu.dot_dimension_numbers<[1], [0], [0], [1], [0, 0, 1, 1], [], []>} : vector<8x8xbf16>, vector<8x8xbf16>, vector<8x8xf32> -> vector<8x8xf32>
    %49 = vector.extract_strided_slice %22 {offsets = [0, 0], sizes = [8, 32], strides = [1, 1]} : vector<32x32xf32> to vector<8x32xf32>
    %50 = arith.truncf %48 : vector<8x8xf32> to vector<8x8xbf16>
    %51 = arith.truncf %49 : vector<8x32xf32> to vector<8x32xbf16>
    %cst_27 = arith.constant dense<0.000000e+00> : vector<8x32xf32>
    %52 = tpu.matmul %50, %51, %cst_27 {dimension_numbers = #tpu.dot_dimension_numbers<[1], [0], [0], [1], [0, 0, 1, 1], [], []>} : vector<8x8xbf16>, vector<8x32xbf16>, vector<8x32xf32> -> vector<8x32xf32>
    %53 = arith.addf %25, %52 : vector<8x32xf32>
    %54 = vector.extract_strided_slice %16 {offsets = [0, 8], sizes = [8, 8], strides = [1, 1]} : vector<8x32xf32> to vector<8x8xf32>
    %55 = arith.truncf %54 : vector<8x8xf32> to vector<8x8xbf16>
    %56 = vector.extract_strided_slice %17 {offsets = [0, 8], sizes = [8, 8], strides = [1, 1]} : vector<8x32xf32> to vector<8x8xf32>
    %57 = tpu.transpose %56, [1, 0] : vector<8x8xf32> -> vector<8x8xf32>
    %58 = arith.truncf %57 : vector<8x8xf32> to vector<8x8xbf16>
    %59 = vector.extract_strided_slice %18 {offsets = [0, 8], sizes = [8, 8], strides = [1, 1]} : vector<8x32xf32> to vector<8x8xf32>
    %60 = arith.truncf %59 : vector<8x8xf32> to vector<8x8xbf16>
    %cst_28 = arith.constant dense<0.000000e+00> : vector<8x8xf32>
    %61 = tpu.matmul %55, %58, %cst_28 {dimension_numbers = #tpu.dot_dimension_numbers<[1], [0], [0], [1], [0, 0, 1, 1], [], []>} : vector<8x8xbf16>, vector<8x8xbf16>, vector<8x8xf32> -> vector<8x8xf32>
    %cst_29 = arith.constant 0.353553385 : f32
    %62 = vector.broadcast %cst_29 : f32 to vector<8x8xf32>
    %63 = arith.mulf %61, %62 : vector<8x8xf32>
    %64 = arith.addf %63, %20 : vector<8x8xf32>
    %cst_30 = arith.constant dense<0xFF800000> : vector<8xf32>
    %65 = vector.multi_reduction <maximumf>, %64, %cst_30 [1] : vector<8x8xf32> to vector<8xf32>
    %66 = vector.shape_cast %65 : vector<8xf32> to vector<8x1xf32>
    %67 = vector.broadcast %66 : vector<8x1xf32> to vector<8x8xf32>
    %68 = arith.subf %64, %67 : vector<8x8xf32>
    %69 = math.exp %68 : vector<8x8xf32>
    %cst_31 = arith.constant dense<0.000000e+00> : vector<8xf32>
    %70 = vector.multi_reduction <add>, %69, %cst_31 [1] : vector<8x8xf32> to vector<8xf32>
    %71 = vector.shape_cast %70 : vector<8xf32> to vector<8x1xf32>
    %72 = tpu.reciprocal %71 {approx = true} : vector<8x1xf32> -> vector<8x1xf32>
    %73 = vector.broadcast %72 : vector<8x1xf32> to vector<8x8xf32>
    %74 = arith.mulf %69, %73 : vector<8x8xf32>
    %75 = arith.truncf %74 : vector<8x8xf32> to vector<8x8xbf16>
    %cst_32 = arith.constant dense<0.000000e+00> : vector<8x8xf32>
    %76 = tpu.matmul %75, %60, %cst_32 {dimension_numbers = #tpu.dot_dimension_numbers<[1], [0], [0], [1], [0, 0, 1, 1], [], []>} : vector<8x8xbf16>, vector<8x8xbf16>, vector<8x8xf32> -> vector<8x8xf32>
    %77 = vector.extract_strided_slice %22 {offsets = [8, 0], sizes = [8, 32], strides = [1, 1]} : vector<32x32xf32> to vector<8x32xf32>
    %78 = arith.truncf %76 : vector<8x8xf32> to vector<8x8xbf16>
    %79 = arith.truncf %77 : vector<8x32xf32> to vector<8x32xbf16>
    %cst_33 = arith.constant dense<0.000000e+00> : vector<8x32xf32>
    %80 = tpu.matmul %78, %79, %cst_33 {dimension_numbers = #tpu.dot_dimension_numbers<[1], [0], [0], [1], [0, 0, 1, 1], [], []>} : vector<8x8xbf16>, vector<8x32xbf16>, vector<8x32xf32> -> vector<8x32xf32>
    %81 = arith.addf %53, %80 : vector<8x32xf32>
    %82 = vector.extract_strided_slice %16 {offsets = [0, 16], sizes = [8, 8], strides = [1, 1]} : vector<8x32xf32> to vector<8x8xf32>
    %83 = arith.truncf %82 : vector<8x8xf32> to vector<8x8xbf16>
    %84 = vector.extract_strided_slice %17 {offsets = [0, 16], sizes = [8, 8], strides = [1, 1]} : vector<8x32xf32> to vector<8x8xf32>
    %85 = tpu.transpose %84, [1, 0] : vector<8x8xf32> -> vector<8x8xf32>
    %86 = arith.truncf %85 : vector<8x8xf32> to vector<8x8xbf16>
    %87 = vector.extract_strided_slice %18 {offsets = [0, 16], sizes = [8, 8], strides = [1, 1]} : vector<8x32xf32> to vector<8x8xf32>
    %88 = arith.truncf %87 : vector<8x8xf32> to vector<8x8xbf16>
    %cst_34 = arith.constant dense<0.000000e+00> : vector<8x8xf32>
    %89 = tpu.matmul %83, %86, %cst_34 {dimension_numbers = #tpu.dot_dimension_numbers<[1], [0], [0], [1], [0, 0, 1, 1], [], []>} : vector<8x8xbf16>, vector<8x8xbf16>, vector<8x8xf32> -> vector<8x8xf32>
    %cst_35 = arith.constant 0.353553385 : f32
    %90 = vector.broadcast %cst_35 : f32 to vector<8x8xf32>
    %91 = arith.mulf %89, %90 : vector<8x8xf32>
    %92 = arith.addf %91, %20 : vector<8x8xf32>
    %cst_36 = arith.constant dense<0xFF800000> : vector<8xf32>
    %93 = vector.multi_reduction <maximumf>, %92, %cst_36 [1] : vector<8x8xf32> to vector<8xf32>
    %94 = vector.shape_cast %93 : vector<8xf32> to vector<8x1xf32>
    %95 = vector.broadcast %94 : vector<8x1xf32> to vector<8x8xf32>
    %96 = arith.subf %92, %95 : vector<8x8xf32>
    %97 = math.exp %96 : vector<8x8xf32>
    %cst_37 = arith.constant dense<0.000000e+00> : vector<8xf32>
    %98 = vector.multi_reduction <add>, %97, %cst_37 [1] : vector<8x8xf32> to vector<8xf32>
    %99 = vector.shape_cast %98 : vector<8xf32> to vector<8x1xf32>
    %100 = tpu.reciprocal %99 {approx = true} : vector<8x1xf32> -> vector<8x1xf32>
    %101 = vector.broadcast %100 : vector<8x1xf32> to vector<8x8xf32>
    %102 = arith.mulf %97, %101 : vector<8x8xf32>
    %103 = arith.truncf %102 : vector<8x8xf32> to vector<8x8xbf16>
    %cst_38 = arith.constant dense<0.000000e+00> : vector<8x8xf32>
    %104 = tpu.matmul %103, %88, %cst_38 {dimension_numbers = #tpu.dot_dimension_numbers<[1], [0], [0], [1], [0, 0, 1, 1], [], []>} : vector<8x8xbf16>, vector<8x8xbf16>, vector<8x8xf32> -> vector<8x8xf32>
    %105 = vector.extract_strided_slice %22 {offsets = [16, 0], sizes = [8, 32], strides = [1, 1]} : vector<32x32xf32> to vector<8x32xf32>
    %106 = arith.truncf %104 : vector<8x8xf32> to vector<8x8xbf16>
    %107 = arith.truncf %105 : vector<8x32xf32> to vector<8x32xbf16>
    %cst_39 = arith.constant dense<0.000000e+00> : vector<8x32xf32>
    %108 = tpu.matmul %106, %107, %cst_39 {dimension_numbers = #tpu.dot_dimension_numbers<[1], [0], [0], [1], [0, 0, 1, 1], [], []>} : vector<8x8xbf16>, vector<8x32xbf16>, vector<8x32xf32> -> vector<8x32xf32>
    %109 = arith.addf %81, %108 : vector<8x32xf32>
    %110 = vector.extract_strided_slice %16 {offsets = [0, 24], sizes = [8, 8], strides = [1, 1]} : vector<8x32xf32> to vector<8x8xf32>
    %111 = arith.truncf %110 : vector<8x8xf32> to vector<8x8xbf16>
    %112 = vector.extract_strided_slice %17 {offsets = [0, 24], sizes = [8, 8], strides = [1, 1]} : vector<8x32xf32> to vector<8x8xf32>
    %113 = tpu.transpose %112, [1, 0] : vector<8x8xf32> -> vector<8x8xf32>
    %114 = arith.truncf %113 : vector<8x8xf32> to vector<8x8xbf16>
    %115 = vector.extract_strided_slice %18 {offsets = [0, 24], sizes = [8, 8], strides = [1, 1]} : vector<8x32xf32> to vector<8x8xf32>
    %116 = arith.truncf %115 : vector<8x8xf32> to vector<8x8xbf16>
    %cst_40 = arith.constant dense<0.000000e+00> : vector<8x8xf32>
    %117 = tpu.matmul %111, %114, %cst_40 {dimension_numbers = #tpu.dot_dimension_numbers<[1], [0], [0], [1], [0, 0, 1, 1], [], []>} : vector<8x8xbf16>, vector<8x8xbf16>, vector<8x8xf32> -> vector<8x8xf32>
    %cst_41 = arith.constant 0.353553385 : f32
    %118 = vector.broadcast %cst_41 : f32 to vector<8x8xf32>
    %119 = arith.mulf %117, %118 : vector<8x8xf32>
    %120 = arith.addf %119, %20 : vector<8x8xf32>
    %cst_42 = arith.constant dense<0xFF800000> : vector<8xf32>
    %121 = vector.multi_reduction <maximumf>, %120, %cst_42 [1] : vector<8x8xf32> to vector<8xf32>
    %122 = vector.shape_cast %121 : vector<8xf32> to vector<8x1xf32>
    %123 = vector.broadcast %122 : vector<8x1xf32> to vector<8x8xf32>
    %124 = arith.subf %120, %123 : vector<8x8xf32>
    %125 = math.exp %124 : vector<8x8xf32>
    %cst_43 = arith.constant dense<0.000000e+00> : vector<8xf32>
    %126 = vector.multi_reduction <add>, %125, %cst_43 [1] : vector<8x8xf32> to vector<8xf32>
    %127 = vector.shape_cast %126 : vector<8xf32> to vector<8x1xf32>
    %128 = tpu.reciprocal %127 {approx = true} : vector<8x1xf32> -> vector<8x1xf32>
    %129 = vector.broadcast %128 : vector<8x1xf32> to vector<8x8xf32>
    %130 = arith.mulf %125, %129 : vector<8x8xf32>
    %131 = arith.truncf %130 : vector<8x8xf32> to vector<8x8xbf16>
    %cst_44 = arith.constant dense<0.000000e+00> : vector<8x8xf32>
    %132 = tpu.matmul %131, %116, %cst_44 {dimension_numbers = #tpu.dot_dimension_numbers<[1], [0], [0], [1], [0, 0, 1, 1], [], []>} : vector<8x8xbf16>, vector<8x8xbf16>, vector<8x8xf32> -> vector<8x8xf32>
    %133 = vector.extract_strided_slice %22 {offsets = [24, 0], sizes = [8, 32], strides = [1, 1]} : vector<32x32xf32> to vector<8x32xf32>
    %134 = arith.truncf %132 : vector<8x8xf32> to vector<8x8xbf16>
    %135 = arith.truncf %133 : vector<8x32xf32> to vector<8x32xbf16>
    %cst_45 = arith.constant dense<0.000000e+00> : vector<8x32xf32>
    %136 = tpu.matmul %134, %135, %cst_45 {dimension_numbers = #tpu.dot_dimension_numbers<[1], [0], [0], [1], [0, 0, 1, 1], [], []>} : vector<8x8xbf16>, vector<8x32xbf16>, vector<8x32xf32> -> vector<8x32xf32>
    %137 = arith.addf %109, %136 : vector<8x32xf32>
    %138 = vector.broadcast %24 : vector<1x32xf32> to vector<8x32xf32>
    %139 = arith.addf %137, %138 : vector<8x32xf32>
    %c0_46 = arith.constant 0 : index
    %c0_47 = arith.constant 0 : index
    %c0_48 = arith.constant 0 : index
    %140 = vector.load %arg10[%c0_46, %c0_47, %c0_48] : memref<1x1x32xf32, #tpu.memory_space<vmem>>, vector<1x1x32xf32>
    %141 = vector.shape_cast %140 : vector<1x1x32xf32> to vector<1x32xf32>
    %c0_49 = arith.constant 0 : index
    %c0_50 = arith.constant 0 : index
    %c0_51 = arith.constant 0 : index
    %142 = vector.load %arg11[%c0_49, %c0_50, %c0_51] : memref<1x1x32xf32, #tpu.memory_space<vmem>>, vector<1x1x32xf32>
    %143 = vector.shape_cast %142 : vector<1x1x32xf32> to vector<1x32xf32>
    %144 = arith.addf %139, %4 : vector<8x32xf32>
    %cst_52 = arith.constant dense<0.000000e+00> : vector<8xf32>
    %145 = vector.multi_reduction <add>, %144, %cst_52 [1] : vector<8x32xf32> to vector<8xf32>
    %146 = vector.shape_cast %145 : vector<8xf32> to vector<8x1xf32>
    %cst_53 = arith.constant 3.200000e+01 : f32
    %147 = vector.broadcast %cst_53 : f32 to vector<8x1xf32>
    %148 = arith.divf %146, %147 : vector<8x1xf32>
    %149 = vector.broadcast %148 : vector<8x1xf32> to vector<8x32xf32>
    %150 = arith.subf %144, %149 : vector<8x32xf32>
    %151 = arith.mulf %150, %150 : vector<8x32xf32>
    %cst_54 = arith.constant dense<0.000000e+00> : vector<8xf32>
    %152 = vector.multi_reduction <add>, %151, %cst_54 [1] : vector<8x32xf32> to vector<8xf32>
    %153 = vector.shape_cast %152 : vector<8xf32> to vector<8x1xf32>
    %cst_55 = arith.constant 3.100000e+01 : f32
    %154 = vector.broadcast %cst_55 : f32 to vector<8x1xf32>
    %155 = arith.divf %153, %154 : vector<8x1xf32>
    %156 = math.sqrt %155 : vector<8x1xf32>
    %157 = vector.broadcast %141 : vector<1x32xf32> to vector<8x32xf32>
    %158 = arith.mulf %157, %150 : vector<8x32xf32>
    %cst_56 = arith.constant 9.99999997E-7 : f32
    %159 = vector.broadcast %cst_56 : f32 to vector<8x1xf32>
    %160 = arith.addf %156, %159 : vector<8x1xf32>
    %161 = vector.broadcast %160 : vector<8x1xf32> to vector<8x32xf32>
    %162 = arith.divf %158, %161 : vector<8x32xf32>
    %163 = vector.broadcast %143 : vector<1x32xf32> to vector<8x32xf32>
    %164 = arith.addf %162, %163 : vector<8x32xf32>
    %c0_57 = arith.constant 0 : index
    %c0_58 = arith.constant 0 : index
    %c0_59 = arith.constant 0 : index
    %165 = vector.load %arg12[%c0_57, %c0_58, %c0_59] : memref<1x32x32xf32, #tpu.memory_space<vmem>>, vector<1x32x32xf32>
    %166 = vector.shape_cast %165 : vector<1x32x32xf32> to vector<32x32xf32>
    %167 = arith.truncf %164 : vector<8x32xf32> to vector<8x32xbf16>
    %168 = arith.truncf %166 : vector<32x32xf32> to vector<32x32xbf16>
    %cst_60 = arith.constant dense<0.000000e+00> : vector<8x32xf32>
    %169 = tpu.matmul %167, %168, %cst_60 {dimension_numbers = #tpu.dot_dimension_numbers<[1], [0], [0], [1], [0, 0, 1, 1], [], []>} : vector<8x32xbf16>, vector<32x32xbf16>, vector<8x32xf32> -> vector<8x32xf32>
    %c0_61 = arith.constant 0 : index
    %c0_62 = arith.constant 0 : index
    %c0_63 = arith.constant 0 : index
    %170 = vector.load %arg13[%c0_61, %c0_62, %c0_63] : memref<1x1x32xf32, #tpu.memory_space<vmem>>, vector<1x1x32xf32>
    %171 = vector.shape_cast %170 : vector<1x1x32xf32> to vector<1x32xf32>
    %172 = vector.broadcast %171 : vector<1x32xf32> to vector<8x32xf32>
    %173 = arith.addf %169, %172 : vector<8x32xf32>
    %c0_64 = arith.constant 0 : index
    %c0_65 = arith.constant 0 : index
    %c0_66 = arith.constant 0 : index
    %174 = vector.load %arg14[%c0_64, %c0_65, %c0_66] : memref<1x32x64xf32, #tpu.memory_space<vmem>>, vector<1x32x64xf32>
    %175 = vector.shape_cast %174 : vector<1x32x64xf32> to vector<32x64xf32>
    %176 = arith.truncf %6 : vector<8x32xf32> to vector<8x32xbf16>
    %177 = arith.truncf %175 : vector<32x64xf32> to vector<32x64xbf16>
    %cst_67 = arith.constant dense<0.000000e+00> : vector<8x64xf32>
    %178 = tpu.matmul %176, %177, %cst_67 {dimension_numbers = #tpu.dot_dimension_numbers<[1], [0], [0], [1], [0, 0, 1, 1], [], []>} : vector<8x32xbf16>, vector<32x64xbf16>, vector<8x64xf32> -> vector<8x64xf32>
    %c0_68 = arith.constant 0 : index
    %c0_69 = arith.constant 0 : index
    %c0_70 = arith.constant 0 : index
    %179 = vector.load %arg15[%c0_68, %c0_69, %c0_70] : memref<1x1x64xf32, #tpu.memory_space<vmem>>, vector<1x1x64xf32>
    %180 = vector.shape_cast %179 : vector<1x1x64xf32> to vector<1x64xf32>
    %181 = vector.broadcast %180 : vector<1x64xf32> to vector<8x64xf32>
    %182 = arith.addf %178, %181 : vector<8x64xf32>
    %183 = vector.extract_strided_slice %182 {offsets = [0, 0], sizes = [8, 32], strides = [1, 1]} : vector<8x64xf32> to vector<8x32xf32>
    %184 = vector.extract_strided_slice %182 {offsets = [0, 32], sizes = [8, 32], strides = [1, 1]} : vector<8x64xf32> to vector<8x32xf32>
    %c0_71 = arith.constant 0 : index
    %c0_72 = arith.constant 0 : index
    %c0_73 = arith.constant 0 : index
    %185 = vector.load %arg5[%c0_71, %c0_72, %c0_73] : memref<1x8x8xf32, #tpu.memory_space<vmem>>, vector<1x8x8xf32>
    %186 = vector.shape_cast %185 : vector<1x8x8xf32> to vector<8x8xf32>
    %c0_74 = arith.constant 0 : index
    %c0_75 = arith.constant 0 : index
    %c0_76 = arith.constant 0 : index
    %187 = vector.load %arg16[%c0_74, %c0_75, %c0_76] : memref<1x32x32xf32, #tpu.memory_space<vmem>>, vector<1x32x32xf32>
    %188 = vector.shape_cast %187 : vector<1x32x32xf32> to vector<32x32xf32>
    %c0_77 = arith.constant 0 : index
    %c0_78 = arith.constant 0 : index
    %c0_79 = arith.constant 0 : index
    %189 = vector.load %arg17[%c0_77, %c0_78, %c0_79] : memref<1x1x32xf32, #tpu.memory_space<vmem>>, vector<1x1x32xf32>
    %190 = vector.shape_cast %189 : vector<1x1x32xf32> to vector<1x32xf32>
    %cst_80 = arith.constant 0.000000e+00 : f32
    %191 = vector.broadcast %cst_80 : f32 to vector<8x32xf32>
    %192 = vector.extract_strided_slice %173 {offsets = [0, 0], sizes = [8, 8], strides = [1, 1]} : vector<8x32xf32> to vector<8x8xf32>
    %193 = arith.truncf %192 : vector<8x8xf32> to vector<8x8xbf16>
    %194 = vector.extract_strided_slice %183 {offsets = [0, 0], sizes = [8, 8], strides = [1, 1]} : vector<8x32xf32> to vector<8x8xf32>
    %195 = tpu.transpose %194, [1, 0] : vector<8x8xf32> -> vector<8x8xf32>
    %196 = arith.truncf %195 : vector<8x8xf32> to vector<8x8xbf16>
    %197 = vector.extract_strided_slice %184 {offsets = [0, 0], sizes = [8, 8], strides = [1, 1]} : vector<8x32xf32> to vector<8x8xf32>
    %198 = arith.truncf %197 : vector<8x8xf32> to vector<8x8xbf16>
    %cst_81 = arith.constant dense<0.000000e+00> : vector<8x8xf32>
    %199 = tpu.matmul %193, %196, %cst_81 {dimension_numbers = #tpu.dot_dimension_numbers<[1], [0], [0], [1], [0, 0, 1, 1], [], []>} : vector<8x8xbf16>, vector<8x8xbf16>, vector<8x8xf32> -> vector<8x8xf32>
    %cst_82 = arith.constant 0.353553385 : f32
    %200 = vector.broadcast %cst_82 : f32 to vector<8x8xf32>
    %201 = arith.mulf %199, %200 : vector<8x8xf32>
    %202 = arith.addf %201, %186 : vector<8x8xf32>
    %cst_83 = arith.constant dense<0xFF800000> : vector<8xf32>
    %203 = vector.multi_reduction <maximumf>, %202, %cst_83 [1] : vector<8x8xf32> to vector<8xf32>
    %204 = vector.shape_cast %203 : vector<8xf32> to vector<8x1xf32>
    %205 = vector.broadcast %204 : vector<8x1xf32> to vector<8x8xf32>
    %206 = arith.subf %202, %205 : vector<8x8xf32>
    %207 = math.exp %206 : vector<8x8xf32>
    %cst_84 = arith.constant dense<0.000000e+00> : vector<8xf32>
    %208 = vector.multi_reduction <add>, %207, %cst_84 [1] : vector<8x8xf32> to vector<8xf32>
    %209 = vector.shape_cast %208 : vector<8xf32> to vector<8x1xf32>
    %210 = tpu.reciprocal %209 {approx = true} : vector<8x1xf32> -> vector<8x1xf32>
    %211 = vector.broadcast %210 : vector<8x1xf32> to vector<8x8xf32>
    %212 = arith.mulf %207, %211 : vector<8x8xf32>
    %213 = arith.truncf %212 : vector<8x8xf32> to vector<8x8xbf16>
    %cst_85 = arith.constant dense<0.000000e+00> : vector<8x8xf32>
    %214 = tpu.matmul %213, %198, %cst_85 {dimension_numbers = #tpu.dot_dimension_numbers<[1], [0], [0], [1], [0, 0, 1, 1], [], []>} : vector<8x8xbf16>, vector<8x8xbf16>, vector<8x8xf32> -> vector<8x8xf32>
    %215 = vector.extract_strided_slice %188 {offsets = [0, 0], sizes = [8, 32], strides = [1, 1]} : vector<32x32xf32> to vector<8x32xf32>
    %216 = arith.truncf %214 : vector<8x8xf32> to vector<8x8xbf16>
    %217 = arith.truncf %215 : vector<8x32xf32> to vector<8x32xbf16>
    %cst_86 = arith.constant dense<0.000000e+00> : vector<8x32xf32>
    %218 = tpu.matmul %216, %217, %cst_86 {dimension_numbers = #tpu.dot_dimension_numbers<[1], [0], [0], [1], [0, 0, 1, 1], [], []>} : vector<8x8xbf16>, vector<8x32xbf16>, vector<8x32xf32> -> vector<8x32xf32>
    %219 = arith.addf %191, %218 : vector<8x32xf32>
    %220 = vector.extract_strided_slice %173 {offsets = [0, 8], sizes = [8, 8], strides = [1, 1]} : vector<8x32xf32> to vector<8x8xf32>
    %221 = arith.truncf %220 : vector<8x8xf32> to vector<8x8xbf16>
    %222 = vector.extract_strided_slice %183 {offsets = [0, 8], sizes = [8, 8], strides = [1, 1]} : vector<8x32xf32> to vector<8x8xf32>
    %223 = tpu.transpose %222, [1, 0] : vector<8x8xf32> -> vector<8x8xf32>
    %224 = arith.truncf %223 : vector<8x8xf32> to vector<8x8xbf16>
    %225 = vector.extract_strided_slice %184 {offsets = [0, 8], sizes = [8, 8], strides = [1, 1]} : vector<8x32xf32> to vector<8x8xf32>
    %226 = arith.truncf %225 : vector<8x8xf32> to vector<8x8xbf16>
    %cst_87 = arith.constant dense<0.000000e+00> : vector<8x8xf32>
    %227 = tpu.matmul %221, %224, %cst_87 {dimension_numbers = #tpu.dot_dimension_numbers<[1], [0], [0], [1], [0, 0, 1, 1], [], []>} : vector<8x8xbf16>, vector<8x8xbf16>, vector<8x8xf32> -> vector<8x8xf32>
    %cst_88 = arith.constant 0.353553385 : f32
    %228 = vector.broadcast %cst_88 : f32 to vector<8x8xf32>
    %229 = arith.mulf %227, %228 : vector<8x8xf32>
    %230 = arith.addf %229, %186 : vector<8x8xf32>
    %cst_89 = arith.constant dense<0xFF800000> : vector<8xf32>
    %231 = vector.multi_reduction <maximumf>, %230, %cst_89 [1] : vector<8x8xf32> to vector<8xf32>
    %232 = vector.shape_cast %231 : vector<8xf32> to vector<8x1xf32>
    %233 = vector.broadcast %232 : vector<8x1xf32> to vector<8x8xf32>
    %234 = arith.subf %230, %233 : vector<8x8xf32>
    %235 = math.exp %234 : vector<8x8xf32>
    %cst_90 = arith.constant dense<0.000000e+00> : vector<8xf32>
    %236 = vector.multi_reduction <add>, %235, %cst_90 [1] : vector<8x8xf32> to vector<8xf32>
    %237 = vector.shape_cast %236 : vector<8xf32> to vector<8x1xf32>
    %238 = tpu.reciprocal %237 {approx = true} : vector<8x1xf32> -> vector<8x1xf32>
    %239 = vector.broadcast %238 : vector<8x1xf32> to vector<8x8xf32>
    %240 = arith.mulf %235, %239 : vector<8x8xf32>
    %241 = arith.truncf %240 : vector<8x8xf32> to vector<8x8xbf16>
    %cst_91 = arith.constant dense<0.000000e+00> : vector<8x8xf32>
    %242 = tpu.matmul %241, %226, %cst_91 {dimension_numbers = #tpu.dot_dimension_numbers<[1], [0], [0], [1], [0, 0, 1, 1], [], []>} : vector<8x8xbf16>, vector<8x8xbf16>, vector<8x8xf32> -> vector<8x8xf32>
    %243 = vector.extract_strided_slice %188 {offsets = [8, 0], sizes = [8, 32], strides = [1, 1]} : vector<32x32xf32> to vector<8x32xf32>
    %244 = arith.truncf %242 : vector<8x8xf32> to vector<8x8xbf16>
    %245 = arith.truncf %243 : vector<8x32xf32> to vector<8x32xbf16>
    %cst_92 = arith.constant dense<0.000000e+00> : vector<8x32xf32>
    %246 = tpu.matmul %244, %245, %cst_92 {dimension_numbers = #tpu.dot_dimension_numbers<[1], [0], [0], [1], [0, 0, 1, 1], [], []>} : vector<8x8xbf16>, vector<8x32xbf16>, vector<8x32xf32> -> vector<8x32xf32>
    %247 = arith.addf %219, %246 : vector<8x32xf32>
    %248 = vector.extract_strided_slice %173 {offsets = [0, 16], sizes = [8, 8], strides = [1, 1]} : vector<8x32xf32> to vector<8x8xf32>
    %249 = arith.truncf %248 : vector<8x8xf32> to vector<8x8xbf16>
    %250 = vector.extract_strided_slice %183 {offsets = [0, 16], sizes = [8, 8], strides = [1, 1]} : vector<8x32xf32> to vector<8x8xf32>
    %251 = tpu.transpose %250, [1, 0] : vector<8x8xf32> -> vector<8x8xf32>
    %252 = arith.truncf %251 : vector<8x8xf32> to vector<8x8xbf16>
    %253 = vector.extract_strided_slice %184 {offsets = [0, 16], sizes = [8, 8], strides = [1, 1]} : vector<8x32xf32> to vector<8x8xf32>
    %254 = arith.truncf %253 : vector<8x8xf32> to vector<8x8xbf16>
    %cst_93 = arith.constant dense<0.000000e+00> : vector<8x8xf32>
    %255 = tpu.matmul %249, %252, %cst_93 {dimension_numbers = #tpu.dot_dimension_numbers<[1], [0], [0], [1], [0, 0, 1, 1], [], []>} : vector<8x8xbf16>, vector<8x8xbf16>, vector<8x8xf32> -> vector<8x8xf32>
    %cst_94 = arith.constant 0.353553385 : f32
    %256 = vector.broadcast %cst_94 : f32 to vector<8x8xf32>
    %257 = arith.mulf %255, %256 : vector<8x8xf32>
    %258 = arith.addf %257, %186 : vector<8x8xf32>
    %cst_95 = arith.constant dense<0xFF800000> : vector<8xf32>
    %259 = vector.multi_reduction <maximumf>, %258, %cst_95 [1] : vector<8x8xf32> to vector<8xf32>
    %260 = vector.shape_cast %259 : vector<8xf32> to vector<8x1xf32>
    %261 = vector.broadcast %260 : vector<8x1xf32> to vector<8x8xf32>
    %262 = arith.subf %258, %261 : vector<8x8xf32>
    %263 = math.exp %262 : vector<8x8xf32>
    %cst_96 = arith.constant dense<0.000000e+00> : vector<8xf32>
    %264 = vector.multi_reduction <add>, %263, %cst_96 [1] : vector<8x8xf32> to vector<8xf32>
    %265 = vector.shape_cast %264 : vector<8xf32> to vector<8x1xf32>
    %266 = tpu.reciprocal %265 {approx = true} : vector<8x1xf32> -> vector<8x1xf32>
    %267 = vector.broadcast %266 : vector<8x1xf32> to vector<8x8xf32>
    %268 = arith.mulf %263, %267 : vector<8x8xf32>
    %269 = arith.truncf %268 : vector<8x8xf32> to vector<8x8xbf16>
    %cst_97 = arith.constant dense<0.000000e+00> : vector<8x8xf32>
    %270 = tpu.matmul %269, %254, %cst_97 {dimension_numbers = #tpu.dot_dimension_numbers<[1], [0], [0], [1], [0, 0, 1, 1], [], []>} : vector<8x8xbf16>, vector<8x8xbf16>, vector<8x8xf32> -> vector<8x8xf32>
    %271 = vector.extract_strided_slice %188 {offsets = [16, 0], sizes = [8, 32], strides = [1, 1]} : vector<32x32xf32> to vector<8x32xf32>
    %272 = arith.truncf %270 : vector<8x8xf32> to vector<8x8xbf16>
    %273 = arith.truncf %271 : vector<8x32xf32> to vector<8x32xbf16>
    %cst_98 = arith.constant dense<0.000000e+00> : vector<8x32xf32>
    %274 = tpu.matmul %272, %273, %cst_98 {dimension_numbers = #tpu.dot_dimension_numbers<[1], [0], [0], [1], [0, 0, 1, 1], [], []>} : vector<8x8xbf16>, vector<8x32xbf16>, vector<8x32xf32> -> vector<8x32xf32>
    %275 = arith.addf %247, %274 : vector<8x32xf32>
    %276 = vector.extract_strided_slice %173 {offsets = [0, 24], sizes = [8, 8], strides = [1, 1]} : vector<8x32xf32> to vector<8x8xf32>
    %277 = arith.truncf %276 : vector<8x8xf32> to vector<8x8xbf16>
    %278 = vector.extract_strided_slice %183 {offsets = [0, 24], sizes = [8, 8], strides = [1, 1]} : vector<8x32xf32> to vector<8x8xf32>
    %279 = tpu.transpose %278, [1, 0] : vector<8x8xf32> -> vector<8x8xf32>
    %280 = arith.truncf %279 : vector<8x8xf32> to vector<8x8xbf16>
    %281 = vector.extract_strided_slice %184 {offsets = [0, 24], sizes = [8, 8], strides = [1, 1]} : vector<8x32xf32> to vector<8x8xf32>
    %282 = arith.truncf %281 : vector<8x8xf32> to vector<8x8xbf16>
    %cst_99 = arith.constant dense<0.000000e+00> : vector<8x8xf32>
    %283 = tpu.matmul %277, %280, %cst_99 {dimension_numbers = #tpu.dot_dimension_numbers<[1], [0], [0], [1], [0, 0, 1, 1], [], []>} : vector<8x8xbf16>, vector<8x8xbf16>, vector<8x8xf32> -> vector<8x8xf32>
    %cst_100 = arith.constant 0.353553385 : f32
    %284 = vector.broadcast %cst_100 : f32 to vector<8x8xf32>
    %285 = arith.mulf %283, %284 : vector<8x8xf32>
    %286 = arith.addf %285, %186 : vector<8x8xf32>
    %cst_101 = arith.constant dense<0xFF800000> : vector<8xf32>
    %287 = vector.multi_reduction <maximumf>, %286, %cst_101 [1] : vector<8x8xf32> to vector<8xf32>
    %288 = vector.shape_cast %287 : vector<8xf32> to vector<8x1xf32>
    %289 = vector.broadcast %288 : vector<8x1xf32> to vector<8x8xf32>
    %290 = arith.subf %286, %289 : vector<8x8xf32>
    %291 = math.exp %290 : vector<8x8xf32>
    %cst_102 = arith.constant dense<0.000000e+00> : vector<8xf32>
    %292 = vector.multi_reduction <add>, %291, %cst_102 [1] : vector<8x8xf32> to vector<8xf32>
    %293 = vector.shape_cast %292 : vector<8xf32> to vector<8x1xf32>
    %294 = tpu.reciprocal %293 {approx = true} : vector<8x1xf32> -> vector<8x1xf32>
    %295 = vector.broadcast %294 : vector<8x1xf32> to vector<8x8xf32>
    %296 = arith.mulf %291, %295 : vector<8x8xf32>
    %297 = arith.truncf %296 : vector<8x8xf32> to vector<8x8xbf16>
    %cst_103 = arith.constant dense<0.000000e+00> : vector<8x8xf32>
    %298 = tpu.matmul %297, %282, %cst_103 {dimension_numbers = #tpu.dot_dimension_numbers<[1], [0], [0], [1], [0, 0, 1, 1], [], []>} : vector<8x8xbf16>, vector<8x8xbf16>, vector<8x8xf32> -> vector<8x8xf32>
    %299 = vector.extract_strided_slice %188 {offsets = [24, 0], sizes = [8, 32], strides = [1, 1]} : vector<32x32xf32> to vector<8x32xf32>
    %300 = arith.truncf %298 : vector<8x8xf32> to vector<8x8xbf16>
    %301 = arith.truncf %299 : vector<8x32xf32> to vector<8x32xbf16>
    %cst_104 = arith.constant dense<0.000000e+00> : vector<8x32xf32>
    %302 = tpu.matmul %300, %301, %cst_104 {dimension_numbers = #tpu.dot_dimension_numbers<[1], [0], [0], [1], [0, 0, 1, 1], [], []>} : vector<8x8xbf16>, vector<8x32xbf16>, vector<8x32xf32> -> vector<8x32xf32>
    %303 = arith.addf %275, %302 : vector<8x32xf32>
    %304 = vector.broadcast %190 : vector<1x32xf32> to vector<8x32xf32>
    %305 = arith.addf %303, %304 : vector<8x32xf32>
    %c0_105 = arith.constant 0 : index
    %c0_106 = arith.constant 0 : index
    %c0_107 = arith.constant 0 : index
    %306 = vector.load %arg18[%c0_105, %c0_106, %c0_107] : memref<1x1x32xf32, #tpu.memory_space<vmem>>, vector<1x1x32xf32>
    %307 = vector.shape_cast %306 : vector<1x1x32xf32> to vector<1x32xf32>
    %c0_108 = arith.constant 0 : index
    %c0_109 = arith.constant 0 : index
    %c0_110 = arith.constant 0 : index
    %308 = vector.load %arg19[%c0_108, %c0_109, %c0_110] : memref<1x1x32xf32, #tpu.memory_space<vmem>>, vector<1x1x32xf32>
    %309 = vector.shape_cast %308 : vector<1x1x32xf32> to vector<1x32xf32>
    %310 = arith.addf %305, %164 : vector<8x32xf32>
    %cst_111 = arith.constant dense<0.000000e+00> : vector<8xf32>
    %311 = vector.multi_reduction <add>, %310, %cst_111 [1] : vector<8x32xf32> to vector<8xf32>
    %312 = vector.shape_cast %311 : vector<8xf32> to vector<8x1xf32>
    %cst_112 = arith.constant 3.200000e+01 : f32
    %313 = vector.broadcast %cst_112 : f32 to vector<8x1xf32>
    %314 = arith.divf %312, %313 : vector<8x1xf32>
    %315 = vector.broadcast %314 : vector<8x1xf32> to vector<8x32xf32>
    %316 = arith.subf %310, %315 : vector<8x32xf32>
    %317 = arith.mulf %316, %316 : vector<8x32xf32>
    %cst_113 = arith.constant dense<0.000000e+00> : vector<8xf32>
    %318 = vector.multi_reduction <add>, %317, %cst_113 [1] : vector<8x32xf32> to vector<8xf32>
    %319 = vector.shape_cast %318 : vector<8xf32> to vector<8x1xf32>
    %cst_114 = arith.constant 3.100000e+01 : f32
    %320 = vector.broadcast %cst_114 : f32 to vector<8x1xf32>
    %321 = arith.divf %319, %320 : vector<8x1xf32>
    %322 = math.sqrt %321 : vector<8x1xf32>
    %323 = vector.broadcast %307 : vector<1x32xf32> to vector<8x32xf32>
    %324 = arith.mulf %323, %316 : vector<8x32xf32>
    %cst_115 = arith.constant 9.99999997E-7 : f32
    %325 = vector.broadcast %cst_115 : f32 to vector<8x1xf32>
    %326 = arith.addf %322, %325 : vector<8x1xf32>
    %327 = vector.broadcast %326 : vector<8x1xf32> to vector<8x32xf32>
    %328 = arith.divf %324, %327 : vector<8x32xf32>
    %329 = vector.broadcast %309 : vector<1x32xf32> to vector<8x32xf32>
    %330 = arith.addf %328, %329 : vector<8x32xf32>
    %c0_116 = arith.constant 0 : index
    %c0_117 = arith.constant 0 : index
    %c0_118 = arith.constant 0 : index
    %331 = vector.load %arg20[%c0_116, %c0_117, %c0_118] : memref<1x32x2048xf32, #tpu.memory_space<vmem>>, vector<1x32x2048xf32>
    %332 = vector.shape_cast %331 : vector<1x32x2048xf32> to vector<32x2048xf32>
    %333 = arith.truncf %330 : vector<8x32xf32> to vector<8x32xbf16>
    %334 = arith.truncf %332 : vector<32x2048xf32> to vector<32x2048xbf16>
    %cst_119 = arith.constant dense<0.000000e+00> : vector<8x2048xf32>
    %335 = tpu.matmul %333, %334, %cst_119 {dimension_numbers = #tpu.dot_dimension_numbers<[1], [0], [0], [1], [0, 0, 1, 1], [], []>} : vector<8x32xbf16>, vector<32x2048xbf16>, vector<8x2048xf32> -> vector<8x2048xf32>
    %c0_120 = arith.constant 0 : index
    %c0_121 = arith.constant 0 : index
    %c0_122 = arith.constant 0 : index
    %336 = vector.load %arg21[%c0_120, %c0_121, %c0_122] : memref<1x1x2048xf32, #tpu.memory_space<vmem>>, vector<1x1x2048xf32>
    %337 = vector.shape_cast %336 : vector<1x1x2048xf32> to vector<1x2048xf32>
    %338 = vector.broadcast %337 : vector<1x2048xf32> to vector<8x2048xf32>
    %339 = arith.addf %335, %338 : vector<8x2048xf32>
    %cst_123 = arith.constant 0.000000e+00 : f32
    %340 = vector.broadcast %cst_123 : f32 to vector<8x2048xf32>
    %341 = arith.maximumf %339, %340 : vector<8x2048xf32>
    %c0_124 = arith.constant 0 : index
    %c0_125 = arith.constant 0 : index
    %c0_126 = arith.constant 0 : index
    %342 = vector.load %arg22[%c0_124, %c0_125, %c0_126] : memref<1x2048x32xf32, #tpu.memory_space<vmem>>, vector<1x2048x32xf32>
    %343 = vector.shape_cast %342 : vector<1x2048x32xf32> to vector<2048x32xf32>
    %344 = arith.truncf %341 : vector<8x2048xf32> to vector<8x2048xbf16>
    %345 = arith.truncf %343 : vector<2048x32xf32> to vector<2048x32xbf16>
    %cst_127 = arith.constant dense<0.000000e+00> : vector<8x32xf32>
    %346 = tpu.matmul %344, %345, %cst_127 {dimension_numbers = #tpu.dot_dimension_numbers<[1], [0], [0], [1], [0, 0, 1, 1], [], []>} : vector<8x2048xbf16>, vector<2048x32xbf16>, vector<8x32xf32> -> vector<8x32xf32>
    %c0_128 = arith.constant 0 : index
    %c0_129 = arith.constant 0 : index
    %c0_130 = arith.constant 0 : index
    %347 = vector.load %arg23[%c0_128, %c0_129, %c0_130] : memref<1x1x32xf32, #tpu.memory_space<vmem>>, vector<1x1x32xf32>
    %348 = vector.shape_cast %347 : vector<1x1x32xf32> to vector<1x32xf32>
    %349 = vector.broadcast %348 : vector<1x32xf32> to vector<8x32xf32>
    %350 = arith.addf %346, %349 : vector<8x32xf32>
    %c0_131 = arith.constant 0 : index
    %c0_132 = arith.constant 0 : index
    %c0_133 = arith.constant 0 : index
    %351 = vector.load %arg24[%c0_131, %c0_132, %c0_133] : memref<1x1x32xf32, #tpu.memory_space<vmem>>, vector<1x1x32xf32>
    %352 = vector.shape_cast %351 : vector<1x1x32xf32> to vector<1x32xf32>
    %c0_134 = arith.constant 0 : index
    %c0_135 = arith.constant 0 : index
    %c0_136 = arith.constant 0 : index
    %353 = vector.load %arg25[%c0_134, %c0_135, %c0_136] : memref<1x1x32xf32, #tpu.memory_space<vmem>>, vector<1x1x32xf32>
    %354 = vector.shape_cast %353 : vector<1x1x32xf32> to vector<1x32xf32>
    %355 = arith.addf %350, %330 : vector<8x32xf32>
    %cst_137 = arith.constant dense<0.000000e+00> : vector<8xf32>
    %356 = vector.multi_reduction <add>, %355, %cst_137 [1] : vector<8x32xf32> to vector<8xf32>
    %357 = vector.shape_cast %356 : vector<8xf32> to vector<8x1xf32>
    %cst_138 = arith.constant 3.200000e+01 : f32
    %358 = vector.broadcast %cst_138 : f32 to vector<8x1xf32>
    %359 = arith.divf %357, %358 : vector<8x1xf32>
    %360 = vector.broadcast %359 : vector<8x1xf32> to vector<8x32xf32>
    %361 = arith.subf %355, %360 : vector<8x32xf32>
    %362 = arith.mulf %361, %361 : vector<8x32xf32>
    %cst_139 = arith.constant dense<0.000000e+00> : vector<8xf32>
    %363 = vector.multi_reduction <add>, %362, %cst_139 [1] : vector<8x32xf32> to vector<8xf32>
    %364 = vector.shape_cast %363 : vector<8xf32> to vector<8x1xf32>
    %cst_140 = arith.constant 3.100000e+01 : f32
    %365 = vector.broadcast %cst_140 : f32 to vector<8x1xf32>
    %366 = arith.divf %364, %365 : vector<8x1xf32>
    %367 = math.sqrt %366 : vector<8x1xf32>
    %368 = vector.broadcast %352 : vector<1x32xf32> to vector<8x32xf32>
    %369 = arith.mulf %368, %361 : vector<8x32xf32>
    %cst_141 = arith.constant 9.99999997E-7 : f32
    %370 = vector.broadcast %cst_141 : f32 to vector<8x1xf32>
    %371 = arith.addf %367, %370 : vector<8x1xf32>
    %372 = vector.broadcast %371 : vector<8x1xf32> to vector<8x32xf32>
    %373 = arith.divf %369, %372 : vector<8x32xf32>
    %374 = vector.broadcast %354 : vector<1x32xf32> to vector<8x32xf32>
    %375 = arith.addf %373, %374 : vector<8x32xf32>
    %c0_142 = arith.constant 0 : index
    %c0_143 = arith.constant 0 : index
    %c0_144 = arith.constant 0 : index
    %376 = vector.load %arg26[%c0_142, %c0_143, %c0_144] : memref<1x8x32xf32, #tpu.memory_space<vmem>>, vector<1x8x32xf32>
    %377 = vector.shape_cast %376 : vector<1x8x32xf32> to vector<8x32xf32>
    %378 = vector.shape_cast %375 : vector<8x32xf32> to vector<1x8x32xf32>
    tpu.vector_store %arg26[%c0_142, %c0_143, %c0_144], %378 {strides = array<i32>} : memref<1x8x32xf32, #tpu.memory_space<vmem>>, vector<1x8x32xf32>,
    return
  }
  func.func @transform_0(%arg0: i32, %arg1: i32) -> (i32, i32, i32) {
    %c0_i32 = arith.constant 0 : i32
    %c0_i32_0 = arith.constant 0 : i32
    %c0_i32_1 = arith.constant 0 : i32
    return %arg0, %c0_i32, %c0_i32_0 : i32, i32, i32
  }
  func.func @transform_1(%arg0: i32, %arg1: i32) -> (i32, i32, i32) {
    %c0_i32 = arith.constant 0 : i32
    %c0_i32_0 = arith.constant 0 : i32
    %c0_i32_1 = arith.constant 0 : i32
    return %arg0, %c0_i32, %c0_i32_0 : i32, i32, i32
  }
  func.func @transform_2(%arg0: i32, %arg1: i32) -> (i32, i32, i32) {
    %c0_i32 = arith.constant 0 : i32
    %c0_i32_0 = arith.constant 0 : i32
    %c0_i32_1 = arith.constant 0 : i32
    return %arg0, %c0_i32, %c0_i32_0 : i32, i32, i32
  }
  func.func @transform_3(%arg0: i32, %arg1: i32) -> (i32, i32, i32) {
    %c0_i32 = arith.constant 0 : i32
    %c0_i32_0 = arith.constant 0 : i32
    %c0_i32_1 = arith.constant 0 : i32
    return %arg0, %c0_i32, %c0_i32_0 : i32, i32, i32
  }
  func.func @transform_4(%arg0: i32, %arg1: i32) -> (i32, i32, i32) {
    %c0_i32 = arith.constant 0 : i32
    %c0_i32_0 = arith.constant 0 : i32
    %c0_i32_1 = arith.constant 0 : i32
    return %arg1, %c0_i32, %c0_i32_0 : i32, i32, i32
  }
  func.func @transform_5(%arg0: i32, %arg1: i32) -> (i32, i32, i32) {
    %c0_i32 = arith.constant 0 : i32
    %c0_i32_0 = arith.constant 0 : i32
    %c0_i32_1 = arith.constant 0 : i32
    return %arg1, %c0_i32, %c0_i32_0 : i32, i32, i32
  }
  func.func @transform_6(%arg0: i32, %arg1: i32) -> (i32, i32, i32) {
    %c0_i32 = arith.constant 0 : i32
    %c0_i32_0 = arith.constant 0 : i32
    %c0_i32_1 = arith.constant 0 : i32
    return %arg1, %c0_i32, %c0_i32_0 : i32, i32, i32
  }
  func.func @transform_7(%arg0: i32, %arg1: i32) -> (i32, i32, i32) {
    %c0_i32 = arith.constant 0 : i32
    %c0_i32_0 = arith.constant 0 : i32
    %c0_i32_1 = arith.constant 0 : i32
    return %arg1, %c0_i32, %c0_i32_0 : i32, i32, i32
  }
  func.func @transform_8(%arg0: i32, %arg1: i32) -> (i32, i32, i32) {
    %c0_i32 = arith.constant 0 : i32
    %c0_i32_0 = arith.constant 0 : i32
    %c0_i32_1 = arith.constant 0 : i32
    return %arg1, %c0_i32, %c0_i32_0 : i32, i32, i32
  }
  func.func @transform_9(%arg0: i32, %arg1: i32) -> (i32, i32, i32) {
    %c0_i32 = arith.constant 0 : i32
    %c0_i32_0 = arith.constant 0 : i32
    %c0_i32_1 = arith.constant 0 : i32
    return %arg1, %c0_i32, %c0_i32_0 : i32, i32, i32
  }
  func.func @transform_10(%arg0: i32, %arg1: i32) -> (i32, i32, i32) {
    %c0_i32 = arith.constant 0 : i32
    %c0_i32_0 = arith.constant 0 : i32
    %c0_i32_1 = arith.constant 0 : i32
    return %arg1, %c0_i32, %c0_i32_0 : i32, i32, i32
  }
  func.func @transform_11(%arg0: i32, %arg1: i32) -> (i32, i32, i32) {
    %c0_i32 = arith.constant 0 : i32
    %c0_i32_0 = arith.constant 0 : i32
    %c0_i32_1 = arith.constant 0 : i32
    return %arg1, %c0_i32, %c0_i32_0 : i32, i32, i32
  }
  func.func @transform_12(%arg0: i32, %arg1: i32) -> (i32, i32, i32) {
    %c0_i32 = arith.constant 0 : i32
    %c0_i32_0 = arith.constant 0 : i32
    %c0_i32_1 = arith.constant 0 : i32
    return %arg1, %c0_i32, %c0_i32_0 : i32, i32, i32
  }
  func.func @transform_13(%arg0: i32, %arg1: i32) -> (i32, i32, i32) {
    %c0_i32 = arith.constant 0 : i32
    %c0_i32_0 = arith.constant 0 : i32
    %c0_i32_1 = arith.constant 0 : i32
    return %arg1, %c0_i32, %c0_i32_0 : i32, i32, i32
  }
  func.func @transform_14(%arg0: i32, %arg1: i32) -> (i32, i32, i32) {
    %c0_i32 = arith.constant 0 : i32
    %c0_i32_0 = arith.constant 0 : i32
    %c0_i32_1 = arith.constant 0 : i32
    return %arg1, %c0_i32, %c0_i32_0 : i32, i32, i32
  }
  func.func @transform_15(%arg0: i32, %arg1: i32) -> (i32, i32, i32) {
    %c0_i32 = arith.constant 0 : i32
    %c0_i32_0 = arith.constant 0 : i32
    %c0_i32_1 = arith.constant 0 : i32
    return %arg1, %c0_i32, %c0_i32_0 : i32, i32, i32
  }
  func.func @transform_16(%arg0: i32, %arg1: i32) -> (i32, i32, i32) {
    %c0_i32 = arith.constant 0 : i32
    %c0_i32_0 = arith.constant 0 : i32
    %c0_i32_1 = arith.constant 0 : i32
    return %arg1, %c0_i32, %c0_i32_0 : i32, i32, i32
  }
  func.func @transform_17(%arg0: i32, %arg1: i32) -> (i32, i32, i32) {
    %c0_i32 = arith.constant 0 : i32
    %c0_i32_0 = arith.constant 0 : i32
    %c0_i32_1 = arith.constant 0 : i32
    return %arg1, %c0_i32, %c0_i32_0 : i32, i32, i32
  }
  func.func @transform_18(%arg0: i32, %arg1: i32) -> (i32, i32, i32) {
    %c0_i32 = arith.constant 0 : i32
    %c0_i32_0 = arith.constant 0 : i32
    %c0_i32_1 = arith.constant 0 : i32
    return %arg1, %c0_i32, %c0_i32_0 : i32, i32, i32
  }
  func.func @transform_19(%arg0: i32, %arg1: i32) -> (i32, i32, i32) {
    %c0_i32 = arith.constant 0 : i32
    %c0_i32_0 = arith.constant 0 : i32
    %c0_i32_1 = arith.constant 0 : i32
    return %arg1, %c0_i32, %c0_i32_0 : i32, i32, i32
  }
  func.func @transform_20(%arg0: i32, %arg1: i32) -> (i32, i32, i32) {
    %c0_i32 = arith.constant 0 : i32
    %c0_i32_0 = arith.constant 0 : i32
    %c0_i32_1 = arith.constant 0 : i32
    return %arg1, %c0_i32, %c0_i32_0 : i32, i32, i32
  }
  func.func @transform_21(%arg0: i32, %arg1: i32) -> (i32, i32, i32) {
    %c0_i32 = arith.constant 0 : i32
    %c0_i32_0 = arith.constant 0 : i32
    %c0_i32_1 = arith.constant 0 : i32
    return %arg1, %c0_i32, %c0_i32_0 : i32, i32, i32
  }
  func.func @transform_22(%arg0: i32, %arg1: i32) -> (i32, i32, i32) {
    %c0_i32 = arith.constant 0 : i32
    %c0_i32_0 = arith.constant 0 : i32
    %c0_i32_1 = arith.constant 0 : i32
    return %arg1, %c0_i32, %c0_i32_0 : i32, i32, i32
  }
  func.func @transform_23(%arg0: i32, %arg1: i32) -> (i32, i32, i32) {
    %c0_i32 = arith.constant 0 : i32
    %c0_i32_0 = arith.constant 0 : i32
    %c0_i32_1 = arith.constant 0 : i32
    return %arg1, %c0_i32, %c0_i32_0 : i32, i32, i32
  }
  func.func @transform_24(%arg0: i32, %arg1: i32) -> (i32, i32, i32) {
    %c0_i32 = arith.constant 0 : i32
    %c0_i32_0 = arith.constant 0 : i32
    %c0_i32_1 = arith.constant 0 : i32
    return %arg0, %c0_i32, %c0_i32_0 : i32, i32, i32
  }
}

</mosaic_0001>

<bundles_post_ra>
// kernel: decoder_forward.1
= control target key start
LH: loop header
LB: loop body
LE: loop exit
PB: predicated region body
PF: predicated region fallthrough
CT: control target
= control target key end

     0   :  { %s4967_s0 = inlined_call_operand.vmem [shape: f32[2,8,32], index: 0, kind: input, shape index: {}]   ;;  %s4968_s1 = inlined_call_operand.vmem [shape: f32[2,8,32], index: 1, kind: input, shape index: {}]   ;;  %s4969_s2 = inlined_call_operand.vmem [shape: f32[2,8,8], index: 2, kind: input, shape index: {}]   ;;  %s4970_s3 = inlined_call_operand.vmem [shape: f32[2,8,8], index: 3, kind: input, shape index: {}]   ;;  %s4971_s4 = inlined_call_operand.vmem [shape: f32[2,32,96], index: 4, kind: input, shape index: {}]   ;;  %s4972_s5 = inlined_call_operand.vmem [shape: f32[2,1,96], index: 5, kind: input, shape index: {}]   ;;  %s4973_s6 = inlined_call_operand.vmem [shape: f32[2,32,32], index: 6, kind: input, shape index: {}]   ;;  %s4974_s7 = inlined_call_operand.vmem [shape: f32[2,1,32], index: 7, kind: input, shape index: {}]   ;;  %s4975_s8 = inlined_call_operand.vmem [shape: f32[2,1,32], index: 8, kind: input, shape index: {}]   ;;  %s4976_s9 = inlined_call_operand.vmem [shape: f32[2,1,32], index: 9, kind: input, shape index: {}]   ;;  %s4977_s10 = inlined_call_operand.vmem [shape: f32[2,32,32], index: 10, kind: input, shape index: {}]   ;;  %s4978_s11 = inlined_call_operand.vmem [shape: f32[2,1,32], index: 11, kind: input, shape index: {}]   ;;  %s4979_s12 = inlined_call_operand.vmem [shape: f32[2,32,64], index: 12, kind: input, shape index: {}]   ;;  %s4980_s13 = inlined_call_operand.vmem [shape: f32[2,1,64], index: 13, kind: input, shape index: {}]   ;;  %s4981_s14 = inlined_call_operand.vmem [shape: f32[2,32,32], index: 14, kind: input, shape index: {}]   ;;  %s4982_s15 = inlined_call_operand.vmem [shape: f32[2,1,32], index: 15, kind: input, shape index: {}]   ;;  %s4983_s16 = inlined_call_operand.vmem [shape: f32[2,1,32], index: 16, kind: input, shape index: {}]   ;;  %s4984_s17 = inlined_call_operand.vmem [shape: f32[2,1,32], index: 17, kind: input, shape index: {}]   ;;  %s4985_s18 = inlined_call_operand.vmem [shape: f32[2,32,2048], index: 18, kind: input, shape index: {}]   ;;  %s4986_s19 = inlined_call_operand.vmem [shape: f32[2,1,2048], index: 19, kind: input, shape index: {}]   ;;  %s4987_s20 = inlined_call_operand.vmem [shape: f32[2,2048,32], index: 20, kind: input, shape index: {}]   ;;  %s4988_s21 = inlined_call_operand.vmem [shape: f32[2,1,32], index: 21, kind: input, shape index: {}]   ;;  %s4989_s22 = inlined_call_operand.vmem [shape: f32[2,1,32], index: 22, kind: input, shape index: {}]   ;;  %s4990_s23 = inlined_call_operand.vmem [shape: f32[2,1,32], index: 23, kind: input, shape index: {}]   ;;  %s4991_s24 = inlined_call_operand.hbm [shape: f32[2,8,32], index: 24, kind: output, shape index: {}]  }
   0x1   :  { %5010 = sst [smem:[#allocation20_spill]] %s4967_s0 }
   0x2   :  { %5011 = sst [smem:[#allocation21_spill]] %s4968_s1 }
   0x3   :  { %5012 = sst [smem:[#allocation22_spill]] %s4969_s2 }
   0x4   :  { %5013 = sst [smem:[#allocation23_spill]] %s4970_s3 }
   0x5   :  { %5014 = sst [smem:[#allocation24_spill]] %s4971_s4 }
   0x6   :  { %5015 = sst [smem:[#allocation25_spill]] %s4972_s5 }
   0x7   :  { %5016 = sst [smem:[#allocation26_spill]] %s4973_s6 }
   0x8   :  { %5017 = sst [smem:[#allocation27_spill]] %s4974_s7 }
   0x9   :  { %5018 = sst [smem:[#allocation28_spill]] %s4975_s8 }
   0xa   :  { %5019 = sst [smem:[#allocation29_spill]] %s4977_s10 }
   0xb   :  { %5020 = sst [smem:[#allocation30_spill]] %s4979_s12 }
   0xc   :  { %5021 = sst [smem:[#allocation31_spill]] %s4981_s14 }
   0xd   :  { %5022 = sst [smem:[#allocation32_spill]] %s4982_s15 }
   0xe   :  { %5023 = sst [smem:[#allocation33_spill]] %s4983_s16 }
   0xf   :  { %5024 = sst [smem:[#allocation34_spill]] %s4984_s17 }
  0x10   :  { %5025 = sst [smem:[#allocation35_spill]] %s4985_s18 }
  0x11   :  { %5026 = sst [smem:[#allocation36_spill]] %s4986_s19 }
  0x12   :  { %5027 = sst [smem:[#allocation37_spill]] %s4987_s20 }
  0x13   :  { %5028 = sst [smem:[#allocation38_spill]] %s4988_s21 }
  0x14   :  { %5029 = sst [smem:[#allocation39_spill]] %s4989_s22 }
  0x15   :  { %5030 = sst [smem:[#allocation40_spill]] %s4990_s23 }
  0x16   :  { %5031 = sst [smem:[#allocation41_spill]] %s4991_s24 }
  0x17   :  { %29 = vsyncpa [#allocation3], 0 }
  0x18   :  { %31 = vsyncpa [#allocation3 + $0x1], 0  ;;  %s4077_s5 = smov 0   ;;  %s4079_s26 = smov 0  }
  0x19   :  { %s4081_s27 = smov 0   ;;  %s4083_s28 = smov 0  }
  0x1a   :  { %s4085_s6 = smov 0   ;;  %s4087_s2 = smov 0  }
  0x1b   :  { %s4089_s29 = smov 0   ;;  %s4091_s0 = smov 0  }
  0x1c LB: > { %5032 = sst [smem:[#allocation5_spill]] %s3909_s5  ;;  %s3604_s7 = sadd.s32 4294967295, %s3937_s0   ;;  %s3937_s0 = sphi %s4091_s0, %s37_s0   ;;  %s3933_s29 = sphi %s4089_s29, %s5114_s29   ;;  %s3929_s2 = sphi %s4087_s2, %s5113_s2   ;;  %s3925_s6 = sphi %s4085_s6, %s5112_s6   ;;  %s3921_s28 = sphi %s4083_s28, %s5111_s28   ;;  %s3917_s27 = sphi %s4081_s27, %s5110_s27   ;;  %s3913_s26 = sphi %s4079_s26, %s5109_s26   ;;  %s3909_s5 = sphi %s4077_s5, %s5108_s5  }
  0x1d   : > { %5033 = sst [smem:[#allocation6_spill]] %s3913_s26  ;;  %s3605_s30 = sadd.s32 4294967294, %s3937_s0  }
  0x1e   : > { %5034 = sst [smem:[#allocation7_spill]] %s3917_s27  ;;  %s46_s3 = sadd.s32 1, %s3929_s2 }
  0x1f   : > { %5035 = sst [smem:[#allocation8_spill]] %s3921_s28  ;;  %p47_p0 = scmp.ge.s32.totalorder %s46_s3, 2 }
  0x20   : > { %5036 = sst [smem:[#allocation9_spill]] %s3925_s6  ;;  %s49_s25 = sadd.s32 1, %s3933_s29 }
  0x21   : > { %5037 = sst [smem:[#allocation10_spill]] %s3929_s2  ;;  %p690_p1 = scmp.ne.s32.totalorder %s3917_s27, %s3913_s26 }
  0x22   : > { %5038 = sst [smem:[#allocation11_spill]] %s3933_s29  ;;  %p691_p2 = scmp.eq.s32.totalorder %s3604_s7, 3 }
  0x23   : > { %5039 = sst [smem:[#allocation12_spill]] %s3937_s0  ;;  %s5116_s3 = smov (%p47_p0, %s46_s3), 0 }
  0x24   : > { %5040 = sst [smem:[#allocation13_spill]] %s5116_s3  ;;  %s5118_s25 = smov (!%p47_p0, %s49_s25), %s3933_s29 }
  0x25   : > { %p4126_p3 = por %p691_p2, %p690_p1  ;;  %p696_p4 = scmp.ne.s32.totalorder %s3913_s26, %s3909_s5 }
  0x26   : > { %p51_p5 = scmp.ge.s32.totalorder %s5118_s25, 2  ;;  %p697_p6 = scmp.eq.s32.totalorder %s3605_s30, 3 }
  0x27   : > { %s5041_s8 = scalar_select %p4126_p3, 1, 0 }
  0x28   : > { %p3608_p7 = scmp.ge.s32.totalorder %s3937_s0, 1  ;;  %p878_p8 = scmp.lt.s32.totalorder %s3937_s0, 5 }
  0x29   : > { %5042 = sst [smem:[#allocation14_spill]] %s5041_s8  ;;  %s5120_s25 = smov (%p51_p5, %s5118_s25), 0 }
  0x2a   : > { %5043 = sst [smem:[#allocation15_spill]] %s5120_s25  ;;  %p4136_p9 = por %p697_p6, %p696_p4 }
  0x2b   : > { %p879_p10 = pnand %p3608_p7, %p878_p8  ;;  %s677_s1 = ssub.s32 %s3933_s29, %s5120_s25 }
  0x2c   : > { %s5044_s4 = scalar_select %p4136_p9, 1, 0 }
  0x2d   : > { %s680_s7 = sadd.s32 1, %s3917_s27  ;;  %p678_p11 = scmp.eq.s32.totalorder %s677_s1, 0 }
  0x2e   : > { %5045 = sst [smem:[#allocation16_spill]] %s5044_s4  ;;  %882 = sbr.rel (%p879_p10) target bundleno = 4253 (0x109d), region = 116 }
  0x2f   : > { %s4144_s3 = scalar_select %p678_p11, %s3917_s27, %s680_s7  }
  0x31   : > { %5046 = sst [smem:[#allocation17_spill]] %s4144_s3 }
  0x33   : > { %s4997_s30 = sand.u32 1, %s3913_s26   ;;  %p1030_p12 = scmp.lt.s32.totalorder %s3925_s6, 1 }
  0x34   : > { %s4150_s2 = sshll.u32 %s4997_s30, 3  ;;  %p1046_p13 = scmp.lt.s32.totalorder %s3921_s28, 1 }
  0x35   : > { %s1031_s4 = scalar_select %p1030_p12, %s3925_s6, 1 }
  0x36   : > { %s4155_s5 = scalar_select %p1046_p13, %s3921_s28, 1 }
  0x37   : > { %s4157_s1 = sshll.u32 %s1031_s4, 3  ;;  %s5053_s3 = sld [smem:[#allocation24_spill]] }
  0x38   : > { %5047 = sst [smem:[#allocation18_spill]] %s4157_s1  ;;  %s3677_s25 = sshll.u32 %s4155_s5, 5 }
  0x39   : > { %s5054_s6 = sld [smem:[#allocation26_spill]]  ;;  %s3683_s19 = sshll.u32 %s4155_s5, 11 }
  0x3a   : > { %s5057_s10 = sld [smem:[#allocation29_spill]] }
  0x3b   : > { %s5058_s12 = sld [smem:[#allocation30_spill]] }
  0x3c   : > { %s5059_s14 = sld [smem:[#allocation31_spill]] }
  0x3d   : > { %s4183_s0 = scalar_lea.vmem %s5053_s3, %s3677_s25  ;;  %s5063_s18 = sld [smem:[#allocation35_spill]] }
  0x3e   : > { %s5069_s15 = sld [smem:[#allocation40_spill]] }
  0x3f   : > { %s4188_s8 = scalar_lea.vmem %s5054_s6, %s3677_s25  ;;  %s5066_s6 = sld [smem:[#allocation37_spill]] }
  0x40   : > { %s4205_s24 = scalar_lea.vmem %s5057_s10, %s3677_s25  ;;  %s5067_s10 = sld [smem:[#allocation38_spill]] }
  0x41   : > { %s4214_s28 = scalar_lea.vmem %s5058_s12, %s3677_s25  ;;  %s3682_s12 = sshll.u32 %s4155_s5, 9 }
  0x42   : > { %s4223_s3 = scalar_lea.vmem %s5059_s14, %s3677_s25  ;;  %s3626_s25 = sshll.u32 %s4155_s5, 4 }
  0x43   : > { %s4241_s20 = scalar_lea.vmem %s5063_s18, %s3682_s12  ;;  %s5065_s14 = sld [smem:[#allocation36_spill]] }
  0x44   : > { %5064 = sst [smem:[#allocation19_spill]] %s4241_s20  ;;  %s1120_s29 = scalar_lea.vmem %s5069_s15, %s4155_s5 }
  0x45   : > { %s4253_s4 = scalar_lea.vmem %s5066_s6, %s3683_s19  ;;  %s5068_s12 = sld [smem:[#allocation39_spill]] }
  0x46   : > { %s1114_s17 = scalar_lea.vmem %s5067_s10, %s4155_s5 }
  0x49   : > { %s4247_s7 = scalar_lea.vmem %s5065_s14, %s3626_s25  ;;  %s4268_s14 = scalar_lea.vmem [#allocation2], %s4150_s2 }
  0x4a   : > { %s5070_s25 = sld [smem:[#allocation8_spill]] }
  0x4b   : > { %s1117_s1 = scalar_lea.vmem %s5068_s12, %s4155_s5 }
  0x50   : > { %p3629_p0 = scmp.ne.s32.totalorder %s5070_s25, 0 }
  0x51   : > { %s5071_s19 = sld [smem:[#allocation20_spill]] (!%p3629_p0) }
  0x52   : > { %1125 = sbr.rel (%p3629_p0) target bundleno = 91 (0x5b), region = 120  ;;  %s5072_s23 = sld [smem:[#allocation18_spill]] (!%p3629_p0) }
  0x57   : > { %vm1127_vm0 = vcmask 261120  }
  0x58   : > { %s5073_s6 = scalar_lea.vmem %s5071_s19, %s5072_s23 }
  0x59   : > { %v1126_v0 = vld [vmem:[%s5073_s6] sm:$0xff] }
  0x5a   : > { %1128 = vst.msk [vmem:[%s4268_s14] sm:$0xff] %vm1127_vm0, %v1126_v0 }
  0x5b PF: > { %v1133_v1 = vld [vmem:[%s4183_s0 + $0x10] sm:$0xff]  ;;  %v1134_v2 = vld [vmem:[%s4183_s0 + $0x18] sm:$0xff]  ;;  %v1131_v3 = vld [vmem:[%s4183_s0] sm:$0xff]  ;;  %vm1142_vm1 = vcmask 261120   ;;  %s5074_s16 = sld [smem:[#allocation25_spill]]  ;;  %s3939_s2 = smov 96  }
  0x5c   : > { %v1137_v4 = vpack.c.bf16 %v1134_v2, %v1133_v1  ;;  %v1132_v5 = vld [vmem:[%s4183_s0 + $0x8] sm:$0xff]  ;;  %s3940_s0 = smov 64   ;;  %s3941_s20 = smov 88   ;;  %vm1207_vm2 = vcmask 1043456   ;;  %vm1203_vm3 = vcmask 64512   ;;  %v1160_v43 = vld [vmem:[%s4188_s8] sm:$0xff] }
  0x5d   : > { %v1136_v7 = vpack.c.bf16 %v1132_v5, %v1131_v3  ;;  %s3942_s21 = smov 80   ;;  %s3943_s22 = smov 72   ;;  %v1261_v44 = vpack.c.bf16 %v1160_v43, %v1160_v43 }
  0x5e   : > { %1152 = vmatpush.bf16.msra.mxu0 %v1137_v4  ;;  %s5076_s30 = sld [smem:[#allocation18_spill]]  ;;  %s3944_s12 = smov 104  }
  0x5f   : > { %s5077_s27 = sld [smem:[#allocation22_spill]]  ;;  %s3945_s23 = smov 120   ;;  %v1379_v45 = vsel %vm1207_vm2, %v1261_v44, 0 }
  0x60   : > { %s3946_s6 = smov 112   ;;  %s3947_s10 = smov 48  }
  0x61   : > { %v4282_v6 = vld [vmem:[%s4268_s14] sm:$0xff]  ;;  %s5075_s18 = scalar_lea.vmem %s5074_s16, %s4155_s5  ;;  %s3948_s15 = smov 56  }
  0x62   : > { %v1135_v8 = vpack.c.bf16 %v4282_v6, %v4282_v6  ;;  %1153 = vmatpush.bf16.msra.mxu0 %v1136_v7  ;;  %v3783_v9 = vld [vmem:[%s5075_s18] ss:$0 sm:$0xff]  ;;  %s3949_s16 = smov 40   ;;  %s5084_s18 = sld [smem:[#allocation28_spill]] }
  0x65   : > { %3630 = vmatmul.msk.bf16.vlgmr.msra.gmra.mxu0 %vm1142_vm1, %v1135_v8  ;;  %s5078_s19 = scalar_lea.vmem %s5077_s27, %s5076_s30  ;;  %s5086_s27 = scalar_lea.vmem %s4976_s9, %s4155_s5 }
  0x66   : > { %v4310_v22 = vld [vmem:[%s5078_s19] sm:$0xff]  ;;  %s5081_s19 = sld [smem:[#allocation27_spill]] }
  0xe2   : > { %v1155_v10 = vpop.f32.mrf.mxu0 }
  0xe3   : > { %v1156_v11 = vadd.f32 %v3783_v9, %v1155_v10 }
  0xe5   : > { %v4292_v12 = vpack.c.bf16 %v1156_v11, %v1156_v11  ;;  %1167 = vrot.lane.b32.xlu0 %v1156_v11, %s3939_s2 }
  0xe7   : > { %1239 = vrot.lane.b32.xlu2 %v4292_v12, %s3940_s0  ;;  %s5079_s0 = sld [smem:[#allocation21_spill]] }
  0xea   : > { %v1157_v13 = vpop.f32.mrf.mxu0 }
  0xed   : > { %s5080_s25 = scalar_lea.vmem %s5079_s0, %s5076_s30  ;;  %s5085_s0 = scalar_lea.vmem %s5084_s18, %s4155_s5 }
  0xef   : > { %1262 = vrot.lane.b32.xlu2 %v1156_v11, %s3941_s20 }
  0xf7   : > { %1394 = vrot.lane.b32.xlu2 %v1156_v11, %s3942_s21 }
  0xff   : > { %1508 = vrot.lane.b32.xlu2 %v1156_v11, %s3943_s22 }
 0x141   : > { %v1240_v14 = vpop.permute.xlu2 %1239 }
 0x142   : > { %v1245_v15 = vsel %vm1207_vm2, %v1240_v14, 0 }
 0x143   : > { %1254 = vmatpush.bf16.msra.mxu2 %v1245_v15 }
 0x149   : > { %v1263_v16 = vpop.permute.xlu2 %1262 }
 0x14a   : > { %1265 = vxpose.xlu2.b32.start.end [1/1] (short) (narrow) %v1263_v16, 8 }
 0x151   : > { %v1395_v32 = vpop.permute.xlu2 %1394 }
 0x157   : > { %v1168_v17 = vpop.permute.xlu0 %1167 }
 0x158   : > { %1170 = vxpose.xlu0.b32.start.end [1/1] (short) (narrow) %v1168_v17, 8 }
 0x159   : > { %v1509_v33 = vpop.permute.xlu2 %1508 }
 0x15a   : > { %v3769_v34 = vpack.i.bf16 %v1509_v33, %v1395_v32 }
 0x1c6   : > { %1544 = vrot.lane.b32.xlu0 %v4292_v12, %s3944_s12 }
 0x1e3   : > { %v1281_v35 = vpop.trf.xlu2 }
 0x1e4   : > { %v1297_v36 = vpack.c.bf16 %v1281_v35, %v1281_v35 }
 0x1e6   : > { %v1304_v37 = vsel %vm1207_vm2, %v1297_v36, 0  ;;  %v1161_v36 = vld [vmem:[%s4188_s8 + $0x8] sm:$0xff] }
 0x1e7   : > { %1313 = vmatpush.bf16.msra.mxu3 %v1304_v37  ;;  %v1355_v37 = vpack.c.bf16 %v1161_v36, %v1161_v36 }
 0x1eb   : > { %1388 = vmatpush.bf16.msrb.mxu3 %v1379_v45 }
 0x1fc   : > { %v1186_v18 = vpop.trf.xlu0 }
 0x1fd   : > { %v1202_v19 = vpack.c.bf16 %v1186_v18, %v1186_v18 }
 0x1ff   : > { %v1209_v20 = vsel %vm1207_vm2, %v1202_v19, 0 }
 0x200   : > { %1218 = vmatpush.bf16.msra.mxu1 %v1209_v20 }
 0x203   : > { %3631 = vmatmul.msk.bf16.vlgmr.msra.gmra.mxu1 %vm1203_vm3, %v4292_v12 }
 0x238   : > { %v1545_v60 = vpop.permute.xlu0 %1544 }
 0x280   : > { %v1220_v21 = vpop.f32.mrf.mxu1 }
 0x281   : > { %v1224_v23 = vmul.f32 0.35355338, %v1220_v21 }
 0x283   : > { %v1225_v24 = vadd.f32 %v1224_v23, %v4310_v22 }
 0x285   : > { %v1226_v25 = vsel %vm1203_vm3, %v1225_v24, -inf }
 0x286   : > { %1227 = vmax.xlane.f32.xlu1 %v1226_v25 }
 0x288   : > { %v1222_v26 = vpop.f32.mrf.mxu1 }
 0x2f9   : > { %v1228_v27 = vpop.xlane.xlu1 %1227 }
 0x2fa   : > { %v1229_v28 = vsub.f32 %v1225_v24, %v1228_v27 }
 0x2fc   : > { %v1230_v29 = vmul.f32 1.442695, %v1229_v28 }
 0x2fe   : > { %3795 = vpow2.f32 %v1230_v29 }
 0x304   : > { %v3796_v30 = vpop.eup %3795 }
 0x305   : > { %v1232_v31 = vsel %vm1203_vm3, %v3796_v30, 0.0 }
 0x306   : > { %1233 = vadd.xlane.f32.xlu1 %v1232_v31 }
 0x31f   : > { %1298 = vrot.lane.b32.xlu1 %v4292_v12, %s3945_s23 }
 0x327   : > { %1430 = vrot.lane.b32.xlu1 %v4292_v12, %s3946_s6 }
 0x35c   : > { %3770 = vxpose.xlu1.b32.start.end [1/1] (short) (narrow) %v3769_v34, 8 }
 0x379   : > { %v1234_v38 = vpop.xlane.xlu1 %1233 }
 0x37a   : > { %3797 = vrcp.f32 %v1234_v38  ;;  %v1360_v38 = vsel %vm1207_vm2, %v1355_v37, 0 }
 0x37b   : > { %1369 = vmatpush.bf16.msrb.mxu2 %v1360_v38 }
 0x380   : > { %v3798_v39 = vpop.eup %3797 }
 0x381   : > { %v1236_v40 = vmul.f32 %v3798_v39, %v3796_v30 }
 0x383   : > { %v1237_v41 = vpack.c.bf16 %v1236_v40, %v1236_v40 }
 0x385   : > { %3632 = vmatmul.msk.bf16.vlgmr.msra.gmra.mxu2 %vm1203_vm3, %v1237_v41 }
 0x391   : > { %v1299_v42 = vpop.permute.xlu1 %1298 }
 0x392   : > { %3633 = vmatmul.msk.bf16.vlgmr.msra.gmra.mxu3 %vm1203_vm3, %v1299_v42 }
 0x399   : > { %v1431_v46 = vpop.permute.xlu1 %1430 }
 0x400   : > { %v3771_v47 = vpop.trf.xlu1 }
 0x401   : > { %v3775_v48 = vunpack.i.h.bf16 %v3771_v47  ;;  %v3772_v49 = vunpack.i.l.bf16 %v3771_v47 }
 0x403   : > { %v1429_v50 = vpack.c.bf16 %v3772_v49, %v3772_v49  ;;  %v1543_v51 = vpack.c.bf16 %v3775_v48, %v3775_v48 }
 0x405   : > { %v1436_v52 = vsel %vm1207_vm2, %v1429_v50, 0  ;;  %v1550_v53 = vsel %vm1207_vm2, %v1543_v51, 0  ;;  %v1162_v51 = vld [vmem:[%s4188_s8 + $0x10] sm:$0xff] }
 0x406   : > { %1445 = vmatpush.bf16.msrb.mxu0 %v1436_v52  ;;  %1559 = vmatpush.bf16.msra.mxu3 %v1550_v53  ;;  %v1487_v52 = vpack.c.bf16 %v1162_v51, %v1162_v51 }
 0x408   : > { %v1256_v54 = vpop.f32.mrf.mxu2  ;;  %v1492_v53 = vsel %vm1207_vm2, %v1487_v52, 0 }
 0x409   : > { %v1260_v55 = vpack.c.bf16 %v1256_v54, %v1256_v54  ;;  %3637 = vmatmul.msk.bf16.vlgmr.msrb.gmra.mxu0 %vm1203_vm3, %v1431_v46  ;;  %1501 = vmatpush.bf16.msra.mxu2 %v1492_v53 }
 0x40b   : > { %3636 = vmatmul.msk.bf16.vlgmr.msrb.gmra.mxu3 %vm1203_vm3, %v1260_v55 }
 0x410   : > { %v1258_v56 = vpop.f32.mrf.mxu2 }
 0x411   : > { %v1163_v56 = vld [vmem:[%s4188_s8 + $0x18] sm:$0xff] }
 0x415   : > { %v1315_v57 = vpop.f32.mrf.mxu3 }
 0x416   : > { %v1319_v58 = vmul.f32 0.35355338, %v1315_v57  ;;  %v1601_v57 = vpack.c.bf16 %v1163_v56, %v1163_v56 }
 0x418   : > { %v1320_v59 = vadd.f32 %v1319_v58, %v4310_v22  ;;  %v1606_v58 = vsel %vm1207_vm2, %v1601_v57, 0 }
 0x41a   : > { %v1321_v61 = vsel %vm1203_vm3, %v1320_v59, -inf }
 0x41b   : > { %1322 = vmax.xlane.f32.xlu2 %v1321_v61  ;;  %3640 = vmatmul.msk.bf16.vlgmr.msra.gmra.mxu3 %vm1203_vm3, %v1545_v60 }
 0x41d   : > { %v1317_v62 = vpop.f32.mrf.mxu3 }
 0x486   : > { %v1447_v63 = vpop.f32.mrf.mxu0 }
 0x487   : > { %v1451_v0 = vmul.f32 0.35355338, %v1447_v63 }
 0x489   : > { %v1452_v1 = vadd.f32 %v1451_v0, %v4310_v22 }
 0x48b   : > { %v1453_v2 = vsel %vm1203_vm3, %v1452_v1, -inf }
 0x48c   : > { %1454 = vmax.xlane.f32.xlu1 %v1453_v2  ;;  %v1718_v2 = vld [vmem:[%s4214_s28 + $0x10] sm:$0xff] }
 0x48e   : > { %v1323_v3 = vpop.xlane.xlu2 %1322  ;;  %v4333_v4 = vpop.f32.mrf.mxu3 }
 0x48f   : > { %v1324_v5 = vsub.f32 %v1320_v59, %v1323_v3  ;;  %v1449_v7 = vpop.f32.mrf.mxu0  ;;  %v1719_v3 = vld [vmem:[%s4214_s28 + $0x18] sm:$0xff] }
 0x490   : > { %v1722_v7 = vpack.c.bf16 %v1719_v3, %v1718_v2  ;;  %v3785_v2 = vld [vmem:[%s5085_s0] ss:$0 sm:$0xff] }
 0x491   : > { %v1325_v8 = vmul.f32 1.442695, %v1324_v5  ;;  %v1716_v5 = vld [vmem:[%s4214_s28] sm:$0xff] }
 0x492   : > { %1736 = vmatpush.bf16.msrb.mxu3 %v1722_v7 }
 0x493   : > { %3799 = vpow2.f32 %v1325_v8  ;;  %v1717_v8 = vld [vmem:[%s4214_s28 + $0x8] sm:$0xff]  ;;  %s5087_s28 = scalar_lea.vmem %s4978_s11, %s4155_s5 }
 0x496   : > { %v1392_v9 = vpop.f32.mrf.mxu3 }
 0x499   : > { %v3800_v10 = vpop.eup %3799 }
 0x49a   : > { %v1327_v11 = vsel %vm1203_vm3, %v3800_v10, 0.0 }
 0x49b   : > { %1328 = vadd.xlane.f32.xlu2 %v1327_v11  ;;  %v1130_v11 = vld [vmem:[%s5080_s25] sm:$0xff]  ;;  %s5095_s25 = sld [smem:[#allocation34_spill]] }
 0x49e   : > { %v1561_v13 = vpop.f32.mrf.mxu3 }
 0x49f   : > { %v1565_v14 = vmul.f32 0.35355338, %v1561_v13  ;;  %v1720_v13 = vpack.c.bf16 %v1130_v11, %v1130_v11  ;;  %v3787_v11 = vld [vmem:[%s5086_s27] ss:$0 sm:$0xff] }
 0x4a1   : > { %v1566_v15 = vadd.f32 %v1565_v14, %v4310_v22  ;;  %s5096_s26 = scalar_lea.vmem %s5095_s25, %s4155_s5 }
 0x4a3   : > { %v1567_v16 = vsel %vm1203_vm3, %v1566_v15, -inf }
 0x4a4   : > { %1568 = vmax.xlane.f32.xlu0 %v1567_v16 }
 0x4a5   : > { %1465 = vrot.lane.b32.xlu1 %v4292_v12, %s3947_s10  ;;  %s5082_s10 = scalar_lea.vmem %s5081_s19, %s4155_s5 }
 0x4a6   : > { %v1563_v17 = vpop.f32.mrf.mxu3  ;;  %v3784_v16 = vld [vmem:[%s5082_s10] ss:$0 sm:$0xff] }
 0x4b3   : > { %1333 = vrot.lane.b32.xlu2 %v4292_v12, %s3948_s15 }
 0x4ff   : > { %v1455_v18 = vpop.xlane.xlu1 %1454 }
 0x500   : > { %v1456_v19 = vsub.f32 %v1452_v1, %v1455_v18 }
 0x502   : > { %v1457_v20 = vmul.f32 1.442695, %v1456_v19 }
 0x504   : > { %3801 = vpow2.f32 %v1457_v20 }
 0x50a   : > { %v3802_v21 = vpop.eup %3801 }
 0x50b   : > { %v1459_v23 = vsel %vm1203_vm3, %v3802_v21, 0.0 }
 0x50c   : > { %1460 = vadd.xlane.f32.xlu0 %v1459_v23 }
 0x50e   : > { %v1329_v24 = vpop.xlane.xlu2 %1328 }
 0x50f   : > { %3803 = vrcp.f32 %v1329_v24  ;;  %v3950_v24 = vmov 32.0  }
 0x515   : > { %v3804_v22 = vpop.eup %3803 }
 0x516   : > { %v1331_v25 = vmul.f32 %v3804_v22, %v3800_v10  ;;  %v1334_v26 = vpop.permute.xlu2 %1333  ;;  %v1721_v10 = vpack.c.bf16 %v1717_v8, %v1716_v5 }
 0x517   : > { %v1569_v27 = vpop.xlane.xlu0 %1568  ;;  %v1466_v28 = vpop.permute.xlu1 %1465  ;;  %v1339_v29 = vsel %vm1207_vm2, %v1334_v26, 0 }
 0x518   : > { %v1570_v30 = vsub.f32 %v1566_v15, %v1569_v27  ;;  %v1471_v31 = vsel %vm1207_vm2, %v1466_v28, 0  ;;  %1348 = vmatpush.bf16.msrb.mxu1 %v1339_v29  ;;  %v1332_v32 = vpack.c.bf16 %v1331_v25, %v1331_v25  ;;  %1737 = vmatpush.bf16.msrb.mxu3 %v1721_v10 }
 0x51a   : > { %v1571_v33 = vmul.f32 1.442695, %v1570_v30 }
 0x51b   : > { %3634 = vmatmul.msk.bf16.vlgmr.msrb.gmra.mxu1 %vm1203_vm3, %v1332_v32  ;;  %3644 = vmatmul.msk.bf16.vlgmr.msrb.gmra.mxu3 %vm1142_vm1, %v1720_v13 }
 0x51c   : > { %1480 = vmatpush.bf16.msra.mxu1 %v1471_v31  ;;  %3805 = vpow2.f32 %v1571_v33 }
 0x520   : > { %1615 = vmatpush.bf16.msrb.mxu1 %v1606_v58 }
 0x522   : > { %v3806_v34 = vpop.eup %3805 }
 0x523   : > { %v1573_v35 = vsel %vm1203_vm3, %v3806_v34, 0.0 }
 0x524   : > { %1574 = vadd.xlane.f32.xlu0 %v1573_v35  ;;  %v3951_v35 = vmov 31.0  }
 0x538   : > { %1579 = vrot.lane.b32.xlu0 %v4292_v12, %s3949_s16  ;;  %s5083_s16 = scalar_lea.vmem %s4980_s13, %s4155_s5 }
 0x539   : > { %v3786_v33 = vld [vmem:[%s5083_s16] ss:$0 sm:$0xff] }
 0x57f   : > { %v1461_v39 = vpop.xlane.xlu0 %1460 }
 0x580   : > { %3807 = vrcp.f32 %v1461_v39 }
 0x586   : > { %v3808_v40 = vpop.eup %3807 }
 0x587   : > { %v1463_v41 = vmul.f32 %v3808_v40, %v3802_v21 }
 0x589   : > { %v1464_v42 = vpack.c.bf16 %v1463_v41, %v1463_v41 }
 0x58b   : > { %3638 = vmatmul.msk.bf16.vlgmr.msra.gmra.mxu1 %vm1203_vm3, %v1464_v42 }
 0x597   : > { %v1575_v45 = vpop.xlane.xlu0 %1574 }
 0x598   : > { %v1350_v43 = vpop.f32.mrf.mxu1  ;;  %3809 = vrcp.f32 %v1575_v45  ;;  %v1689_v45 = vld [vmem:[%s4205_s24] sm:$0xff] }
 0x599   : > { %v1354_v44 = vpack.c.bf16 %v1350_v43, %v1350_v43  ;;  %3811 = vrcp.f32 %v3950_v24  ;;  %v1691_v43 = vld [vmem:[%s4205_s24 + $0x10] sm:$0xff] }
 0x59a   : > { %3813 = vrcp.f32 %v3951_v35 }
 0x59b   : > { %3635 = vmatmul.msk.bf16.vlgmr.msrb.gmra.mxu2 %vm1203_vm3, %v1354_v44  ;;  %v1692_v44 = vld [vmem:[%s4205_s24 + $0x18] sm:$0xff] }
 0x59e   : > { %v3810_v46 = vpop.eup %3809 }
 0x59f   : > { %v1577_v47 = vmul.f32 %v3810_v46, %v3806_v34  ;;  %v3812_v22 = vpop.eup %3811  ;;  %v1739_v34 = vpop.f32.mrf.mxu3  ;;  %v1690_v46 = vld [vmem:[%s4205_s24 + $0x8] sm:$0xff]  ;;  %s5088_s24 = sld [smem:[#allocation23_spill]] }
 0x5a0   : > { %v1352_v12 = vpop.f32.mrf.mxu1  ;;  %vm1637_vm4 = vweird.f32 %v3812_v22  ;;  %v4385_v36 = vadd.f32 %v3786_v33, %v1739_v34  ;;  %v3814_v37 = vpop.eup %3813 }
 0x5a1   : > { %v1578_v50 = vpack.c.bf16 %v1577_v47, %v1577_v47  ;;  %v1646_v39 = vmul.f32 31.0, %v3814_v37  ;;  %vm1650_vm5 = vweird.f32 %v3814_v37  ;;  %v1695_v12 = vpack.c.bf16 %v1692_v44, %v1691_v43 }
 0x5a2   : > { %1750 = vxpose.xlu0.b32.start.end [1/1] (short) (narrow) %v4385_v36, 8  ;;  %v1694_v47 = vpack.c.bf16 %v1690_v46, %v1689_v45 }
 0x5a3   : > { %v1647_v40 = vsub.f32 1.0, %v1646_v39  ;;  %1709 = vmatpush.bf16.msrb.mxu2 %v1695_v12 }
 0x5a5   : > { %v1648_v41 = vmul.f32 %v3814_v37, %v1647_v40  ;;  %s5089_s8 = scalar_lea.vmem %s5088_s24, %s5076_s30  ;;  %s3291_s30 = sshll.u32 %s4268_s14, 4  ;;  %s3292_s30 = int_to_ptr.vmem [resolvable:$true] %s3291_s30 }
 0x5a7   : > { %v1741_v38 = vpop.f32.mrf.mxu3  ;;  %v1649_v42 = vadd.f32 %v3814_v37, %v1648_v41  ;;  %1710 = vmatpush.bf16.msrb.mxu2 %v1694_v47 }
 0x5aa   : > { %v1580_v48 = vpop.permute.xlu0 %1579 }
 0x5ab   : > { %v1585_v49 = vsel %vm1207_vm2, %v1580_v48, 0  ;;  %v4396_v48 = vsel %vm1650_vm5, %v3814_v37, %v1649_v42 }
 0x5ac   : > { %1594 = vmatpush.bf16.msra.mxu0 %v1585_v49 }
 0x5af   : > { %3641 = vmatmul.msk.bf16.vlgmr.msra.gmra.mxu0 %vm1203_vm3, %v1578_v50 }
 0x608   : > { %v1482_v54 = vpop.f32.mrf.mxu1 }
 0x609   : > { %v1486_v55 = vpack.c.bf16 %v1482_v54, %v1482_v54 }
 0x60b   : > { %3639 = vmatmul.msk.bf16.vlgmr.msra.gmra.mxu2 %vm1203_vm3, %v1486_v55 }
 0x610   : > { %v1484_v59 = vpop.f32.mrf.mxu1 }
 0x61e   : > { %v1371_v60 = vpop.f32.mrf.mxu2 }
 0x61f   : > { %v1391_v14 = vadd.f32 %v4333_v4, %v1371_v60  ;;  %v1633_v4 = vmul.f32 32.0, %v3812_v22 }
 0x621   : > { %v1634_v25 = vsub.f32 1.0, %v1633_v4 }
 0x623   : > { %v1635_v26 = vmul.f32 %v3812_v22, %v1634_v25  ;;  %v4428_v25 = vld [vmem:[%s5089_s8] sm:$0xff]  ;;  %s5100_s8 = sld [smem:[#allocation41_spill]] }
 0x625   : > { %v1636_v27 = vadd.f32 %v3812_v22, %v1635_v26 }
 0x626   : > { %v1373_v61 = vpop.f32.mrf.mxu2 }
 0x627   : > { %v4376_v28 = vsel %vm1637_vm4, %v3812_v22, %v1636_v27 }
 0x629   : > { %s3863_s25 = scalar_lea.hbm %s5100_s8, 16 }
 0x62c   : > { %v1596_v62 = vpop.f32.mrf.mxu0 }
 0x62d   : > { %v1600_v63 = vpack.c.bf16 %v1596_v62, %v1596_v62 }
 0x62f   : > { %3642 = vmatmul.msk.bf16.vlgmr.msrb.gmra.mxu1 %vm1203_vm3, %v1600_v63 }
 0x634   : > { %v1598_v0 = vpop.f32.mrf.mxu0 }
 0x68e   : > { %v1503_v1 = vpop.f32.mrf.mxu2 }
 0x68f   : > { %v1507_v15 = vadd.f32 %v1503_v1, %v1391_v14 }
 0x696   : > { %v1505_v9 = vpop.f32.mrf.mxu2 }
 0x6ac   : > { %v1617_v17 = vpop.f32.mrf.mxu1 }
 0x6ad   : > { %v1621_v18 = vadd.f32 %v1617_v17, %v1507_v15  ;;  %v1766_v17 = vpop.trf.xlu0 }
 0x6af   : > { %v1625_v19 = vadd.f32 %v3784_v16, %v1621_v18  ;;  %v1782_v18 = vpack.c.bf16 %v1766_v17, %v1766_v17 }
 0x6b1   : > { %v1628_v20 = vadd.f32 %v1625_v19, %v4282_v6  ;;  %v1788_v19 = vsel %vm1207_vm2, %v1782_v18, 0 }
 0x6b2   : > { %1797 = vmatpush.bf16.msrb.mxu0 %v1788_v19 }
 0x6b3   : > { %v1629_v21 = vsel %vm1142_vm1, %v1628_v20, 0.0 }
 0x6b4   : > { %1630 = vadd.xlane.f32.xlu2 %v1629_v21  ;;  %v1619_v23 = vpop.f32.mrf.mxu1 }
 0x727   : > { %v1631_v29 = vpop.xlane.xlu2 %1630 }
 0x728   : > { %v1639_v30 = vmul.f32 %v4376_v28, %v1631_v29 }
 0x72a   : > { %v1640_v31 = vsub.f32 %v1628_v20, %v1639_v30  ;;  %v3788_v20 = vld [vmem:[%s5087_s28] ss:$0 sm:$0xff] }
 0x72c   : > { %v1641_v6 = vmul.f32 %v1640_v31, %v1640_v31  ;;  %v1668_v9 = vmul.f32 %v3785_v2, %v1640_v31  ;;  %v4434_v31 = vpack.c.bf16 %v4385_v36, %v4385_v36 }
 0x72e   : > { %v1642_v32 = vsel %vm1142_vm1, %v1641_v6, 0.0 }
 0x72f   : > { %1643 = vadd.xlane.f32.xlu1 %v1642_v32 }
 0x748   : > { %1842 = vrot.lane.b32.xlu1 %v4385_v36, %s3945_s23 }
 0x750   : > { %2089 = vrot.lane.b32.xlu1 %v4385_v36, %s3944_s12 }
 0x7a2   : > { %v1644_v49 = vpop.xlane.xlu1 %1643 }
 0x7a3   : > { %v1652_v50 = vmul.f32 %v4396_v48, %v1644_v49 }
 0x7a5   : > { %3815 = vrsqrt.f32 %v1652_v50  ;;  %vm1660_vm6 = vcmp.eq.f32.partialorder %v1652_v50, inf  ;;  %v1663_v58 = vand.u32 2147483648, %v1652_v50  ;;  %vm1662_vm7 = vcmp.eq.f32.partialorder %v1652_v50, 0.0 }
 0x7ab   : > { %v3816_v51 = vpop.eup %3815 }
 0x7ac   : > { %v1654_v52 = vmul.f32 %v3816_v51, %v1652_v50 }
 0x7ae   : > { %v1655_v53 = vmul.f32 %v3816_v51, %v1654_v52 }
 0x7b0   : > { %v1656_v54 = vmul.f32 0.5, %v1655_v53 }
 0x7b2   : > { %v1657_v55 = vsub.f32 1.5, %v1656_v54 }
 0x7b4   : > { %v1658_v56 = vmul.f32 %v3816_v51, %v1657_v55 }
 0x7b6   : > { %v1659_v57 = vmul.f32 %v1658_v56, %v1652_v50 }
 0x7b8   : > { %v1661_v59 = vsel %vm1660_vm6, %v1652_v50, %v1659_v57  ;;  %v1744_v57 = vld [vmem:[%s4223_s3] sm:$0xff] }
 0x7b9   : > { %v1664_v60 = vsel %vm1662_vm7, %v1663_v58, %v1661_v59  ;;  %v1840_v58 = vpack.c.bf16 %v1744_v57, %v1744_v57 }
 0x7ba   : > { %v1669_v61 = vadd.f32 1e-06, %v1664_v60  ;;  %v1843_v6 = vpop.permute.xlu1 %1842 }
 0x7bb   : > { %v1960_v59 = vsel %vm1207_vm2, %v1840_v58, 0 }
 0x7bc   : > { %3817 = vrcp.f32 %v1669_v61  ;;  %v1681_v1 = vand.u32 2147483648, %v1669_v61  ;;  %v1679_v5 = vand.u32 2147483647, %v1669_v61  ;;  %vm1675_vm9 = vweird.f32 %v1669_v61 }
 0x7be   : > { %v1682_v8 = vor.u32 1.1754944e-38, %v1681_v1  ;;  %vm1680_vm11 = vcmp.eq.f32.partialorder %v1679_v5, 8.507059e+37 }
 0x7c2   : > { %v3818_v62 = vpop.eup %3817  ;;  %v2090_v40 = vpop.permute.xlu1 %2089 }
 0x7c3   : > { %v1671_v63 = vmul.f32 %v3818_v62, %v1669_v61  ;;  %vm1676_vm8 = vweird.f32 %v3818_v62 }
 0x7c4   : > { %vm1677_vm10 = vmor %vm1675_vm9, %vm1676_vm8 }
 0x7c5   : > { %v1672_v0 = vsub.f32 1.0, %v1671_v63 }
 0x7c7   : > { %v1673_v3 = vmul.f32 %v3818_v62, %v1672_v0 }
 0x7c9   : > { %v1674_v7 = vadd.f32 %v3818_v62, %v1673_v3 }
 0x7cb   : > { %v1678_v10 = vsel %vm1677_vm10, %v3818_v62, %v1674_v7 }
 0x7cc   : > { %v1683_v13 = vsel %vm1680_vm11, %v1682_v8, %v1678_v10 }
 0x7cd   : > { %v1684_v14 = vmul.f32 %v1683_v13, %v1668_v9 }
 0x7cf   : > { %v4409_v15 = vadd.f32 %v3787_v11, %v1684_v14 }
 0x7d1   : > { %v1693_v16 = vpack.c.bf16 %v4409_v15, %v4409_v15 }
 0x7d3   : > { %3643 = vmatmul.msk.bf16.vlgmr.msrb.gmra.mxu2 %vm1142_vm1, %v1693_v16 }
 0x856   : > { %v1712_v21 = vpop.f32.mrf.mxu2 }
 0x857   : > { %v1713_v23 = vadd.f32 %v3788_v20, %v1712_v21 }
 0x859   : > { %v1749_v24 = vpack.c.bf16 %v1713_v23, %v1713_v23 }
 0x85b   : > { %2011 = vrot.lane.b32.xlu1 %v1749_v24, %s3946_s6  ;;  %3645 = vmatmul.msk.bf16.vlgmr.msrb.gmra.mxu0 %vm1203_vm3, %v1749_v24 }
 0x85e   : > { %v1714_v22 = vpop.f32.mrf.mxu2 }
 0x863   : > { %2125 = vrot.lane.b32.xlu1 %v1749_v24, %s3944_s12 }
 0x8cd   : > { %v2012_v50 = vpop.permute.xlu1 %2011 }
 0x8d5   : > { %v2126_v51 = vpop.permute.xlu1 %2125 }
 0x8d8   : > { %v1799_v4 = vpop.f32.mrf.mxu0 }
 0x8d9   : > { %v1803_v26 = vmul.f32 0.35355338, %v1799_v4 }
 0x8db   : > { %v1804_v27 = vadd.f32 %v1803_v26, %v4428_v25 }
 0x8dd   : > { %v1805_v29 = vsel %vm1203_vm3, %v1804_v27, -inf }
 0x8de   : > { %1806 = vmax.xlane.f32.xlu2 %v1805_v29 }
 0x8e0   : > { %v1801_v30 = vpop.f32.mrf.mxu0 }
 0x8f6   : > { %1818 = vrot.lane.b32.xlu2 %v4434_v31, %s3939_s2 }
 0x8fe   : > { %1975 = vrot.lane.b32.xlu2 %v4385_v36, %s3946_s6 }
 0x906   : > { %1879 = vrot.lane.b32.xlu2 %v1749_v24, %s3945_s23  ;;  %s5093_s23 = sld [smem:[#allocation33_spill]] }
 0x90c   : > { %s5094_s6 = scalar_lea.vmem %s5093_s23, %s4155_s5 }
 0x92c   : > { %1845 = vxpose.xlu2.b32.start.end [1/1] (short) (narrow) %v1843_v6, 8 }
 0x951   : > { %v1807_v32 = vpop.xlane.xlu2 %1806 }
 0x952   : > { %v1808_v33 = vsub.f32 %v1804_v27, %v1807_v32 }
 0x954   : > { %v1809_v34 = vmul.f32 1.442695, %v1808_v33 }
 0x956   : > { %3819 = vpow2.f32 %v1809_v34 }
 0x959   : > { %v1819_v35 = vpop.permute.xlu2 %1818 }
 0x95a   : > { %v1824_v37 = vsel %vm1207_vm2, %v1819_v35, 0 }
 0x95b   : > { %1833 = vmatpush.bf16.msra.mxu1 %v1824_v37 }
 0x95c   : > { %v3820_v38 = vpop.eup %3819 }
 0x95d   : > { %v1811_v39 = vsel %vm1203_vm3, %v3820_v38, 0.0 }
 0x95e   : > { %1812 = vadd.xlane.f32.xlu0 %v1811_v39 }
 0x95f   : > { %1969 = vmatpush.bf16.msrb.mxu1 %v1960_v59 }
 0x961   : > { %v1976_v41 = vpop.permute.xlu2 %1975 }
 0x962   : > { %v3776_v42 = vpack.i.bf16 %v2090_v40, %v1976_v41 }
 0x964   : > { %3777 = vxpose.xlu1.b32.start.end [1/1] (short) (narrow) %v3776_v42, 8 }
 0x969   : > { %v1880_v36 = vpop.permute.xlu2 %1879 }
 0x9c5   : > { %v1861_v43 = vpop.trf.xlu2 }
 0x9c6   : > { %v1877_v44 = vpack.c.bf16 %v1861_v43, %v1861_v43 }
 0x9c8   : > { %v1885_v45 = vsel %vm1207_vm2, %v1877_v44, 0 }
 0x9c9   : > { %1894 = vmatpush.bf16.msra.mxu2 %v1885_v45  ;;  %v1745_v45 = vld [vmem:[%s4223_s3 + $0x8] sm:$0xff] }
 0x9cc   : > { %3647 = vmatmul.msk.bf16.vlgmr.msra.gmra.mxu2 %vm1203_vm3, %v1880_v36 }
 0x9d1   : > { %v1813_v12 = vpop.xlane.xlu0 %1812 }
 0x9d2   : > { %3821 = vrcp.f32 %v1813_v12  ;;  %v1936_v12 = vpack.c.bf16 %v1745_v45, %v1745_v45 }
 0x9d8   : > { %v3822_v46 = vpop.eup %3821 }
 0x9d9   : > { %v1815_v47 = vmul.f32 %v3822_v46, %v3820_v38  ;;  %v1941_v46 = vsel %vm1207_vm2, %v1936_v12, 0 }
 0x9da   : > { %1950 = vmatpush.bf16.msra.mxu0 %v1941_v46 }
 0x9db   : > { %v1816_v49 = vpack.c.bf16 %v1815_v47, %v1815_v47 }
 0x9dd   : > { %3646 = vmatmul.msk.bf16.vlgmr.msra.gmra.mxu1 %vm1203_vm3, %v1816_v49 }
 0xa08   : > { %v3778_v52 = vpop.trf.xlu1 }
 0xa09   : > { %v3779_v53 = vunpack.i.l.bf16 %v3778_v52  ;;  %v3782_v56 = vunpack.i.h.bf16 %v3778_v52 }
 0xa0b   : > { %v2010_v54 = vpack.c.bf16 %v3779_v53, %v3779_v53  ;;  %v2124_v60 = vpack.c.bf16 %v3782_v56, %v3782_v56 }
 0xa0d   : > { %v2017_v55 = vsel %vm1207_vm2, %v2010_v54, 0  ;;  %v2131_v61 = vsel %vm1207_vm2, %v2124_v60, 0  ;;  %v1747_v60 = vld [vmem:[%s4223_s3 + $0x18] sm:$0xff] }
 0xa0e   : > { %2026 = vmatpush.bf16.msrb.mxu2 %v2017_v55  ;;  %2140 = vmatpush.bf16.msra.mxu1 %v2131_v61  ;;  %v2182_v61 = vpack.c.bf16 %v1747_v60, %v1747_v60 }
 0xa11   : > { %3651 = vmatmul.msk.bf16.vlgmr.msrb.gmra.mxu2 %vm1203_vm3, %v2012_v50 }
 0xa4f   : > { %v1896_v62 = vpop.f32.mrf.mxu2 }
 0xa50   : > { %v1900_v63 = vmul.f32 0.35355338, %v1896_v62  ;;  %v2187_v62 = vsel %vm1207_vm2, %v2182_v61, 0 }
 0xa52   : > { %v1901_v0 = vadd.f32 %v1900_v63, %v4428_v25  ;;  %v1746_v63 = vld [vmem:[%s4223_s3 + $0x10] sm:$0xff]  ;;  %s5101_s3 = sld [smem:[#allocation6_spill]] }
 0xa54   : > { %v1902_v1 = vsel %vm1203_vm3, %v1901_v0, -inf }
 0xa55   : > { %1903 = vmax.xlane.f32.xlu2 %v1902_v1 }
 0xa57   : > { %v1898_v2 = vpop.f32.mrf.mxu2 }
 0xa58   : > { %s5104_s23 = sand.u32 1, %s5101_s3  }
 0xa5a   : > { %v1835_v3 = vpop.f32.mrf.mxu1 }
 0xa5b   : > { %v1839_v5 = vpack.c.bf16 %v1835_v3, %v1835_v3 }
 0xa5d   : > { %3650 = vmatmul.msk.bf16.vlgmr.msrb.gmra.mxu1 %vm1203_vm3, %v1839_v5 }
 0xa62   : > { %v1837_v7 = vpop.f32.mrf.mxu1 }
 0xa6d   : > { %2160 = vrot.lane.b32.xlu2 %v4434_v31, %s3943_s22  ;;  %3654 = vmatmul.msk.bf16.vlgmr.msra.gmra.mxu1 %vm1203_vm3, %v2126_v51  ;;  %s5092_s22 = sld [smem:[#allocation19_spill]] }
 0xa73   : > { %v2256_v12 = vld [vmem:[%s5092_s22] sm:$0xff] }
 0xa74   : > { %v2272_v46 = vld [vmem:[%s5092_s22 + $0x80] sm:$0xff] }
 0xa75   : > { %v2292_v60 = vld [vmem:[%s5092_s22 + $0x120] sm:$0xff] }
 0xa76   : > { %v2308_v61 = vld [vmem:[%s5092_s22 + $0x1a0] sm:$0xff] }
 0xa94   : > { %v2028_v8 = vpop.f32.mrf.mxu2 }
 0xa95   : > { %v2032_v9 = vmul.f32 0.35355338, %v2028_v8 }
 0xa97   : > { %v2033_v10 = vadd.f32 %v2032_v9, %v4428_v25 }
 0xa99   : > { %v2034_v11 = vsel %vm1203_vm3, %v2033_v10, -inf }
 0xa9a   : > { %2035 = vmax.xlane.f32.xlu0 %v2034_v11 }
 0xa9c   : > { %v2030_v13 = vpop.f32.mrf.mxu2 }
 0xac8   : > { %v1904_v14 = vpop.xlane.xlu2 %1903 }
 0xac9   : > { %v1905_v16 = vsub.f32 %v1901_v0, %v1904_v14  ;;  %v2068_v0 = vpack.c.bf16 %v1746_v63, %v1746_v63  ;;  %v2341_v63 = vpack.c.bf16 %v2308_v61, %v2292_v60  ;;  %v2282_v60 = vld [vmem:[%s5092_s22 + $0xd0] sm:$0xff]  ;;  %v2267_v61 = vld [vmem:[%s5092_s22 + $0x58] sm:$0xff] }
 0xacb   : > { %v1906_v17 = vmul.f32 1.442695, %v1905_v16  ;;  %v2073_v1 = vsel %vm1207_vm2, %v2068_v0, 0  ;;  %v2309_v0 = vld [vmem:[%s5092_s22 + $0x1a8] sm:$0xff] }
 0xacc   : > { %2082 = vmatpush.bf16.msrb.mxu0 %v2073_v1  ;;  %v2294_v1 = vld [vmem:[%s5092_s22 + $0x130] sm:$0xff] }
 0xacd   : > { %3823 = vpow2.f32 %v1906_v17 }
 0xad0   : > { %v2161_v18 = vpop.permute.xlu2 %2160 }
 0xad1   : > { %v2166_v19 = vsel %vm1207_vm2, %v2161_v18, 0 }
 0xad2   : > { %2175 = vmatpush.bf16.msra.mxu2 %v2166_v19 }
 0xad3   : > { %v3824_v20 = vpop.eup %3823 }
 0xad4   : > { %v1908_v21 = vsel %vm1203_vm3, %v3824_v20, 0.0 }
 0xad5   : > { %1909 = vadd.xlane.f32.xlu0 %v1908_v21 }
 0xada   : > { %v4461_v23 = vpop.f32.mrf.mxu1 }
 0xae2   : > { %v1973_v24 = vpop.f32.mrf.mxu1 }
 0xae9   : > { %1914 = vrot.lane.b32.xlu0 %v4434_v31, %s3941_s20  ;;  %s5090_s20 = sld [smem:[#allocation32_spill]] }
 0xaea   : > { %v2142_v22 = vpop.f32.mrf.mxu1 }
 0xaeb   : > { %v2146_v4 = vmul.f32 0.35355338, %v2142_v22 }
 0xaed   : > { %v2147_v26 = vadd.f32 %v2146_v4, %v4428_v25 }
 0xaef   : > { %v2148_v27 = vsel %vm1203_vm3, %v2147_v26, -inf }
 0xaf0   : > { %2149 = vmax.xlane.f32.xlu1 %v2148_v27 }
 0xaf2   : > { %v2144_v29 = vpop.f32.mrf.mxu1 }
 0xb0d   : > { %v2036_v30 = vpop.xlane.xlu0 %2035 }
 0xb0e   : > { %v2037_v6 = vsub.f32 %v2033_v10, %v2036_v30 }
 0xb10   : > { %v2038_v32 = vmul.f32 1.442695, %v2037_v6 }
 0xb12   : > { %3825 = vpow2.f32 %v2038_v32  ;;  %v2288_v32 = vld [vmem:[%s5092_s22 + $0x100] sm:$0xff] }
 0xb18   : > { %v3826_v33 = vpop.eup %3825 }
 0xb19   : > { %v2040_v34 = vsel %vm1203_vm3, %v3826_v33, 0.0 }
 0xb1a   : > { %2041 = vadd.xlane.f32.xlu0 %v2040_v34  ;;  %v2289_v34 = vld [vmem:[%s5092_s22 + $0x108] sm:$0xff] }
 0xb48   : > { %v1910_v35 = vpop.xlane.xlu0 %1909 }
 0xb49   : > { %3827 = vrcp.f32 %v1910_v35 }
 0xb4f   : > { %v3828_v37 = vpop.eup %3827 }
 0xb50   : > { %v1912_v38 = vmul.f32 %v3828_v37, %v3824_v20 }
 0xb52   : > { %v1913_v40 = vpack.c.bf16 %v1912_v38, %v1912_v38  ;;  %v2305_v38 = vld [vmem:[%s5092_s22 + $0x188] sm:$0xff] }
 0xb5b   : > { %v1915_v39 = vpop.permute.xlu0 %1914 }
 0xb5c   : > { %v1920_v25 = vsel %vm1207_vm2, %v1915_v39, 0  ;;  %v2290_v39 = vld [vmem:[%s5092_s22 + $0x110] sm:$0xff] }
 0xb5d   : > { %1929 = vmatpush.bf16.msra.mxu3 %v1920_v25  ;;  %v2306_v25 = vld [vmem:[%s5092_s22 + $0x190] sm:$0xff] }
 0xb60   : > { %3648 = vmatmul.msk.bf16.vlgmr.msra.gmra.mxu3 %vm1203_vm3, %v1913_v40 }
 0xb63   : > { %v2150_v41 = vpop.xlane.xlu1 %2149 }
 0xb64   : > { %v2151_v42 = vsub.f32 %v2147_v26, %v2150_v41  ;;  %v2338_v41 = vpack.c.bf16 %v2305_v38, %v2289_v34  ;;  %v3790_v34 = vld [vmem:[%s5094_s6] ss:$0 sm:$0xff]  ;;  %s3279_s6 = scalar_lea.sflag [#allocation3], %s5104_s23 }
 0xb66   : > { %v2152_v36 = vmul.f32 1.442695, %v2151_v42  ;;  %v2339_v42 = vpack.c.bf16 %v2306_v25, %v2290_v39  ;;  %2411 = vmatpush.bf16.msrb.mxu1 %v2338_v41 }
 0xb68   : > { %3829 = vpow2.f32 %v2152_v36  ;;  %v2291_v36 = vld [vmem:[%s5092_s22 + $0x118] sm:$0xff]  ;;  %2424 = vmatpush.bf16.msrb.mxu2 %v2339_v42 }
 0xb6e   : > { %v3830_v43 = vpop.eup %3829 }
 0xb6f   : > { %v2154_v44 = vsel %vm1203_vm3, %v3830_v43, 0.0 }
 0xb70   : > { %2155 = vadd.xlane.f32.xlu0 %v2154_v44 }
 0xb84   : > { %2046 = vrot.lane.b32.xlu0 %v4434_v31, %s3942_s21  ;;  %s5091_s21 = scalar_lea.vmem %s5090_s20, %s4155_s5 }
 0xb85   : > { %v3789_v18 = vld [vmem:[%s5091_s21] ss:$0 sm:$0xff] }
 0xb8d   : > { %v2042_v47 = vpop.xlane.xlu0 %2041 }
 0xbe3   : > { %v1931_v49 = vpop.f32.mrf.mxu3  ;;  %v2156_v50 = vpop.xlane.xlu0 %2155 }
 0xbe4   : > { %v1935_v51 = vpack.c.bf16 %v1931_v49, %v1931_v49  ;;  %3831 = vrcp.f32 %v2156_v50  ;;  %v2321_v49 = vpack.c.bf16 %v2272_v46, %v2256_v12  ;;  %v2273_v50 = vld [vmem:[%s5092_s22 + $0x88] sm:$0xff]  ;;  %v2298_v46 = vld [vmem:[%s5092_s22 + $0x150] sm:$0xff] }
 0xbe5   : > { %3833 = vrcp.f32 %v2042_v47  ;;  %v2257_v47 = vld [vmem:[%s5092_s22 + $0x8] sm:$0xff] }
 0xbe6   : > { %3649 = vmatmul.msk.bf16.vlgmr.msra.gmra.mxu0 %vm1203_vm3, %v1935_v51  ;;  %v2258_v51 = vld [vmem:[%s5092_s22 + $0x10] sm:$0xff]  ;;  %v2313_v12 = vld [vmem:[%s5092_s22 + $0x1c8] sm:$0xff] }
 0xbea   : > { %v3832_v52 = vpop.eup %3831 }
 0xbeb   : > { %v2158_v53 = vmul.f32 %v3832_v52, %v3830_v43  ;;  %v1933_v54 = vpop.f32.mrf.mxu3  ;;  %v3834_v31 = vpop.eup %3833  ;;  %v2307_v43 = vld [vmem:[%s5092_s22 + $0x198] sm:$0xff]  ;;  %v2274_v52 = vld [vmem:[%s5092_s22 + $0x90] sm:$0xff] }
 0xbec   : > { %v2044_v56 = vmul.f32 %v3834_v31, %v3826_v33  ;;  %v2304_v33 = vld [vmem:[%s5092_s22 + $0x180] sm:$0xff]  ;;  %v2340_v44 = vpack.c.bf16 %v2307_v43, %v2291_v36  ;;  %v2322_v54 = vpack.c.bf16 %v2273_v50, %v2257_v47  ;;  %v2259_v31 = vld [vmem:[%s5092_s22 + $0x18] sm:$0xff]  ;;  %v2314_v47 = vld [vmem:[%s5092_s22 + $0x1d0] sm:$0xff] }
 0xbed   : > { %v2159_v55 = vpack.c.bf16 %v2158_v53, %v2158_v53  ;;  %v2337_v37 = vpack.c.bf16 %v2304_v33, %v2288_v32  ;;  %v2296_v43 = vld [vmem:[%s5092_s22 + $0x140] sm:$0xff]  ;;  %v2315_v50 = vld [vmem:[%s5092_s22 + $0x1d8] sm:$0xff] }
 0xbee   : > { %v2045_v59 = vpack.c.bf16 %v2044_v56, %v2044_v56  ;;  %v2275_v56 = vld [vmem:[%s5092_s22 + $0x98] sm:$0xff]  ;;  %2412 = vmatpush.bf16.msrb.mxu1 %v2322_v54  ;;  %v2264_v54 = vld [vmem:[%s5092_s22 + $0x40] sm:$0xff] }
 0xbef   : > { %3655 = vmatmul.msk.bf16.vlgmr.msra.gmra.mxu2 %vm1203_vm3, %v2159_v55  ;;  %2398 = vmatpush.bf16.msra.mxu0 %v2337_v37  ;;  %v2323_v55 = vpack.c.bf16 %v2274_v52, %v2258_v51 }
 0xbf1   : > { %2425 = vmatpush.bf16.msrb.mxu2 %v2323_v55  ;;  %v2280_v55 = vld [vmem:[%s5092_s22 + $0xc0] sm:$0xff] }
 0xbf3   : > { %2399 = vmatpush.bf16.msra.mxu0 %v2321_v49  ;;  %v2299_v49 = vld [vmem:[%s5092_s22 + $0x158] sm:$0xff] }
 0xbf6   : > { %v2047_v57 = vpop.permute.xlu0 %2046 }
 0xbf7   : > { %v2052_v58 = vsel %vm1207_vm2, %v2047_v57, 0  ;;  %v2324_v57 = vpack.c.bf16 %v2275_v56, %v2259_v31  ;;  %v2347_v31 = vpack.c.bf16 %v2314_v47, %v2298_v46  ;;  %v2348_v56 = vpack.c.bf16 %v2315_v50, %v2299_v49  ;;  %v2660_v46 = vld [vmem:[%s4253_s4 + $0x160] sm:$0xff]  ;;  %v2661_v47 = vld [vmem:[%s4253_s4 + $0x168] sm:$0xff] }
 0xbf8   : > { %2061 = vmatpush.bf16.msrb.mxu3 %v2052_v58  ;;  %v2676_v49 = vld [vmem:[%s4253_s4 + $0x1e0] sm:$0xff]  ;;  %v2677_v50 = vld [vmem:[%s4253_s4 + $0x1e8] sm:$0xff] }
 0xbfb   : > { %3652 = vmatmul.msk.bf16.vlgmr.msrb.gmra.mxu3 %vm1203_vm3, %v2045_v59 }
 0xbfc   : > { %2196 = vmatpush.bf16.msra.mxu3 %v2187_v62  ;;  %v2293_v62 = vld [vmem:[%s5092_s22 + $0x128] sm:$0xff] }
 0xc00   : > { %2437 = vmatpush.bf16.msrb.mxu3 %v2340_v44  ;;  %v2312_v44 = vld [vmem:[%s5092_s22 + $0x1c0] sm:$0xff] }
 0xc01   : > { %v2345_v52 = vpack.c.bf16 %v2312_v44, %v2296_v43  ;;  %v2644_v43 = vld [vmem:[%s4253_s4 + $0xe0] sm:$0xff]  ;;  %v2645_v44 = vld [vmem:[%s4253_s4 + $0xe8] sm:$0xff] }
 0xc04   : > { %2438 = vmatpush.bf16.msrb.mxu3 %v2324_v57  ;;  %v2265_v57 = vld [vmem:[%s5092_s22 + $0x48] sm:$0xff] }
 0xc63   : > { %v1952_v2 = vpop.f32.mrf.mxu0 }
 0xc64   : > { %v1972_v14 = vadd.f32 %v4461_v23, %v1952_v2  ;;  %v2310_v2 = vld [vmem:[%s5092_s22 + $0x1b0] sm:$0xff] }
 0xc6b   : > { %v1954_v3 = vpop.f32.mrf.mxu0 }
 0xc72   : > { %v2177_v5 = vpop.f32.mrf.mxu2 }
 0xc73   : > { %v2181_v7 = vpack.c.bf16 %v2177_v5, %v2177_v5  ;;  %v2342_v5 = vpack.c.bf16 %v2309_v0, %v2293_v62  ;;  %v2283_v62 = vld [vmem:[%s5092_s22 + $0xd8] sm:$0xff] }
 0xc75   : > { %3656 = vmatmul.msk.bf16.vlgmr.msra.gmra.mxu3 %vm1203_vm3, %v2181_v7  ;;  %v2343_v7 = vpack.c.bf16 %v2310_v2, %v2294_v1  ;;  %2463 = vmatpush.bf16.msra.mxu1 %v2342_v5  ;;  %v2332_v2 = vpack.c.bf16 %v2283_v62, %v2267_v61  ;;  %v2316_v5 = vld [vmem:[%s5092_s22 + $0x1e0] sm:$0xff]  ;;  %v2674_v61 = vld [vmem:[%s4253_s4 + $0x1d0] sm:$0xff]  ;;  %v2675_v62 = vld [vmem:[%s4253_s4 + $0x1d8] sm:$0xff] }
 0xc77   : > { %2476 = vmatpush.bf16.msra.mxu2 %v2343_v7  ;;  %v2301_v7 = vld [vmem:[%s5092_s22 + $0x168] sm:$0xff] }
 0xc7a   : > { %v2179_v8 = vpop.f32.mrf.mxu2 }
 0xc7b   : > { %v2295_v8 = vld [vmem:[%s5092_s22 + $0x138] sm:$0xff] }
 0xc7e   : > { %v2063_v9 = vpop.f32.mrf.mxu3 }
 0xc7f   : > { %v2067_v10 = vpack.c.bf16 %v2063_v9, %v2063_v9  ;;  %v2311_v9 = vld [vmem:[%s5092_s22 + $0x1b8] sm:$0xff] }
 0xc81   : > { %3653 = vmatmul.msk.bf16.vlgmr.msrb.gmra.mxu0 %vm1203_vm3, %v2067_v10  ;;  %v2260_v10 = vld [vmem:[%s5092_s22 + $0x20] sm:$0xff] }
 0xc82   : > { %2450 = vmatpush.bf16.msrb.mxu0 %v2341_v63  ;;  %v2329_v63 = vpack.c.bf16 %v2280_v55, %v2264_v54  ;;  %v2626_v54 = vld [vmem:[%s4253_s4 + $0x50] sm:$0xff]  ;;  %v2627_v55 = vld [vmem:[%s4253_s4 + $0x58] sm:$0xff] }
 0xc86   : > { %v2065_v11 = vpop.f32.mrf.mxu3 }
 0xcf8   : > { %v2198_v13 = vpop.f32.mrf.mxu3 }
 0xcfe   : > { %v2084_v16 = vpop.f32.mrf.mxu0 }
 0xcff   : > { %v2088_v17 = vadd.f32 %v2084_v16, %v1972_v14  ;;  %v2276_v14 = vld [vmem:[%s5092_s22 + $0xa0] sm:$0xff]  ;;  %v2261_v16 = vld [vmem:[%s5092_s22 + $0x28] sm:$0xff] }
 0xd00   : > { %v2200_v19 = vpop.f32.mrf.mxu3 }
 0xd01   : > { %v2202_v20 = vadd.f32 %v2198_v13, %v2088_v17  ;;  %v2344_v13 = vpack.c.bf16 %v2311_v9, %v2295_v8  ;;  %v2277_v17 = vld [vmem:[%s5092_s22 + $0xa8] sm:$0xff]  ;;  %v2325_v19 = vpack.c.bf16 %v2276_v14, %v2260_v10  ;;  %v2302_v9 = vld [vmem:[%s5092_s22 + $0x170] sm:$0xff] }
 0xd02   : > { %v2317_v8 = vld [vmem:[%s5092_s22 + $0x1e8] sm:$0xff]  ;;  %v2318_v10 = vld [vmem:[%s5092_s22 + $0x1f0] sm:$0xff] }
 0xd03   : > { %v2206_v21 = vadd.f32 %v3789_v18, %v2202_v20  ;;  %v2326_v20 = vpack.c.bf16 %v2277_v17, %v2261_v16  ;;  %2489 = vmatpush.bf16.msra.mxu3 %v2344_v13  ;;  %2451 = vmatpush.bf16.msrb.mxu0 %v2325_v19  ;;  %v2319_v13 = vld [vmem:[%s5092_s22 + $0x1f8] sm:$0xff]  ;;  %v2350_v16 = vpack.c.bf16 %v2317_v8, %v2301_v7  ;;  %v2268_v17 = vld [vmem:[%s5092_s22 + $0x60] sm:$0xff] }
 0xd04   : > { %v2351_v19 = vpack.c.bf16 %v2318_v10, %v2302_v9  ;;  %v2917_v8 = vpack.c.bf16 %v2675_v62, %v2674_v61  ;;  %v2656_v9 = vld [vmem:[%s4253_s4 + $0x140] sm:$0xff]  ;;  %v2657_v10 = vld [vmem:[%s4253_s4 + $0x148] sm:$0xff]  ;;  %v2711_v61 = vld [vmem:[%s4253_s4 + $0x2f8] sm:$0xff] }
 0xd05   : > { %v2209_v24 = vadd.f32 %v2206_v21, %v4409_v15  ;;  %v2262_v21 = vld [vmem:[%s5092_s22 + $0x30] sm:$0xff]  ;;  %2464 = vmatpush.bf16.msra.mxu1 %v2326_v20  ;;  %v2648_v62 = vld [vmem:[%s4253_s4 + $0x100] sm:$0xff] }
 0xd06   : > { %v2086_v22 = vpop.f32.mrf.mxu0 }
 0xd07   : > { %v2210_v4 = vsel %vm1142_vm1, %v2209_v24, 0.0  ;;  %v2263_v22 = vld [vmem:[%s5092_s22 + $0x38] sm:$0xff] }
 0xd08   : > { %2211 = vadd.xlane.f32.xlu1 %v2210_v4 }
 0xd7b   : > { %v2212_v23 = vpop.xlane.xlu1 %2211 }
 0xd7c   : > { %v2213_v26 = vmul.f32 %v2212_v23, %v4376_v28 }
 0xd7e   : > { %v4494_v27 = vsub.f32 %v2209_v24, %v2213_v26  ;;  %v2278_v24 = vld [vmem:[%s5092_s22 + $0xb0] sm:$0xff]  ;;  %v2279_v26 = vld [vmem:[%s5092_s22 + $0xb8] sm:$0xff] }
 0xd7f   : > { %v2327_v23 = vpack.c.bf16 %v2278_v24, %v2262_v21  ;;  %v2269_v21 = vld [vmem:[%s5092_s22 + $0x68] sm:$0xff] }
 0xd80   : > { %v2215_v29 = vmul.f32 %v4494_v27, %v4494_v27  ;;  %v2235_v25 = vmul.f32 %v3790_v34, %v4494_v27  ;;  %v2285_v24 = vld [vmem:[%s5092_s22 + $0xe8] sm:$0xff]  ;;  %v2646_v34 = vld [vmem:[%s4253_s4 + $0xf0] sm:$0xff] }
 0xd81   : > { %2477 = vmatpush.bf16.msra.mxu2 %v2327_v23  ;;  %v2271_v23 = vld [vmem:[%s5092_s22 + $0x78] sm:$0xff] }
 0xd82   : > { %v2216_v30 = vsel %vm1142_vm1, %v2215_v29, 0.0 }
 0xd83   : > { %2217 = vadd.xlane.f32.xlu1 %v2216_v30  ;;  %v2328_v30 = vpack.c.bf16 %v2279_v26, %v2263_v22  ;;  %v2270_v22 = vld [vmem:[%s5092_s22 + $0x70] sm:$0xff]  ;;  %v2287_v26 = vld [vmem:[%s5092_s22 + $0xf8] sm:$0xff] }
 0xd85   : > { %2490 = vmatpush.bf16.msra.mxu3 %v2328_v30  ;;  %v2334_v30 = vpack.c.bf16 %v2285_v24, %v2269_v21  ;;  %v2908_v21 = vpack.c.bf16 %v2657_v10, %v2656_v9  ;;  %v2743_v9 = vld [vmem:[%s4253_s4 + $0x3f8] sm:$0xff] }
 0xdf6   : > { %v2218_v15 = vpop.xlane.xlu1 %2217 }
 0xdf7   : > { %v4500_v6 = vmul.f32 %v2218_v15, %v4396_v48 }
 0xdf9   : > { %3835 = vrsqrt.f32 %v4500_v6  ;;  %vm2227_vm12 = vcmp.eq.f32.partialorder %v4500_v6, inf  ;;  %v2230_v11 = vand.u32 2147483648, %v4500_v6  ;;  %vm2229_vm13 = vcmp.eq.f32.partialorder %v4500_v6, 0.0 }
 0xdff   : > { %v3836_v35 = vpop.eup %3835 }
 0xe00   : > { %v2221_v40 = vmul.f32 %v3836_v35, %v4500_v6 }
 0xe02   : > { %v2222_v45 = vmul.f32 %v3836_v35, %v2221_v40  ;;  %v3791_v40 = vld [vmem:[%s5096_s26] ss:$0 sm:$0xff] }
 0xe04   : > { %v2223_v53 = vmul.f32 0.5, %v2222_v45  ;;  %v2297_v45 = vld [vmem:[%s5092_s22 + $0x148] sm:$0xff] }
 0xe06   : > { %v2224_v58 = vsub.f32 1.5, %v2223_v53  ;;  %v2346_v53 = vpack.c.bf16 %v2313_v12, %v2297_v45 }
 0xe08   : > { %v2225_v59 = vmul.f32 %v3836_v35, %v2224_v58  ;;  %v2281_v58 = vld [vmem:[%s5092_s22 + $0xc8] sm:$0xff] }
 0xe09   : > { %v2330_v0 = vpack.c.bf16 %v2281_v58, %v2265_v57  ;;  %v2910_v57 = vpack.c.bf16 %v2661_v47, %v2660_v46  ;;  %v2918_v58 = vpack.c.bf16 %v2677_v50, %v2676_v49  ;;  %v2651_v46 = vld [vmem:[%s4253_s4 + $0x118] sm:$0xff]  ;;  %v2666_v47 = vld [vmem:[%s4253_s4 + $0x190] sm:$0xff]  ;;  %v2616_v50 = vld [vmem:[%s4253_s4] sm:$0xff] }
 0xe0a   : > { %v2226_v3 = vmul.f32 %v2225_v59, %v4500_v6  ;;  %v2266_v59 = vld [vmem:[%s5092_s22 + $0x50] sm:$0xff]  ;;  %v2667_v49 = vld [vmem:[%s4253_s4 + $0x198] sm:$0xff] }
 0xe0b   : > { %v2331_v1 = vpack.c.bf16 %v2282_v60, %v2266_v59  ;;  %v2658_v59 = vld [vmem:[%s4253_s4 + $0x150] sm:$0xff]  ;;  %v2659_v60 = vld [vmem:[%s4253_s4 + $0x158] sm:$0xff] }
 0xe0c   : > { %v2228_v18 = vsel %vm2227_vm12, %v4500_v6, %v2226_v3  ;;  %v2300_v3 = vld [vmem:[%s5092_s22 + $0x160] sm:$0xff]  ;;  %v2909_v7 = vpack.c.bf16 %v2659_v60, %v2658_v59  ;;  %v2913_v60 = vpack.c.bf16 %v2667_v49, %v2666_v47  ;;  %v2737_v47 = vld [vmem:[%s4253_s4 + $0x3c8] sm:$0xff] }
 0xe0d   : > { %v2231_v4 = vsel %vm2229_vm13, %v2230_v11, %v2228_v18  ;;  %v2303_v11 = vld [vmem:[%s5092_s22 + $0x178] sm:$0xff]  ;;  %v2349_v14 = vpack.c.bf16 %v2316_v5, %v2300_v3  ;;  %v2284_v18 = vld [vmem:[%s5092_s22 + $0xe0] sm:$0xff]  ;;  %v2641_v5 = vld [vmem:[%s4253_s4 + $0xc8] sm:$0xff] }
 0xe0e   : > { %v2236_v29 = vadd.f32 1e-06, %v2231_v4  ;;  %v2352_v20 = vpack.c.bf16 %v2319_v13, %v2303_v11  ;;  %v2286_v4 = vld [vmem:[%s5092_s22 + $0xf0] sm:$0xff]  ;;  %v2640_v3 = vld [vmem:[%s4253_s4 + $0xc0] sm:$0xff]  ;;  %v2673_v13 = vld [vmem:[%s4253_s4 + $0x1c8] sm:$0xff] }
 0xe0f   : > { %v2672_v11 = vld [vmem:[%s4253_s4 + $0x1c0] sm:$0xff] }
 0xe10   : > { %3837 = vrcp.f32 %v2236_v29  ;;  %v2248_v33 = vand.u32 2147483648, %v2236_v29  ;;  %v2246_v37 = vand.u32 2147483647, %v2236_v29  ;;  %vm2242_vm15 = vweird.f32 %v2236_v29 }
 0xe11   : > { %v2916_v24 = vpack.c.bf16 %v2673_v13, %v2672_v11  ;;  %v2692_v13 = vld [vmem:[%s4253_s4 + $0x260] sm:$0xff] }
 0xe12   : > { %v2249_v39 = vor.u32 1.1754944e-38, %v2248_v33  ;;  %vm2247_vm2 = vcmp.eq.f32.partialorder %v2246_v37, 8.507059e+37  ;;  %v2631_v33 = vld [vmem:[%s4253_s4 + $0x78] sm:$0xff]  ;;  %v2662_v37 = vld [vmem:[%s4253_s4 + $0x170] sm:$0xff] }
 0xe16   : > { %v3838_v15 = vpop.eup %3837 }
 0xe17   : > { %v2238_v6 = vmul.f32 %v3838_v15, %v2236_v29  ;;  %vm2243_vm14 = vweird.f32 %v3838_v15  ;;  %v2333_v29 = vpack.c.bf16 %v2284_v18, %v2268_v17  ;;  %v2622_v17 = vld [vmem:[%s4253_s4 + $0x30] sm:$0xff]  ;;  %v2623_v18 = vld [vmem:[%s4253_s4 + $0x38] sm:$0xff] }
 0xe18   : > { %vm2244_vm0 = vmor %vm2242_vm15, %vm2243_vm14 }
 0xe19   : > { %v2239_v32 = vsub.f32 1.0, %v2238_v6  ;;  %v2336_v6 = vpack.c.bf16 %v2287_v26, %v2271_v23  ;;  %v2670_v23 = vld [vmem:[%s4253_s4 + $0x1b0] sm:$0xff]  ;;  %v2671_v26 = vld [vmem:[%s4253_s4 + $0x1b8] sm:$0xff] }
 0xe1b   : > { %v2240_v35 = vmul.f32 %v3838_v15, %v2239_v32  ;;  %v2630_v32 = vld [vmem:[%s4253_s4 + $0x70] sm:$0xff] }
 0xe1d   : > { %v2241_v38 = vadd.f32 %v3838_v15, %v2240_v35  ;;  %v2647_v35 = vld [vmem:[%s4253_s4 + $0xf8] sm:$0xff] }
 0xe1f   : > { %v2245_v41 = vsel %vm2244_vm0, %v3838_v15, %v2241_v38  ;;  %v2335_v15 = vpack.c.bf16 %v2286_v4, %v2270_v22  ;;  %v2663_v38 = vld [vmem:[%s4253_s4 + $0x178] sm:$0xff]  ;;  %v2654_v22 = vld [vmem:[%s4253_s4 + $0x130] sm:$0xff] }
 0xe20   : > { %v2250_v42 = vsel %vm2247_vm2, %v2249_v39, %v2245_v41  ;;  %v2678_v39 = vld [vmem:[%s4253_s4 + $0x1f0] sm:$0xff]  ;;  %v2903_v41 = vpack.c.bf16 %v2647_v35, %v2646_v34  ;;  %v2911_v45 = vpack.c.bf16 %v2663_v38, %v2662_v37  ;;  %v2655_v4 = vld [vmem:[%s4253_s4 + $0x138] sm:$0xff]  ;;  %v2915_v35 = vpack.c.bf16 %v2671_v26, %v2670_v23  ;;  %v2652_v37 = vld [vmem:[%s4253_s4 + $0x120] sm:$0xff] }
 0xe21   : > { %v2251_v36 = vmul.f32 %v2250_v42, %v2235_v25  ;;  %v2679_v25 = vld [vmem:[%s4253_s4 + $0x1f8] sm:$0xff]  ;;  %v2628_v42 = vld [vmem:[%s4253_s4 + $0x60] sm:$0xff]  ;;  %v2907_v34 = vpack.c.bf16 %v2655_v4, %v2654_v22  ;;  %v2653_v38 = vld [vmem:[%s4253_s4 + $0x128] sm:$0xff] }
 0xe22   : > { %v2919_v12 = vpack.c.bf16 %v2679_v25, %v2678_v39  ;;  %v2668_v39 = vld [vmem:[%s4253_s4 + $0x1a0] sm:$0xff]  ;;  %v2669_v25 = vld [vmem:[%s4253_s4 + $0x1a8] sm:$0xff] }
 0xe23   : > { %v4557_v27 = vadd.f32 %v3791_v40, %v2251_v36  ;;  %v2895_v40 = vpack.c.bf16 %v2631_v33, %v2630_v32  ;;  %v2629_v36 = vld [vmem:[%s4253_s4 + $0x68] sm:$0xff]  ;;  %v2636_v32 = vld [vmem:[%s4253_s4 + $0xa0] sm:$0xff] }
 0xe24   : > { %v2637_v33 = vld [vmem:[%s4253_s4 + $0xa8] sm:$0xff]  ;;  %v2740_v4 = vld [vmem:[%s4253_s4 + $0x3e0] sm:$0xff] }
 0xe25   : > { %v4564_v51 = vpack.c.bf16 %v4557_v27, %v4557_v27  ;;  %v2725_v22 = vld [vmem:[%s4253_s4 + $0x368] sm:$0xff] }
 0xe26   : > { %v2741_v23 = vld [vmem:[%s4253_s4 + $0x3e8] sm:$0xff] }
 0xe27   : > { %3657 = vmatmul.msk.bf16.vlgmr.msra.gmra.mxu0 %vm1142_vm1, %v4564_v51  ;;  %3658 = vmatmul.msk.bf16.vlgmr.msrb.gmra.mxu1 %vm1142_vm1, %v4564_v51 }
 0xe28   : > { %3659 = vmatmul.msk.bf16.vlgmr.msrb.gmra.mxu2 %vm1142_vm1, %v4564_v51  ;;  %3660 = vmatmul.msk.bf16.vlgmr.msrb.gmra.mxu3 %vm1142_vm1, %v4564_v51 }
 0xe29   : > { %2502 = vmatpush.bf16.msra.mxu0 %v2345_v52  ;;  %2515 = vmatpush.bf16.msrb.mxu1 %v2346_v53  ;;  %v2894_v52 = vpack.c.bf16 %v2629_v36, %v2628_v42  ;;  %v2902_v53 = vpack.c.bf16 %v2645_v44, %v2644_v43  ;;  %v2618_v42 = vld [vmem:[%s4253_s4 + $0x10] sm:$0xff]  ;;  %v2619_v36 = vld [vmem:[%s4253_s4 + $0x18] sm:$0xff] }
 0xe2a   : > { %2528 = vmatpush.bf16.msrb.mxu2 %v2347_v31  ;;  %2541 = vmatpush.bf16.msrb.mxu3 %v2348_v56  ;;  %v2642_v31 = vld [vmem:[%s4253_s4 + $0xd0] sm:$0xff]  ;;  %v2643_v56 = vld [vmem:[%s4253_s4 + $0xd8] sm:$0xff] }
 0xe2b   : > { %v2634_v43 = vld [vmem:[%s4253_s4 + $0x90] sm:$0xff]  ;;  %v2635_v44 = vld [vmem:[%s4253_s4 + $0x98] sm:$0xff] }
 0xe2d   : > { %2503 = vmatpush.bf16.msra.mxu0 %v2329_v63  ;;  %2516 = vmatpush.bf16.msrb.mxu1 %v2330_v0  ;;  %v2893_v63 = vpack.c.bf16 %v2627_v55, %v2626_v54  ;;  %v2901_v0 = vpack.c.bf16 %v2643_v56, %v2642_v31  ;;  %v2617_v54 = vld [vmem:[%s4253_s4 + $0x8] sm:$0xff]  ;;  %v2632_v55 = vld [vmem:[%s4253_s4 + $0x80] sm:$0xff]  ;;  %v2694_v56 = vld [vmem:[%s4253_s4 + $0x270] sm:$0xff] }
 0xe2e   : > { %2529 = vmatpush.bf16.msrb.mxu2 %v2331_v1  ;;  %2542 = vmatpush.bf16.msrb.mxu3 %v2332_v2  ;;  %v2624_v1 = vld [vmem:[%s4253_s4 + $0x40] sm:$0xff]  ;;  %v2625_v2 = vld [vmem:[%s4253_s4 + $0x48] sm:$0xff] }
 0xe2f   : > { %v2633_v31 = vld [vmem:[%s4253_s4 + $0x88] sm:$0xff] }
 0xe37   : > { %3661 = vmatmul.msk.bf16.vlgmr.msrb.gmra.mxu0 %vm1142_vm1, %v4564_v51  ;;  %3662 = vmatmul.msk.bf16.vlgmr.msra.gmra.mxu1 %vm1142_vm1, %v4564_v51 }
 0xe38   : > { %3663 = vmatmul.msk.bf16.vlgmr.msra.gmra.mxu2 %vm1142_vm1, %v4564_v51  ;;  %3664 = vmatmul.msk.bf16.vlgmr.msra.gmra.mxu3 %vm1142_vm1, %v4564_v51 }
 0xe39   : > { %2554 = vmatpush.bf16.msrb.mxu0 %v2349_v14  ;;  %2567 = vmatpush.bf16.msra.mxu1 %v2350_v16  ;;  %v2892_v14 = vpack.c.bf16 %v2625_v2, %v2624_v1  ;;  %v2900_v16 = vpack.c.bf16 %v2641_v5, %v2640_v3  ;;  %v2665_v1 = vld [vmem:[%s4253_s4 + $0x188] sm:$0xff]  ;;  %v2726_v2 = vld [vmem:[%s4253_s4 + $0x370] sm:$0xff]  ;;  %v2888_v3 = vpack.c.bf16 %v2617_v54, %v2616_v50 }
 0xe3a   : > { %2580 = vmatpush.bf16.msra.mxu2 %v2351_v19  ;;  %2593 = vmatpush.bf16.msra.mxu3 %v2352_v20  ;;  %v2638_v19 = vld [vmem:[%s4253_s4 + $0xb0] sm:$0xff]  ;;  %v2639_v20 = vld [vmem:[%s4253_s4 + $0xb8] sm:$0xff]  ;;  %v2896_v5 = vpack.c.bf16 %v2633_v31, %v2632_v55 }
 0xe3b   : > { %v2702_v54 = vld [vmem:[%s4253_s4 + $0x2b0] sm:$0xff]  ;;  %v2703_v55 = vld [vmem:[%s4253_s4 + $0x2b8] sm:$0xff] }
 0xe3d   : > { %2555 = vmatpush.bf16.msrb.mxu0 %v2333_v29  ;;  %2568 = vmatpush.bf16.msra.mxu1 %v2334_v30  ;;  %v2891_v29 = vpack.c.bf16 %v2623_v18, %v2622_v17  ;;  %v2899_v30 = vpack.c.bf16 %v2639_v20, %v2638_v19  ;;  %v2709_v17 = vld [vmem:[%s4253_s4 + $0x2e8] sm:$0xff] }
 0xe3e   : > { %2581 = vmatpush.bf16.msra.mxu2 %v2335_v15  ;;  %2594 = vmatpush.bf16.msra.mxu3 %v2336_v6  ;;  %v2620_v15 = vld [vmem:[%s4253_s4 + $0x20] sm:$0xff]  ;;  %v2621_v6 = vld [vmem:[%s4253_s4 + $0x28] sm:$0xff] }
 0xe47   : > { %3665 = vmatmul.msk.bf16.vlgmr.msra.gmra.mxu0 %vm1142_vm1, %v4564_v51  ;;  %3666 = vmatmul.msk.bf16.vlgmr.msrb.gmra.mxu1 %vm1142_vm1, %v4564_v51 }
 0xe48   : > { %3667 = vmatmul.msk.bf16.vlgmr.msrb.gmra.mxu2 %vm1142_vm1, %v4564_v51  ;;  %3668 = vmatmul.msk.bf16.vlgmr.msrb.gmra.mxu3 %vm1142_vm1, %v4564_v51 }
 0xe49   : > { %3020 = vmatpush.bf16.msra.mxu0 %v2895_v40  ;;  %3033 = vmatpush.bf16.msrb.mxu1 %v2903_v41  ;;  %v2890_v40 = vpack.c.bf16 %v2621_v6, %v2620_v15  ;;  %v2898_v41 = vpack.c.bf16 %v2637_v33, %v2636_v32  ;;  %v2691_v15 = vld [vmem:[%s4253_s4 + $0x258] sm:$0xff]  ;;  %v2706_v6 = vld [vmem:[%s4253_s4 + $0x2d0] sm:$0xff] }
 0xe4a   : > { %3046 = vmatpush.bf16.msrb.mxu2 %v2911_v45  ;;  %3059 = vmatpush.bf16.msrb.mxu3 %v2919_v12  ;;  %v2906_v45 = vpack.c.bf16 %v2653_v38, %v2652_v37  ;;  %v2914_v12 = vpack.c.bf16 %v2669_v25, %v2668_v39  ;;  %v2707_v32 = vld [vmem:[%s4253_s4 + $0x2d8] sm:$0xff]  ;;  %v2738_v38 = vld [vmem:[%s4253_s4 + $0x3d0] sm:$0xff] }
 0xe4b   : > { %v2723_v37 = vld [vmem:[%s4253_s4 + $0x358] sm:$0xff] }
 0xe4c   : > { %v2739_v39 = vld [vmem:[%s4253_s4 + $0x3d8] sm:$0xff] }
 0xe4d   : > { %3021 = vmatpush.bf16.msra.mxu0 %v2894_v52  ;;  %3034 = vmatpush.bf16.msrb.mxu1 %v2902_v53  ;;  %v2889_v52 = vpack.c.bf16 %v2619_v36, %v2618_v42  ;;  %v2897_v53 = vpack.c.bf16 %v2635_v44, %v2634_v43  ;;  %v2689_v42 = vld [vmem:[%s4253_s4 + $0x248] sm:$0xff]  ;;  %v2704_v36 = vld [vmem:[%s4253_s4 + $0x2c0] sm:$0xff] }
 0xe4e   : > { %3047 = vmatpush.bf16.msrb.mxu2 %v2910_v57  ;;  %3060 = vmatpush.bf16.msrb.mxu3 %v2918_v58  ;;  %v2695_v57 = vld [vmem:[%s4253_s4 + $0x278] sm:$0xff]  ;;  %v2710_v58 = vld [vmem:[%s4253_s4 + $0x2f0] sm:$0xff]  ;;  %v2705_v43 = vld [vmem:[%s4253_s4 + $0x2c8] sm:$0xff] }
 0xe4f   : > { %v2927_v10 = vpack.c.bf16 %v2695_v57, %v2694_v56  ;;  %v2935_v11 = vpack.c.bf16 %v2711_v61, %v2710_v58  ;;  %v2932_v50 = vpack.c.bf16 %v2705_v43, %v2704_v36  ;;  %v2931_v58 = vpack.c.bf16 %v2703_v55, %v2702_v54  ;;  %v2700_v61 = vld [vmem:[%s4253_s4 + $0x2a0] sm:$0xff] }
 0xe51   : > { %3022 = vmatpush.bf16.msra.mxu0 %v2893_v63  ;;  %3035 = vmatpush.bf16.msrb.mxu1 %v2901_v0  ;;  %v2649_v63 = vld [vmem:[%s4253_s4 + $0x108] sm:$0xff]  ;;  %v2664_v0 = vld [vmem:[%s4253_s4 + $0x180] sm:$0xff] }
 0xe52   : > { %3048 = vmatpush.bf16.msrb.mxu2 %v2909_v7  ;;  %3061 = vmatpush.bf16.msrb.mxu3 %v2917_v8  ;;  %v2727_v7 = vld [vmem:[%s4253_s4 + $0x378] sm:$0xff]  ;;  %v2742_v8 = vld [vmem:[%s4253_s4 + $0x3f0] sm:$0xff]  ;;  %v2904_v18 = vpack.c.bf16 %v2649_v63, %v2648_v62  ;;  %v2912_v19 = vpack.c.bf16 %v2665_v1, %v2664_v0  ;;  %v2701_v62 = vld [vmem:[%s4253_s4 + $0x2a8] sm:$0xff] }
 0xe53   : > { %v2943_v20 = vpack.c.bf16 %v2727_v7, %v2726_v2  ;;  %v2930_v0 = vpack.c.bf16 %v2701_v62, %v2700_v61  ;;  %v2718_v1 = vld [vmem:[%s4253_s4 + $0x330] sm:$0xff]  ;;  %v2719_v2 = vld [vmem:[%s4253_s4 + $0x338] sm:$0xff]  ;;  %v2772_v61 = vld [vmem:[%s4253_s4 + $0x4e0] sm:$0xff] }
 0xe54   : > { %v2735_v7 = vld [vmem:[%s4253_s4 + $0x3b8] sm:$0xff]  ;;  %v2773_v62 = vld [vmem:[%s4253_s4 + $0x4e8] sm:$0xff] }
 0xe55   : > { %3023 = vmatpush.bf16.msra.mxu0 %v2892_v14  ;;  %3036 = vmatpush.bf16.msrb.mxu1 %v2900_v16  ;;  %v2693_v14 = vld [vmem:[%s4253_s4 + $0x268] sm:$0xff]  ;;  %v2708_v16 = vld [vmem:[%s4253_s4 + $0x2e0] sm:$0xff] }
 0xe56   : > { %3049 = vmatpush.bf16.msrb.mxu2 %v2908_v21  ;;  %3062 = vmatpush.bf16.msrb.mxu3 %v2916_v24  ;;  %v2951_v21 = vpack.c.bf16 %v2743_v9, %v2742_v8  ;;  %v2724_v24 = vld [vmem:[%s4253_s4 + $0x360] sm:$0xff]  ;;  %v2926_v26 = vpack.c.bf16 %v2693_v14, %v2692_v13  ;;  %v2682_v9 = vld [vmem:[%s4253_s4 + $0x210] sm:$0xff]  ;;  %v2699_v14 = vld [vmem:[%s4253_s4 + $0x298] sm:$0xff] }
 0xe57   : > { %3669 = vmatmul.msk.bf16.vlgmr.msrb.gmra.mxu0 %vm1142_vm1, %v4564_v51  ;;  %3670 = vmatmul.msk.bf16.vlgmr.msra.gmra.mxu1 %vm1142_vm1, %v4564_v51  ;;  %v2942_v33 = vpack.c.bf16 %v2725_v22, %v2724_v24  ;;  %v2680_v22 = vld [vmem:[%s4253_s4 + $0x200] sm:$0xff] }
 0xe58   : > { %3671 = vmatmul.msk.bf16.vlgmr.msra.gmra.mxu2 %vm1142_vm1, %v4564_v51  ;;  %3672 = vmatmul.msk.bf16.vlgmr.msra.gmra.mxu3 %vm1142_vm1, %v4564_v51  ;;  %v2650_v51 = vld [vmem:[%s4253_s4 + $0x110] sm:$0xff] }
 0xe59   : > { %3024 = vmatpush.bf16.msra.mxu0 %v2891_v29  ;;  %3037 = vmatpush.bf16.msrb.mxu1 %v2899_v30  ;;  %v2905_v59 = vpack.c.bf16 %v2651_v46, %v2650_v51  ;;  %v2934_v29 = vpack.c.bf16 %v2709_v17, %v2708_v16  ;;  %v2690_v30 = vld [vmem:[%s4253_s4 + $0x250] sm:$0xff]  ;;  %v2721_v51 = vld [vmem:[%s4253_s4 + $0x348] sm:$0xff]  ;;  %v2736_v46 = vld [vmem:[%s4253_s4 + $0x3c0] sm:$0xff] }
 0xe5a   : > { %3050 = vmatpush.bf16.msrb.mxu2 %v2907_v34  ;;  %3063 = vmatpush.bf16.msrb.mxu3 %v2915_v35  ;;  %v2950_v34 = vpack.c.bf16 %v2741_v23, %v2740_v4  ;;  %v2722_v35 = vld [vmem:[%s4253_s4 + $0x350] sm:$0xff]  ;;  %v2925_v25 = vpack.c.bf16 %v2691_v15, %v2690_v30  ;;  %v2948_v56 = vpack.c.bf16 %v2737_v47, %v2736_v46  ;;  %v2716_v17 = vld [vmem:[%s4253_s4 + $0x320] sm:$0xff]  ;;  %v2681_v4 = vld [vmem:[%s4253_s4 + $0x208] sm:$0xff] }
 0xe5b   : > { %v2941_v44 = vpack.c.bf16 %v2723_v37, %v2722_v35  ;;  %v2696_v23 = vld [vmem:[%s4253_s4 + $0x280] sm:$0xff]  ;;  %v2714_v15 = vld [vmem:[%s4253_s4 + $0x310] sm:$0xff]  ;;  %v2759_v47 = vld [vmem:[%s4253_s4 + $0x478] sm:$0xff] }
 0xe5c   : > { %v2712_v37 = vld [vmem:[%s4253_s4 + $0x300] sm:$0xff] }
 0xe5d   : > { %3025 = vmatpush.bf16.msra.mxu0 %v2890_v40  ;;  %3038 = vmatpush.bf16.msrb.mxu1 %v2898_v41  ;;  %v2933_v40 = vpack.c.bf16 %v2707_v32, %v2706_v6  ;;  %v2688_v41 = vld [vmem:[%s4253_s4 + $0x240] sm:$0xff]  ;;  %v2715_v6 = vld [vmem:[%s4253_s4 + $0x318] sm:$0xff]  ;;  %v2730_v32 = vld [vmem:[%s4253_s4 + $0x390] sm:$0xff] }
 0xe5e   : > { %3051 = vmatpush.bf16.msrb.mxu2 %v2906_v45  ;;  %3064 = vmatpush.bf16.msrb.mxu3 %v2914_v12  ;;  %v2949_v45 = vpack.c.bf16 %v2739_v39, %v2738_v38  ;;  %v2720_v12 = vld [vmem:[%s4253_s4 + $0x340] sm:$0xff]  ;;  %v2924_v49 = vpack.c.bf16 %v2689_v42, %v2688_v41  ;;  %v2713_v38 = vld [vmem:[%s4253_s4 + $0x308] sm:$0xff] }
 0xe5f   : > { %v2940_v31 = vpack.c.bf16 %v2721_v51, %v2720_v12  ;;  %v2936_v39 = vpack.c.bf16 %v2713_v38, %v2712_v37  ;;  %v4751_v42 = vld [vmem:[%s4247_s7] sm:$0xff]  ;;  %v2758_v12 = vld [vmem:[%s4253_s4 + $0x470] sm:$0xff]  ;;  %v2769_v38 = vld [vmem:[%s4253_s4 + $0x4c8] sm:$0xff] }
 0xe60   : > { %v2357_v36 = vperm.slane %v4751_v42, 0  ;;  %v2358_v43 = vperm.slane %v4751_v42, 1  ;;  %v2359_v54 = vperm.slane %v4751_v42, 2  ;;  %v2360_v55 = vperm.slane %v4751_v42, 3  ;;  %v2768_v37 = vld [vmem:[%s4253_s4 + $0x4c0] sm:$0xff] }
 0xe61   : > { %3026 = vmatpush.bf16.msra.mxu0 %v2889_v52  ;;  %3039 = vmatpush.bf16.msrb.mxu1 %v2897_v53  ;;  %v2686_v52 = vld [vmem:[%s4253_s4 + $0x230] sm:$0xff]  ;;  %v2687_v53 = vld [vmem:[%s4253_s4 + $0x238] sm:$0xff] }
 0xe62   : > { %3052 = vmatpush.bf16.msrb.mxu2 %v2905_v59  ;;  %3065 = vmatpush.bf16.msrb.mxu3 %v2913_v60  ;;  %v2923_v57 = vpack.c.bf16 %v2687_v53, %v2686_v52  ;;  %v2684_v59 = vld [vmem:[%s4253_s4 + $0x220] sm:$0xff]  ;;  %v2685_v60 = vld [vmem:[%s4253_s4 + $0x228] sm:$0xff] }
 0xe63   : > { %v2922_v63 = vpack.c.bf16 %v2685_v60, %v2684_v59 }
 0xe65   : > { %3027 = vmatpush.bf16.msra.mxu0 %v2888_v3  ;;  %3040 = vmatpush.bf16.msrb.mxu1 %v2896_v5  ;;  %v2734_v3 = vld [vmem:[%s4253_s4 + $0x3b0] sm:$0xff]  ;;  %v2939_v5 = vpack.c.bf16 %v2719_v2, %v2718_v1 }
 0xe66   : > { %3053 = vmatpush.bf16.msrb.mxu2 %v2904_v18  ;;  %3066 = vmatpush.bf16.msrb.mxu3 %v2912_v19  ;;  %v2947_v8 = vpack.c.bf16 %v2735_v7, %v2734_v3  ;;  %v2717_v18 = vld [vmem:[%s4253_s4 + $0x328] sm:$0xff]  ;;  %v2732_v19 = vld [vmem:[%s4253_s4 + $0x3a0] sm:$0xff]  ;;  %v2790_v2 = vld [vmem:[%s4253_s4 + $0x570] sm:$0xff] }
 0xe67   : > { %v2791_v3 = vld [vmem:[%s4253_s4 + $0x578] sm:$0xff] }
 0xe69   : > { %3072 = vmatpush.bf16.msrb.mxu0 %v2927_v10  ;;  %3085 = vmatpush.bf16.msra.mxu1 %v2935_v11  ;;  %v2683_v10 = vld [vmem:[%s4253_s4 + $0x218] sm:$0xff]  ;;  %v2698_v11 = vld [vmem:[%s4253_s4 + $0x290] sm:$0xff] }
 0xe6a   : > { %3098 = vmatpush.bf16.msra.mxu2 %v2943_v20  ;;  %3111 = vmatpush.bf16.msra.mxu3 %v2951_v21  ;;  %v2921_v13 = vpack.c.bf16 %v2683_v10, %v2682_v9  ;;  %v2929_v16 = vpack.c.bf16 %v2699_v14, %v2698_v11  ;;  %v2938_v20 = vpack.c.bf16 %v2717_v18, %v2716_v17  ;;  %v2733_v21 = vld [vmem:[%s4253_s4 + $0x3a8] sm:$0xff]  ;;  %v2754_v14 = vld [vmem:[%s4253_s4 + $0x450] sm:$0xff]  ;;  %v2771_v18 = vld [vmem:[%s4253_s4 + $0x4d8] sm:$0xff] }
 0xe6b   : > { %v2946_v24 = vpack.c.bf16 %v2733_v21, %v2732_v19  ;;  %v2966_v11 = vpack.c.bf16 %v2773_v62, %v2772_v61  ;;  %v2770_v17 = vld [vmem:[%s4253_s4 + $0x4d0] sm:$0xff]  ;;  %v2975_v21 = vpack.c.bf16 %v2791_v3, %v2790_v2  ;;  %v2364_v61 = vperm.slane %v4751_v42, 7  ;;  %v2785_v62 = vld [vmem:[%s4253_s4 + $0x548] sm:$0xff] }
 0xe6d   : > { %3073 = vmatpush.bf16.msrb.mxu0 %v2926_v26  ;;  %3086 = vmatpush.bf16.msra.mxu1 %v2934_v29  ;;  %v2920_v26 = vpack.c.bf16 %v2681_v4, %v2680_v22  ;;  %v2697_v29 = vld [vmem:[%s4253_s4 + $0x288] sm:$0xff]  ;;  %v2788_v4 = vld [vmem:[%s4253_s4 + $0x560] sm:$0xff] }
 0xe6e   : > { %3099 = vmatpush.bf16.msra.mxu2 %v2942_v33  ;;  %3112 = vmatpush.bf16.msra.mxu3 %v2950_v34  ;;  %v2928_v30 = vpack.c.bf16 %v2697_v29, %v2696_v23  ;;  %v2731_v33 = vld [vmem:[%s4253_s4 + $0x398] sm:$0xff]  ;;  %v2937_v34 = vpack.c.bf16 %v2715_v6, %v2714_v15  ;;  %v2789_v23 = vld [vmem:[%s4253_s4 + $0x568] sm:$0xff]  ;;  %v2804_v15 = vld [vmem:[%s4253_s4 + $0x5e0] sm:$0xff] }
 0xe6f   : > { %v2945_v35 = vpack.c.bf16 %v2731_v33, %v2730_v32  ;;  %v2805_v6 = vld [vmem:[%s4253_s4 + $0x5e8] sm:$0xff]  ;;  %v2752_v32 = vld [vmem:[%s4253_s4 + $0x440] sm:$0xff]  ;;  %v2361_v33 = vperm.slane %v4751_v42, 4 }
 0xe71   : > { %3074 = vmatpush.bf16.msrb.mxu0 %v2925_v25  ;;  %3087 = vmatpush.bf16.msra.mxu1 %v2933_v40  ;;  %v2728_v25 = vld [vmem:[%s4253_s4 + $0x380] sm:$0xff]  ;;  %v2729_v40 = vld [vmem:[%s4253_s4 + $0x388] sm:$0xff] }
 0xe72   : > { %3100 = vmatpush.bf16.msra.mxu2 %v2941_v44  ;;  %3113 = vmatpush.bf16.msra.mxu3 %v2949_v45  ;;  %v2944_v41 = vpack.c.bf16 %v2729_v40, %v2728_v25  ;;  %v2974_v40 = vpack.c.bf16 %v2789_v23, %v2788_v4 }
 0xe75   : > { %3075 = vmatpush.bf16.msrb.mxu0 %v2924_v49  ;;  %3088 = vmatpush.bf16.msra.mxu1 %v2932_v50  ;;  %v2774_v49 = vld [vmem:[%s4253_s4 + $0x4f0] sm:$0xff]  ;;  %v2775_v50 = vld [vmem:[%s4253_s4 + $0x4f8] sm:$0xff] }
 0xe76   : > { %3101 = vmatpush.bf16.msra.mxu2 %v2940_v31  ;;  %3114 = vmatpush.bf16.msra.mxu3 %v2948_v56  ;;  %v2959_v31 = vpack.c.bf16 %v2759_v47, %v2758_v12  ;;  %v2967_v56 = vpack.c.bf16 %v2775_v50, %v2774_v49  ;;  %v2964_v12 = vpack.c.bf16 %v2769_v38, %v2768_v37  ;;  %v2803_v47 = vld [vmem:[%s4253_s4 + $0x5d8] sm:$0xff]  ;;  %v2780_v37 = vld [vmem:[%s4253_s4 + $0x520] sm:$0xff] }
 0xe79   : > { %3076 = vmatpush.bf16.msrb.mxu0 %v2923_v57  ;;  %3089 = vmatpush.bf16.msra.mxu1 %v2931_v58  ;;  %v2756_v57 = vld [vmem:[%s4253_s4 + $0x460] sm:$0xff]  ;;  %v2757_v58 = vld [vmem:[%s4253_s4 + $0x468] sm:$0xff] }
 0xe7a   : > { %3102 = vmatpush.bf16.msra.mxu2 %v2939_v5  ;;  %3115 = vmatpush.bf16.msra.mxu3 %v2947_v8  ;;  %v2958_v1 = vpack.c.bf16 %v2757_v58, %v2756_v57  ;;  %v2806_v5 = vld [vmem:[%s4253_s4 + $0x5f0] sm:$0xff] }
 0xe7d   : > { %3077 = vmatpush.bf16.msrb.mxu0 %v2922_v63  ;;  %3090 = vmatpush.bf16.msra.mxu1 %v2930_v0 }
 0xe7e   : > { %3103 = vmatpush.bf16.msra.mxu2 %v2938_v20  ;;  %3116 = vmatpush.bf16.msra.mxu3 %v2946_v24 }
 0xe81   : > { %3078 = vmatpush.bf16.msrb.mxu0 %v2921_v13  ;;  %3091 = vmatpush.bf16.msra.mxu1 %v2929_v16  ;;  %v2807_v13 = vld [vmem:[%s4253_s4 + $0x5f8] sm:$0xff] }
 0xe82   : > { %3104 = vmatpush.bf16.msra.mxu2 %v2937_v34  ;;  %3117 = vmatpush.bf16.msra.mxu3 %v2945_v35  ;;  %v2755_v16 = vld [vmem:[%s4253_s4 + $0x458] sm:$0xff]  ;;  %v2983_v24 = vpack.c.bf16 %v2807_v13, %v2806_v5  ;;  %v2362_v34 = vperm.slane %v4751_v42, 5  ;;  %v2753_v35 = vld [vmem:[%s4253_s4 + $0x448] sm:$0xff] }
 0xe83   : > { %v2957_v22 = vpack.c.bf16 %v2755_v16, %v2754_v14  ;;  %v2782_v16 = vld [vmem:[%s4253_s4 + $0x530] sm:$0xff] }
 0xe85   : > { %3079 = vmatpush.bf16.msrb.mxu0 %v2920_v26  ;;  %3092 = vmatpush.bf16.msra.mxu1 %v2928_v30  ;;  %v2965_v30 = vpack.c.bf16 %v2771_v18, %v2770_v17 }
 0xe86   : > { %3105 = vmatpush.bf16.msra.mxu2 %v2936_v39  ;;  %3118 = vmatpush.bf16.msra.mxu3 %v2944_v41  ;;  %v2982_v41 = vpack.c.bf16 %v2805_v6, %v2804_v15  ;;  %v2762_v6 = vld [vmem:[%s4253_s4 + $0x490] sm:$0xff] }
 0xea4   : > { %v2401_v44 = vpop.f32.mrf.mxu0  ;;  %v2414_v45 = vpop.f32.mrf.mxu1 }
 0xea5   : > { %v2402_v51 = vadd.f32 %v2401_v44, %v2357_v36  ;;  %v2415_v46 = vadd.f32 %v2414_v45, %v2358_v43  ;;  %v2786_v36 = vld [vmem:[%s4253_s4 + $0x550] sm:$0xff]  ;;  %v2956_v45 = vpack.c.bf16 %v2753_v35, %v2752_v32  ;;  %v2763_v32 = vld [vmem:[%s4253_s4 + $0x498] sm:$0xff] }
 0xea7   : > { %v2600_v52 = vmax.f32 %v2402_v51, 0.0  ;;  %v2601_v53 = vmax.f32 %v2415_v46, 0.0  ;;  %v2787_v51 = vld [vmem:[%s4253_s4 + $0x558] sm:$0xff]  ;;  %v2802_v46 = vld [vmem:[%s4253_s4 + $0x5d0] sm:$0xff] }
 0xea8   : > { %v2973_v57 = vpack.c.bf16 %v2787_v51, %v2786_v36  ;;  %v2981_v58 = vpack.c.bf16 %v2803_v47, %v2802_v46  ;;  %v2745_v51 = vld [vmem:[%s4253_s4 + $0x408] sm:$0xff]  ;;  %v2760_v46 = vld [vmem:[%s4253_s4 + $0x480] sm:$0xff] }
 0xea9   : > { %v2872_v59 = vpack.c.bf16 %v2600_v52, %v2600_v52  ;;  %v2873_v60 = vpack.c.bf16 %v2601_v53, %v2601_v53  ;;  %v2750_v52 = vld [vmem:[%s4253_s4 + $0x430] sm:$0xff]  ;;  %v2751_v53 = vld [vmem:[%s4253_s4 + $0x438] sm:$0xff]  ;;  %v2761_v47 = vld [vmem:[%s4253_s4 + $0x488] sm:$0xff] }
 0xeaa   : > { %v2955_v3 = vpack.c.bf16 %v2751_v53, %v2750_v52 }
 0xeab   : > { %v2427_v63 = vpop.f32.mrf.mxu2  ;;  %v2440_v0 = vpop.f32.mrf.mxu3  ;;  %3028 = vmatmul.bf16.vlgmr.msra.gmra.mxu0 %v2872_v59  ;;  %3041 = vmatmul.bf16.vlgmr.msrb.gmra.mxu1 %v2873_v60  ;;  %v2784_v59 = vld [vmem:[%s4253_s4 + $0x540] sm:$0xff]  ;;  %v2363_v60 = vperm.slane %v4751_v42, 6 }
 0xeac   : > { %v2428_v7 = vadd.f32 %v2427_v63, %v2359_v54  ;;  %v2441_v8 = vadd.f32 %v2440_v0, %v2360_v55  ;;  %3124 = vmatpush.bf16.msra.mxu0 %v2959_v31  ;;  %3137 = vmatpush.bf16.msrb.mxu1 %v2967_v56  ;;  %v2403_v9 = vpop.f32.mrf.mxu0  ;;  %v2416_v10 = vpop.f32.mrf.mxu1  ;;  %v2766_v54 = vld [vmem:[%s4253_s4 + $0x4b0] sm:$0xff]  ;;  %v2767_v55 = vld [vmem:[%s4253_s4 + $0x4b8] sm:$0xff]  ;;  %v2800_v63 = vld [vmem:[%s4253_s4 + $0x5c0] sm:$0xff]  ;;  %v2972_v42 = vpack.c.bf16 %v2785_v62, %v2784_v59 }
 0xead   : > { %v2801_v0 = vld [vmem:[%s4253_s4 + $0x5c8] sm:$0xff]  ;;  %v2963_v5 = vpack.c.bf16 %v2767_v55, %v2766_v54  ;;  %v2764_v9 = vld [vmem:[%s4253_s4 + $0x4a0] sm:$0xff]  ;;  %v2794_v62 = vld [vmem:[%s4253_s4 + $0x590] sm:$0xff] }
 0xeae   : > { %v2602_v19 = vmax.f32 %v2428_v7, 0.0  ;;  %v2603_v20 = vmax.f32 %v2441_v8, 0.0  ;;  %v2748_v7 = vld [vmem:[%s4253_s4 + $0x420] sm:$0xff]  ;;  %v2749_v8 = vld [vmem:[%s4253_s4 + $0x428] sm:$0xff]  ;;  %v2980_v14 = vpack.c.bf16 %v2801_v0, %v2800_v63  ;;  %v2795_v63 = vld [vmem:[%s4253_s4 + $0x598] sm:$0xff] }
 0xeaf   : > { %v2765_v10 = vld [vmem:[%s4253_s4 + $0x4a8] sm:$0xff]  ;;  %v2954_v4 = vpack.c.bf16 %v2749_v8, %v2748_v7 }
 0xeb0   : > { %v2874_v26 = vpack.c.bf16 %v2602_v19, %v2602_v19  ;;  %v2875_v29 = vpack.c.bf16 %v2603_v20, %v2603_v20  ;;  %3125 = vmatpush.bf16.msra.mxu0 %v2958_v1  ;;  %3138 = vmatpush.bf16.msrb.mxu1 %v2966_v11  ;;  %v2962_v23 = vpack.c.bf16 %v2765_v10, %v2764_v9  ;;  %v2821_v8 = vld [vmem:[%s4253_s4 + $0x668] sm:$0xff]  ;;  %v2836_v9 = vld [vmem:[%s4253_s4 + $0x6e0] sm:$0xff] }
 0xeb1   : > { %v2837_v10 = vld [vmem:[%s4253_s4 + $0x6e8] sm:$0xff] }
 0xeb2   : > { %3054 = vmatmul.bf16.vlgmr.msrb.gmra.mxu2 %v2874_v26  ;;  %3067 = vmatmul.bf16.vlgmr.msrb.gmra.mxu3 %v2875_v29  ;;  %v2746_v26 = vld [vmem:[%s4253_s4 + $0x410] sm:$0xff]  ;;  %v2747_v29 = vld [vmem:[%s4253_s4 + $0x418] sm:$0xff] }
 0xeb3   : > { %3150 = vmatpush.bf16.msrb.mxu2 %v2975_v21  ;;  %3163 = vmatpush.bf16.msrb.mxu3 %v2983_v24  ;;  %v2429_v39 = vpop.f32.mrf.mxu2  ;;  %v2442_v25 = vpop.f32.mrf.mxu3  ;;  %v2783_v21 = vld [vmem:[%s4253_s4 + $0x538] sm:$0xff]  ;;  %v2798_v24 = vld [vmem:[%s4253_s4 + $0x5b0] sm:$0xff]  ;;  %v2953_v36 = vpack.c.bf16 %v2747_v29, %v2746_v26 }
 0xeb4   : > { %3126 = vmatpush.bf16.msra.mxu0 %v2957_v22  ;;  %3139 = vmatpush.bf16.msrb.mxu1 %v2965_v30  ;;  %v2453_v43 = vpop.f32.mrf.mxu0  ;;  %v2466_v44 = vpop.f32.mrf.mxu1  ;;  %v2799_v22 = vld [vmem:[%s4253_s4 + $0x5b8] sm:$0xff]  ;;  %v2781_v25 = vld [vmem:[%s4253_s4 + $0x528] sm:$0xff]  ;;  %v2870_v26 = vld [vmem:[%s4253_s4 + $0x7f0] sm:$0xff] }
 0xeb5   : > { %v2454_v49 = vadd.f32 %v2453_v43, %v2361_v33  ;;  %v2467_v50 = vadd.f32 %v2466_v44, %v2362_v34  ;;  %v4810_v33 = vld [vmem:[%s4247_s7 + $0x8] sm:$0xff]  ;;  %v2971_v34 = vpack.c.bf16 %v2783_v21, %v2782_v16  ;;  %v2979_v35 = vpack.c.bf16 %v2799_v22, %v2798_v24  ;;  %v2776_v16 = vld [vmem:[%s4253_s4 + $0x500] sm:$0xff]  ;;  %v2854_v24 = vld [vmem:[%s4253_s4 + $0x770] sm:$0xff] }
 0xeb6   : > { %v2961_v43 = vpack.c.bf16 %v2763_v32, %v2762_v6  ;;  %v2365_v44 = vperm.slane %v4810_v33, 0  ;;  %v2970_v54 = vpack.c.bf16 %v2781_v25, %v2780_v37  ;;  %v2793_v21 = vld [vmem:[%s4253_s4 + $0x588] sm:$0xff]  ;;  %v2855_v22 = vld [vmem:[%s4253_s4 + $0x778] sm:$0xff]  ;;  %v2818_v6 = vld [vmem:[%s4253_s4 + $0x650] sm:$0xff] }
 0xeb7   : > { %v2604_v31 = vmax.f32 %v2454_v49, 0.0  ;;  %v2605_v56 = vmax.f32 %v2467_v50, 0.0  ;;  %3151 = vmatpush.bf16.msrb.mxu2 %v2974_v40  ;;  %3164 = vmatpush.bf16.msrb.mxu3 %v2982_v41  ;;  %v2796_v40 = vld [vmem:[%s4253_s4 + $0x5a0] sm:$0xff]  ;;  %v2797_v41 = vld [vmem:[%s4253_s4 + $0x5a8] sm:$0xff]  ;;  %v2822_v49 = vld [vmem:[%s4253_s4 + $0x670] sm:$0xff] }
 0xeb8   : > { %3127 = vmatpush.bf16.msra.mxu0 %v2956_v45  ;;  %3140 = vmatpush.bf16.msrb.mxu1 %v2964_v12  ;;  %v2366_v45 = vperm.slane %v4810_v33, 1  ;;  %v2744_v12 = vld [vmem:[%s4253_s4 + $0x400] sm:$0xff]  ;;  %v2823_v50 = vld [vmem:[%s4253_s4 + $0x678] sm:$0xff]  ;;  %v2978_v55 = vpack.c.bf16 %v2797_v41, %v2796_v40  ;;  %v2834_v25 = vld [vmem:[%s4253_s4 + $0x6d0] sm:$0xff] }
 0xeb9   : > { %v2876_v1 = vpack.c.bf16 %v2604_v31, %v2604_v31  ;;  %v2877_v2 = vpack.c.bf16 %v2605_v56, %v2605_v56  ;;  %v2838_v31 = vld [vmem:[%s4253_s4 + $0x6f0] sm:$0xff]  ;;  %v2839_v56 = vld [vmem:[%s4253_s4 + $0x6f8] sm:$0xff] }
 0xeba   : > { %v2999_v7 = vpack.c.bf16 %v2839_v56, %v2838_v31  ;;  %v2871_v29 = vld [vmem:[%s4253_s4 + $0x7f8] sm:$0xff]  ;;  %v2817_v31 = vld [vmem:[%s4253_s4 + $0x648] sm:$0xff]  ;;  %v2832_v56 = vld [vmem:[%s4253_s4 + $0x6c0] sm:$0xff] }
 0xebb   : > { %3152 = vmatpush.bf16.msrb.mxu2 %v2973_v57  ;;  %3165 = vmatpush.bf16.msrb.mxu3 %v2981_v58  ;;  %v2479_v11 = vpop.f32.mrf.mxu2  ;;  %v2492_v13 = vpop.f32.mrf.mxu3  ;;  %v2778_v57 = vld [vmem:[%s4253_s4 + $0x510] sm:$0xff]  ;;  %v2835_v40 = vld [vmem:[%s4253_s4 + $0x6d8] sm:$0xff] }
 0xebc   : > { %v2480_v17 = vadd.f32 %v2479_v11, %v2363_v60  ;;  %v2493_v18 = vadd.f32 %v2492_v13, %v2364_v61  ;;  %3080 = vmatmul.bf16.vlgmr.msrb.gmra.mxu0 %v2876_v1  ;;  %3093 = vmatmul.bf16.vlgmr.msra.gmra.mxu1 %v2877_v2  ;;  %v2455_v19 = vpop.f32.mrf.mxu0  ;;  %v2468_v20 = vpop.f32.mrf.mxu1  ;;  %v2952_v60 = vpack.c.bf16 %v2745_v51, %v2744_v12  ;;  %v2779_v61 = vld [vmem:[%s4253_s4 + $0x518] sm:$0xff]  ;;  %v2852_v12 = vld [vmem:[%s4253_s4 + $0x760] sm:$0xff]  ;;  %v2853_v51 = vld [vmem:[%s4253_s4 + $0x768] sm:$0xff] }
 0xebd   : > { %3128 = vmatpush.bf16.msra.mxu0 %v2955_v3  ;;  %3141 = vmatpush.bf16.msrb.mxu1 %v2963_v5  ;;  %v2960_v2 = vpack.c.bf16 %v2761_v47, %v2760_v46  ;;  %v2820_v3 = vld [vmem:[%s4253_s4 + $0x660] sm:$0xff]  ;;  %v2991_v5 = vpack.c.bf16 %v2823_v50, %v2822_v49  ;;  %v2367_v19 = vperm.slane %v4810_v33, 2  ;;  %v2368_v20 = vperm.slane %v4810_v33, 3  ;;  %v2869_v47 = vld [vmem:[%s4253_s4 + $0x7e8] sm:$0xff] }
 0xebe   : > { %v2606_v30 = vmax.f32 %v2480_v17, 0.0  ;;  %v2607_v15 = vmax.f32 %v2493_v18, 0.0  ;;  %v2777_v17 = vld [vmem:[%s4253_s4 + $0x508] sm:$0xff]  ;;  %v2792_v18 = vld [vmem:[%s4253_s4 + $0x580] sm:$0xff] }
 0xebf   : > { %3153 = vmatpush.bf16.msrb.mxu2 %v2972_v42  ;;  %3166 = vmatpush.bf16.msrb.mxu3 %v2980_v14  ;;  %v2969_v42 = vpack.c.bf16 %v2779_v61, %v2778_v57  ;;  %v2977_v14 = vpack.c.bf16 %v2795_v63, %v2794_v62  ;;  %v2976_v37 = vpack.c.bf16 %v2793_v21, %v2792_v18  ;;  %v2868_v46 = vld [vmem:[%s4253_s4 + $0x7e0] sm:$0xff]  ;;  %v2833_v57 = vld [vmem:[%s4253_s4 + $0x6c8] sm:$0xff]  ;;  %v2850_v61 = vld [vmem:[%s4253_s4 + $0x750] sm:$0xff] }
 0xec0   : > { %v2878_v38 = vpack.c.bf16 %v2606_v30, %v2606_v30  ;;  %v2879_v39 = vpack.c.bf16 %v2607_v15, %v2607_v15  ;;  %v2990_v30 = vpack.c.bf16 %v2821_v8, %v2820_v3  ;;  %v2998_v15 = vpack.c.bf16 %v2837_v10, %v2836_v9  ;;  %v2851_v62 = vld [vmem:[%s4253_s4 + $0x758] sm:$0xff]  ;;  %v2866_v63 = vld [vmem:[%s4253_s4 + $0x7d0] sm:$0xff]  ;;  %v2864_v18 = vld [vmem:[%s4253_s4 + $0x7c0] sm:$0xff] }
 0xec1   : > { %3129 = vmatpush.bf16.msra.mxu0 %v2954_v4  ;;  %3142 = vmatpush.bf16.msrb.mxu1 %v2962_v23  ;;  %v2814_v3 = vld [vmem:[%s4253_s4 + $0x630] sm:$0xff]  ;;  %v2815_v8 = vld [vmem:[%s4253_s4 + $0x638] sm:$0xff] }
 0xec2   : > { %3106 = vmatmul.bf16.vlgmr.msra.gmra.mxu2 %v2878_v38  ;;  %3119 = vmatmul.bf16.vlgmr.msra.gmra.mxu3 %v2879_v39  ;;  %v3007_v38 = vpack.c.bf16 %v2855_v22, %v2854_v24  ;;  %v2819_v39 = vld [vmem:[%s4253_s4 + $0x658] sm:$0xff]  ;;  %v2830_v9 = vld [vmem:[%s4253_s4 + $0x6b0] sm:$0xff]  ;;  %v2812_v24 = vld [vmem:[%s4253_s4 + $0x620] sm:$0xff] }
 0xec3   : > { %3154 = vmatpush.bf16.msrb.mxu2 %v2971_v34  ;;  %3167 = vmatpush.bf16.msrb.mxu3 %v2979_v35  ;;  %v2481_v52 = vpop.f32.mrf.mxu2  ;;  %v2494_v53 = vpop.f32.mrf.mxu3  ;;  %v2968_v35 = vpack.c.bf16 %v2777_v17, %v2776_v16  ;;  %v2831_v10 = vld [vmem:[%s4253_s4 + $0x6b8] sm:$0xff]  ;;  %v2848_v16 = vld [vmem:[%s4253_s4 + $0x740] sm:$0xff]  ;;  %v2849_v17 = vld [vmem:[%s4253_s4 + $0x748] sm:$0xff] }
 0xec4   : > { %v2505_v58 = vpop.f32.mrf.mxu0  ;;  %v2518_v59 = vpop.f32.mrf.mxu1  ;;  %v2989_v52 = vpack.c.bf16 %v2819_v39, %v2818_v6  ;;  %v2997_v53 = vpack.c.bf16 %v2835_v40, %v2834_v25  ;;  %v2995_v21 = vpack.c.bf16 %v2831_v10, %v2830_v9  ;;  %v2813_v22 = vld [vmem:[%s4253_s4 + $0x628] sm:$0xff]  ;;  %v2862_v6 = vld [vmem:[%s4253_s4 + $0x7b0] sm:$0xff]  ;;  %v2370_v39 = vperm.slane %v4810_v33, 5 }
 0xec5   : > { %3130 = vmatpush.bf16.msra.mxu0 %v2953_v36  ;;  %3143 = vmatpush.bf16.msrb.mxu1 %v2961_v43  ;;  %v2506_v0 = vadd.f32 %v2505_v58, %v2365_v44  ;;  %v2519_v1 = vadd.f32 %v2518_v59, %v2366_v45  ;;  %v3015_v45 = vpack.c.bf16 %v2871_v29, %v2870_v26 }
 0xec6   : > { %v3004_v26 = vpack.c.bf16 %v2849_v17, %v2848_v16  ;;  %v2841_v16 = vld [vmem:[%s4253_s4 + $0x708] sm:$0xff]  ;;  %v2856_v17 = vld [vmem:[%s4253_s4 + $0x780] sm:$0xff] }
 0xec7   : > { %v2608_v11 = vmax.f32 %v2506_v0, 0.0  ;;  %v2609_v13 = vmax.f32 %v2519_v1, 0.0  ;;  %3155 = vmatpush.bf16.msrb.mxu2 %v2970_v54  ;;  %3168 = vmatpush.bf16.msrb.mxu3 %v2978_v55  ;;  %v2816_v54 = vld [vmem:[%s4253_s4 + $0x640] sm:$0xff]  ;;  %v3006_v55 = vpack.c.bf16 %v2853_v51, %v2852_v12  ;;  %v2867_v0 = vld [vmem:[%s4253_s4 + $0x7d8] sm:$0xff] }
 0xec8   : > { %v2988_v1 = vpack.c.bf16 %v2817_v31, %v2816_v54  ;;  %v2808_v54 = vld [vmem:[%s4253_s4 + $0x600] sm:$0xff] }
 0xec9   : > { %v2880_v4 = vpack.c.bf16 %v2608_v11, %v2608_v11  ;;  %v2881_v23 = vpack.c.bf16 %v2609_v13, %v2609_v13  ;;  %3131 = vmatpush.bf16.msra.mxu0 %v2952_v60  ;;  %3144 = vmatpush.bf16.msrb.mxu1 %v2960_v2  ;;  %v3014_v60 = vpack.c.bf16 %v2869_v47, %v2868_v46  ;;  %v2844_v46 = vld [vmem:[%s4253_s4 + $0x720] sm:$0xff]  ;;  %v2845_v47 = vld [vmem:[%s4253_s4 + $0x728] sm:$0xff] }
 0xeca   : > { %v2996_v2 = vpack.c.bf16 %v2833_v57, %v2832_v56  ;;  %v2809_v56 = vld [vmem:[%s4253_s4 + $0x608] sm:$0xff]  ;;  %v2824_v57 = vld [vmem:[%s4253_s4 + $0x680] sm:$0xff] }
 0xecb   : > { %3156 = vmatpush.bf16.msrb.mxu2 %v2969_v42  ;;  %3169 = vmatpush.bf16.msrb.mxu3 %v2977_v14  ;;  %v2531_v32 = vpop.f32.mrf.mxu2  ;;  %v2544_v34 = vpop.f32.mrf.mxu3  ;;  %v3005_v42 = vpack.c.bf16 %v2851_v62, %v2850_v61  ;;  %v3013_v14 = vpack.c.bf16 %v2867_v0, %v2866_v63  ;;  %v2842_v61 = vld [vmem:[%s4253_s4 + $0x710] sm:$0xff]  ;;  %v2371_v62 = vperm.slane %v4810_v33, 6  ;;  %v2372_v63 = vperm.slane %v4810_v33, 7  ;;  %v2843_v0 = vld [vmem:[%s4253_s4 + $0x718] sm:$0xff] }
 0xecc   : > { %v2532_v41 = vadd.f32 %v2531_v32, %v2367_v19  ;;  %v2545_v36 = vadd.f32 %v2544_v34, %v2368_v20  ;;  %3132 = vmatmul.bf16.vlgmr.msra.gmra.mxu0 %v2880_v4  ;;  %3145 = vmatmul.bf16.vlgmr.msrb.gmra.mxu1 %v2881_v23  ;;  %v2507_v43 = vpop.f32.mrf.mxu0  ;;  %v2520_v44 = vpop.f32.mrf.mxu1  ;;  %v2865_v19 = vld [vmem:[%s4253_s4 + $0x7c8] sm:$0xff]  ;;  %v2987_v20 = vpack.c.bf16 %v2815_v8, %v2814_v3  ;;  %v2828_v4 = vld [vmem:[%s4253_s4 + $0x6a0] sm:$0xff]  ;;  %v2863_v32 = vld [vmem:[%s4253_s4 + $0x7b8] sm:$0xff] }
 0xecd   : > { %3176 = vmatpush.bf16.msrb.mxu0 %v2991_v5  ;;  %3189 = vmatpush.bf16.msra.mxu1 %v2999_v7  ;;  %v2829_v23 = vld [vmem:[%s4253_s4 + $0x6a8] sm:$0xff]  ;;  %v3012_v29 = vpack.c.bf16 %v2865_v19, %v2864_v18  ;;  %v2986_v34 = vpack.c.bf16 %v2813_v22, %v2812_v24  ;;  %v2827_v43 = vld [vmem:[%s4253_s4 + $0x698] sm:$0xff]  ;;  %v3011_v51 = vpack.c.bf16 %v2863_v32, %v2862_v6 }
 0xece   : > { %v2610_v49 = vmax.f32 %v2532_v41, 0.0  ;;  %v2611_v50 = vmax.f32 %v2545_v36, 0.0  ;;  %v2811_v41 = vld [vmem:[%s4253_s4 + $0x618] sm:$0xff]  ;;  %v2826_v36 = vld [vmem:[%s4253_s4 + $0x690] sm:$0xff]  ;;  %v2984_v3 = vpack.c.bf16 %v2809_v56, %v2808_v54  ;;  %v2857_v18 = vld [vmem:[%s4253_s4 + $0x788] sm:$0xff] }
 0xecf   : > { %3157 = vmatpush.bf16.msrb.mxu2 %v2968_v35  ;;  %3170 = vmatpush.bf16.msrb.mxu3 %v2976_v37  ;;  %v2994_v35 = vpack.c.bf16 %v2829_v23, %v2828_v4  ;;  %v2810_v37 = vld [vmem:[%s4253_s4 + $0x610] sm:$0xff]  ;;  %v3008_v24 = vpack.c.bf16 %v2857_v18, %v2856_v17 }
 0xed0   : > { %v2882_v58 = vpack.c.bf16 %v2610_v49, %v2610_v49  ;;  %v2883_v59 = vpack.c.bf16 %v2611_v50, %v2611_v50  ;;  %v2860_v49 = vld [vmem:[%s4253_s4 + $0x7a0] sm:$0xff]  ;;  %v2861_v50 = vld [vmem:[%s4253_s4 + $0x7a8] sm:$0xff] }
 0xed1   : > { %3177 = vmatpush.bf16.msrb.mxu0 %v2990_v30  ;;  %3190 = vmatpush.bf16.msra.mxu1 %v2998_v15  ;;  %v2846_v30 = vld [vmem:[%s4253_s4 + $0x730] sm:$0xff]  ;;  %v2847_v15 = vld [vmem:[%s4253_s4 + $0x738] sm:$0xff] }
 0xed2   : > { %3158 = vmatmul.bf16.vlgmr.msrb.gmra.mxu2 %v2882_v58  ;;  %3171 = vmatmul.bf16.vlgmr.msrb.gmra.mxu3 %v2883_v59  ;;  %v3003_v12 = vpack.c.bf16 %v2847_v15, %v2846_v30  ;;  %v2825_v58 = vld [vmem:[%s4253_s4 + $0x688] sm:$0xff]  ;;  %v3002_v59 = vpack.c.bf16 %v2845_v47, %v2844_v46 }
 0xed3   : > { %3202 = vmatpush.bf16.msra.mxu2 %v3007_v38  ;;  %3215 = vmatpush.bf16.msra.mxu3 %v3015_v45  ;;  %v2533_v5 = vpop.f32.mrf.mxu2  ;;  %v2546_v7 = vpop.f32.mrf.mxu3  ;;  %v2369_v38 = vperm.slane %v4810_v33, 4  ;;  %v2840_v33 = vld [vmem:[%s4253_s4 + $0x700] sm:$0xff] }
 0xed4   : > { %v2557_v11 = vpop.f32.mrf.mxu0  ;;  %v2570_v13 = vpop.f32.mrf.mxu1  ;;  %v2992_v5 = vpack.c.bf16 %v2825_v58, %v2824_v57 }
 0xed5   : > { %3178 = vmatpush.bf16.msrb.mxu0 %v2989_v52  ;;  %3191 = vmatpush.bf16.msra.mxu1 %v2997_v53  ;;  %v2985_v52 = vpack.c.bf16 %v2811_v41, %v2810_v37  ;;  %v2993_v53 = vpack.c.bf16 %v2827_v43, %v2826_v36  ;;  %v2571_v31 = vadd.f32 %v2570_v13, %v2370_v39 }
 0xed7   : > { %3203 = vmatpush.bf16.msra.mxu2 %v3006_v55  ;;  %3216 = vmatpush.bf16.msra.mxu3 %v3014_v60  ;;  %v2558_v55 = vadd.f32 %v2557_v11, %v2369_v38  ;;  %v3010_v60 = vpack.c.bf16 %v2861_v50, %v2860_v49  ;;  %v2613_v8 = vmax.f32 %v2571_v31, 0.0  ;;  %v3001_v11 = vpack.c.bf16 %v2843_v0, %v2842_v61 }
 0xed9   : > { %3179 = vmatpush.bf16.msrb.mxu0 %v2988_v1  ;;  %3192 = vmatpush.bf16.msra.mxu1 %v2996_v2  ;;  %v2858_v1 = vld [vmem:[%s4253_s4 + $0x790] sm:$0xff]  ;;  %v2859_v2 = vld [vmem:[%s4253_s4 + $0x798] sm:$0xff]  ;;  %v2612_v7 = vmax.f32 %v2558_v55, 0.0 }
 0xeda   : > { %v3009_v13 = vpack.c.bf16 %v2859_v2, %v2858_v1 }
 0xedb   : > { %3204 = vmatpush.bf16.msra.mxu2 %v3005_v42  ;;  %3217 = vmatpush.bf16.msra.mxu3 %v3013_v14  ;;  %v2583_v25 = vpop.f32.mrf.mxu2  ;;  %v2596_v40 = vpop.f32.mrf.mxu3  ;;  %v2884_v19 = vpack.c.bf16 %v2612_v7, %v2612_v7 }
 0xedc   : > { %v2559_v44 = vpop.f32.mrf.mxu0  ;;  %v2572_v45 = vpop.f32.mrf.mxu1  ;;  %v2584_v42 = vadd.f32 %v2583_v25, %v2371_v62  ;;  %v2597_v14 = vadd.f32 %v2596_v40, %v2372_v63  ;;  %v3792_v25 = vld [vmem:[%s1114_s17] ss:$0 sm:$0xff]  ;;  %s5098_s17 = sld [smem:[#allocation9_spill]] }
 0xedd   : > { %3180 = vmatpush.bf16.msrb.mxu0 %v2987_v20  ;;  %3193 = vmatpush.bf16.msra.mxu1 %v2995_v21  ;;  %v2885_v20 = vpack.c.bf16 %v2613_v8, %v2613_v8  ;;  %v3000_v21 = vpack.c.bf16 %v2841_v16, %v2840_v33 }
 0xede   : > { %v2614_v22 = vmax.f32 %v2584_v42, 0.0  ;;  %v2615_v4 = vmax.f32 %v2597_v14, 0.0 }
 0xedf   : > { %3205 = vmatpush.bf16.msra.mxu2 %v3004_v26  ;;  %3218 = vmatpush.bf16.msra.mxu3 %v3012_v29 }
 0xee0   : > { %v2886_v23 = vpack.c.bf16 %v2614_v22, %v2614_v22  ;;  %v2887_v26 = vpack.c.bf16 %v2615_v4, %v2615_v4 }
 0xee1   : > { %3181 = vmatpush.bf16.msrb.mxu0 %v2986_v34  ;;  %3194 = vmatpush.bf16.msra.mxu1 %v2994_v35 }
 0xee2   : > { %s3674_s19 = sshll.u32 %s5098_s17, 3 }
 0xee3   : > { %3206 = vmatpush.bf16.msra.mxu2 %v3003_v12  ;;  %3219 = vmatpush.bf16.msra.mxu3 %v3011_v51  ;;  %v2585_v9 = vpop.f32.mrf.mxu2  ;;  %v2598_v10 = vpop.f32.mrf.mxu3  ;;  %s3289_s2 = scalar_lea.hbm %s5100_s8, %s3674_s19 }
 0xee4   : > { %s3293_s12 = sshll.u32 %s3289_s2, 4  ;;  %s3294_s12 = int_to_ptr.hbm [resolvable:$true] %s3293_s12 }
 0xee5   : > { %3182 = vmatpush.bf16.msrb.mxu0 %v2985_v52  ;;  %3195 = vmatpush.bf16.msra.mxu1 %v2993_v53  ;;  %s3857_s18 = sshra.s32 %s3294_s12, 4  ;;  %s3858_s18 = int_to_ptr.hbm [resolvable:$true] %s3857_s18 }
 0xee6   : > { %s3859_s0 = scalar_lea.hbm %s3858_s18, 8  ;;  %p3864_p5 = scmp.lt.s32.totalorder %s3858_s18, %s5100_s8 }
 0xee7   : > { %3207 = vmatpush.bf16.msra.mxu2 %v3002_v59  ;;  %3220 = vmatpush.bf16.msra.mxu3 %v3010_v60  ;;  %p3860_p1 = scmp.ne.s32.totalorder %s3858_s18, %s3859_s0  ;;  %p3865_p6 = scmp.lt.s32.totalorder %s3863_s25, %s3859_s0 }
 0xee9   : > { %3183 = vmatpush.bf16.msrb.mxu0 %v2984_v3  ;;  %3196 = vmatpush.bf16.msra.mxu1 %v2992_v5  ;;  %p3861_p2 = pnand %p3860_p1, %p4126_p3  ;;  %p3866_p7 = por %p3865_p6, %p3864_p5 }
 0xeeb   : > { %3208 = vmatpush.bf16.msra.mxu2 %v3001_v11  ;;  %3221 = vmatpush.bf16.msra.mxu3 %v3009_v13  ;;  %p3862_p4 = pneg %p3861_p2 }
 0xeec   : > { %3184 = vmatmul.bf16.vlgmr.msrb.gmra.mxu0 %v2884_v19  ;;  %3197 = vmatmul.bf16.vlgmr.msra.gmra.mxu1 %v2885_v20 }
 0xeed   : > { %p3867_p8 = pnand %p3866_p7, %p3862_p4 }
 0xeef   : > { %3209 = vmatpush.bf16.msra.mxu2 %v3000_v21  ;;  %3222 = vmatpush.bf16.msra.mxu3 %v3008_v24 }
 0xef2   : > { %3210 = vmatmul.bf16.vlgmr.msra.gmra.mxu2 %v2886_v23  ;;  %3223 = vmatmul.bf16.vlgmr.msra.gmra.mxu3 %v2887_v26 }
 0xf28   : > { %v3029_v29 = vpop.f32.mrf.mxu0  ;;  %v3042_v30 = vpop.f32.mrf.mxu1 }
 0xf29   : > { %v3030_v36 = vadd.f32 %v3792_v25, %v3029_v29 }
 0xf2b   : > { %v3043_v45 = vadd.f32 %v3042_v30, %v3030_v36 }
 0xf30   : > { %v3031_v15 = vpop.f32.mrf.mxu0  ;;  %v3044_v6 = vpop.f32.mrf.mxu1 }
 0xf35   : > { %v3055_v32 = vpop.f32.mrf.mxu2  ;;  %v3068_v34 = vpop.f32.mrf.mxu3 }
 0xf36   : > { %v3056_v46 = vadd.f32 %v3055_v32, %v3043_v45  ;;  %v3794_v45 = vld [vmem:[%s1120_s29] ss:$0 sm:$0xff] }
 0xf38   : > { %v3069_v50 = vadd.f32 %v3068_v34, %v3056_v46 }
 0xf39   : > { %v3081_v35 = vpop.f32.mrf.mxu0  ;;  %v3094_v37 = vpop.f32.mrf.mxu1 }
 0xf3a   : > { %v3082_v54 = vadd.f32 %v3081_v35, %v3069_v50 }
 0xf3c   : > { %v3095_v56 = vadd.f32 %v3094_v37, %v3082_v54 }
 0xf3d   : > { %v3057_v38 = vpop.f32.mrf.mxu2  ;;  %v3070_v39 = vpop.f32.mrf.mxu3 }
 0xf3e   : > { %v3793_v39 = vld [vmem:[%s1117_s1] ss:$0 sm:$0xff] }
 0xf41   : > { %v3083_v40 = vpop.f32.mrf.mxu0  ;;  %v3096_v41 = vpop.f32.mrf.mxu1 }
 0xf45   : > { %v3107_v43 = vpop.f32.mrf.mxu2  ;;  %v3120_v44 = vpop.f32.mrf.mxu3 }
 0xf46   : > { %v3108_v57 = vadd.f32 %v3107_v43, %v3095_v56 }
 0xf48   : > { %v3121_v58 = vadd.f32 %v3120_v44, %v3108_v57 }
 0xf49   : > { %v3133_v12 = vpop.f32.mrf.mxu0  ;;  %v3146_v51 = vpop.f32.mrf.mxu1 }
 0xf4a   : > { %v3134_v61 = vadd.f32 %v3133_v12, %v3121_v58 }
 0xf4c   : > { %v3147_v62 = vadd.f32 %v3146_v51, %v3134_v61 }
 0xf4d   : > { %v3109_v47 = vpop.f32.mrf.mxu2  ;;  %v3122_v49 = vpop.f32.mrf.mxu3 }
 0xf51   : > { %v3135_v52 = vpop.f32.mrf.mxu0  ;;  %v3148_v53 = vpop.f32.mrf.mxu1 }
 0xf55   : > { %v3159_v55 = vpop.f32.mrf.mxu2  ;;  %v3172_v31 = vpop.f32.mrf.mxu3 }
 0xf56   : > { %v3160_v1 = vadd.f32 %v3159_v55, %v3147_v62 }
 0xf58   : > { %v3173_v2 = vadd.f32 %v3172_v31, %v3160_v1 }
 0xf5d   : > { %v3161_v59 = vpop.f32.mrf.mxu2  ;;  %v3174_v60 = vpop.f32.mrf.mxu3 }
 0xf69   : > { %v3185_v63 = vpop.f32.mrf.mxu0  ;;  %v3198_v0 = vpop.f32.mrf.mxu1 }
 0xf6a   : > { %v3186_v3 = vadd.f32 %v3185_v63, %v3173_v2 }
 0xf6c   : > { %v3199_v8 = vadd.f32 %v3198_v0, %v3186_v3 }
 0xf71   : > { %v3187_v5 = vpop.f32.mrf.mxu0  ;;  %v3200_v7 = vpop.f32.mrf.mxu1 }
 0xf75   : > { %v3211_v9 = vpop.f32.mrf.mxu2  ;;  %v3224_v10 = vpop.f32.mrf.mxu3 }
 0xf76   : > { %v3212_v11 = vadd.f32 %v3211_v9, %v3199_v8 }
 0xf78   : > { %v3225_v13 = vadd.f32 %v3224_v10, %v3212_v11 }
 0xf7a   : > { %v3230_v33 = vadd.f32 %v3225_v13, %v4557_v27 }
 0xf7c   : > { %v3231_v42 = vsel %vm1142_vm1, %v3230_v33, 0.0 }
 0xf7d   : > { %v3213_v14 = vpop.f32.mrf.mxu2  ;;  %v3226_v16 = vpop.f32.mrf.mxu3  ;;  %3232 = vadd.xlane.f32.xlu1 %v3231_v42 }
 0xff0   : > { %v3233_v17 = vpop.xlane.xlu1 %3232 }
 0xff1   : > { %v3234_v18 = vmul.f32 %v3233_v17, %v4376_v28 }
 0xff3   : > { %v3235_v19 = vsub.f32 %v3230_v33, %v3234_v18 }
 0xff5   : > { %v3236_v20 = vmul.f32 %v3235_v19, %v3235_v19  ;;  %v3256_v43 = vmul.f32 %v3793_v39, %v3235_v19 }
 0xff7   : > { %v3237_v21 = vsel %vm1142_vm1, %v3236_v20, 0.0 }
 0xff8   : > { %3238 = vadd.xlane.f32.xlu2 %v3237_v21 }
0x106b   : > { %v3239_v24 = vpop.xlane.xlu2 %3238 }
0x106c   : > { %v3240_v22 = vmul.f32 %v3239_v24, %v4396_v48 }
0x106e   : > { %3839 = vrsqrt.f32 %v3240_v22  ;;  %vm3248_vm3 = vcmp.eq.f32.partialorder %v3240_v22, inf  ;;  %v3251_v28 = vand.u32 2147483648, %v3240_v22  ;;  %vm3250_vm4 = vcmp.eq.f32.partialorder %v3240_v22, 0.0 }
0x1074   : > { %v3840_v4 = vpop.eup %3839 }
0x1075   : > { %v3242_v23 = vmul.f32 %v3840_v4, %v3240_v22 }
0x1077   : > { %v3243_v27 = vmul.f32 %v3840_v4, %v3242_v23 }
0x1079   : > { %v3244_v26 = vmul.f32 0.5, %v3243_v27 }
0x107b   : > { %v3245_v29 = vsub.f32 1.5, %v3244_v26 }
0x107d   : > { %v3246_v30 = vmul.f32 %v3840_v4, %v3245_v29 }
0x107f   : > { %v3247_v15 = vmul.f32 %v3246_v30, %v3240_v22 }
0x1081   : > { %v3249_v6 = vsel %vm3248_vm3, %v3240_v22, %v3247_v15 }
0x1082   : > { %v3252_v32 = vsel %vm3250_vm4, %v3251_v28, %v3249_v6 }
0x1083   : > { %v3257_v34 = vadd.f32 1e-06, %v3252_v32 }
0x1085   : > { %3841 = vrcp.f32 %v3257_v34  ;;  %v3269_v38 = vand.u32 2147483648, %v3257_v34  ;;  %v3267_v40 = vand.u32 2147483647, %v3257_v34  ;;  %vm3263_vm6 = vweird.f32 %v3257_v34 }
0x1087   : > { %v3270_v36 = vor.u32 1.1754944e-38, %v3269_v38  ;;  %vm3268_vm8 = vcmp.eq.f32.partialorder %v3267_v40, 8.507059e+37 }
0x108b   : > { %v3842_v35 = vpop.eup %3841 }
0x108c   : > { %v3259_v37 = vmul.f32 %v3842_v35, %v3257_v34  ;;  %vm3264_vm5 = vweird.f32 %v3842_v35 }
0x108d   : > { %vm3265_vm7 = vmor %vm3263_vm6, %vm3264_vm5 }
0x108e   : > { %v3260_v48 = vsub.f32 1.0, %v3259_v37 }
0x1090   : > { %v3261_v25 = vmul.f32 %v3842_v35, %v3260_v48 }
0x1092   : > { %v3262_v41 = vadd.f32 %v3842_v35, %v3261_v25 }
0x1094   : > { %v3266_v44 = vsel %vm3265_vm7, %v3842_v35, %v3262_v41 }
0x1095   : > { %v3271_v12 = vsel %vm3268_vm8, %v3270_v36, %v3266_v44 }
0x1096   : > { %v3272_v51 = vmul.f32 %v3271_v12, %v3256_v43 }
0x1098   : > { %v3276_v46 = vadd.f32 %v3794_v45, %v3272_v51 }
0x109a   : > { %3277 = vst.msk [vmem:[%s4268_s14] sm:$0xff] %vm1142_vm1, %v3276_v46 }
0x109b   : > { %3870 = shalt.err (!%p3867_p8)
}
0x109c   : > { %3684 = dma.vmem_to_hbm [thread:$0]  (%p4126_p3), %s3292_s30, 128, %s3294_s12, %s3279_s6  }
0x109d PF: > { %s5105_s14 = sld [smem:[#allocation12_spill]] }
0x109e   : > { %s5106_s7 = sld [smem:[#allocation5_spill]] }
0x10a3   : > { %p3690_p10 = scmp.ge.s32.totalorder %s5105_s14, 2 }
0x10a4   : > { %s3305_s17 = sand.u32 1, %s5106_s7  }
0x10a5   : > { %p3687_p11 = pnand %p3690_p10, %p4136_p9  ;;  %s3306_s19 = scalar_lea.sflag [#allocation3], %s3305_s17 }
0x10a7   : > { %p3688_p12 = pneg %p3687_p11 }
0x10a9   : > { %3904 = dma.done.wait (%p3688_p12), %s3306_s19, 128  }
0x10aa   : > { %3906 = vsyncadd (%p3688_p12), %s3306_s19, 4294967168  ;;  %s37_s0 = sadd.s32 1, %s5105_s14   ;;  %s5108_s5 = sld [smem:[#allocation6_spill]] }
0x10ab   : > { %p34_p13 = scmp.ge.s32.totalorder %s37_s0, 6   ;;  %s5109_s26 = sld [smem:[#allocation7_spill]] }
0x10ac   : > { %s5110_s27 = sld [smem:[#allocation17_spill]] }
0x10ad   : > { %s5111_s28 = sld [smem:[#allocation10_spill]]  ;;  %36 = sbr.rel (!%p34_p13) target bundleno = 28 (0x1c), region = 224 }
0x10ae   : > { %s5112_s6 = sld [smem:[#allocation11_spill]] }
0x10af   : > { %s5113_s2 = sld [smem:[#allocation13_spill]] }
0x10b0   : > { %s5114_s29 = sld [smem:[#allocation15_spill]] }
0x10b2   :  { %3312 = vsyncpa [#allocation3], 1 }
0x10b3   :  { %3314 = vsyncpa [#allocation3 + $0x1], 1 }

</bundles_post_ra>
